<compile_context>
chip_gen: v6e
topology: v6e:2x2x1
jax: 0.10.0
libtpu: 0.0.40
codegen_flags: <defaults>
</compile_context>

<pallas_src>
import functools

import jax
import jax.numpy as jnp
from jax import lax
from jax.experimental import pallas as pl
from jax.experimental.pallas import tpu as pltpu


def _double_conv_kernel(x_ref, w1_ref, b1_ref, w2_ref, b2_ref, o_ref, xpad_ref,
                        *, B_t, H, W, Cin, Cout):
    """Fused 3x3/s1/p1 conv -> ReLU -> 3x3/s1/p1 conv -> ReLU for B_t batch elems.

    x_ref:    (B_t, H, W, Cin)       NHWC input block (f32)
    w1_ref:   (9, Cin, Cout)         conv1 weights per tap (tap = kh*3 + kw)
    b1_ref:   (1, Cout)              conv1 bias (f32)
    w2_ref:   (9, Cout, Cout)        conv2 weights per tap, (co, ci) order
    b2_ref:   (Cout, 1)              conv2 bias (f32)
    o_ref:    (B_t, Cout, H*W)       channels-major output (lane-dense last dim)
    xpad_ref: (B_t, H+2, W+2, Cmax)  shared zero-haloed scratch (both stages)
    """
    mm_dtype = xpad_ref.dtype
    Cmax = xpad_ref.shape[-1]
    HW = H * W
    M = B_t * HW

    # ---- halo-only zeroing (interior is fully overwritten below) -------------
    xpad_ref[:, 0:1, :, :] = jnp.zeros((B_t, 1, W + 2, Cmax), mm_dtype)
    xpad_ref[:, H + 1:H + 2, :, :] = jnp.zeros((B_t, 1, W + 2, Cmax), mm_dtype)
    xpad_ref[:, 1:H + 1, 0:1, :] = jnp.zeros((B_t, H, 1, Cmax), mm_dtype)
    xpad_ref[:, 1:H + 1, W + 1:W + 2, :] = jnp.zeros((B_t, H, 1, Cmax), mm_dtype)

    # ---- conv1: 9 shifted matmul-accumulates directly from the padded scratch
    xpad_ref[:, 1:H + 1, 1:W + 1, :Cin] = x_ref[...].astype(mm_dtype)

    acc1 = jnp.zeros((M, Cout), jnp.float32)
    for kh in range(3):
        for kw in range(3):
            tap = kh * 3 + kw
            patch = xpad_ref[:, kh:kh + H, kw:kw + W, :Cin].reshape(M, Cin)
            acc1 = acc1 + jnp.dot(patch, w1_ref[tap],
                                  preferred_element_type=jnp.float32)
    h1 = jnp.maximum(acc1 + b1_ref[...], 0.0)              # (M, Cout), f32

    # ---- conv2: intermediate stays in the SAME VMEM scratch (no HBM roundtrip)
    xpad_ref[:, 1:H + 1, 1:W + 1, :Cout] = (
        h1.reshape(B_t, H, W, Cout).astype(mm_dtype))

    acc2 = jnp.zeros((Cout, M), jnp.float32)
    for kh in range(3):
        for kw in range(3):
            tap = kh * 3 + kw
            patch = xpad_ref[:, kh:kh + H, kw:kw + W, :Cout].reshape(M, Cout)
            # (Cout, C) x (M, C) contracted over C -> (Cout, M): channels-major,
            # so the output store is lane-dense (last dim H*W, multiple of 128).
            acc2 = acc2 + lax.dot_general(
                w2_ref[tap], patch,
                dimension_numbers=(((1,), (1,)), ((), ())),
                preferred_element_type=jnp.float32)
    h2 = jnp.maximum(acc2 + b2_ref[...], 0.0)               # (Cout, M), f32

    for b in range(B_t):                                    # static, small
        o_ref[b] = h2[:, b * HW:(b + 1) * HW].astype(o_ref.dtype)


def double_conv_forward(x_nchw, params, *, matmul_dtype=jnp.float32):
    """DoubleConv forward. x_nchw: (N, Cin, H, W) -> (N, Cout, H, W)."""
    w1, b1, w2, b2 = params
    N, Cin, H, W = x_nchw.shape
    Cout = w1.shape[0]
    Cmax = max(Cin, Cout)
    HW = H * W

    # Single layout change at the module boundary (channels onto lanes).  The
    # kernel emits channels-major output, so the NCHW result is a free reshape.
    x_nhwc = jnp.transpose(x_nchw, (0, 2, 3, 1))

    # OIHW -> per-tap weight slabs (tap = kh*3 + kw).
    w1r = jnp.transpose(w1, (2, 3, 1, 0)).reshape(9, Cin, Cout).astype(matmul_dtype)
    w2r = jnp.transpose(w2, (2, 3, 0, 1)).reshape(9, Cout, Cout).astype(matmul_dtype)
    b1r = b1.reshape(1, Cout).astype(jnp.float32)
    b2r = b2.reshape(Cout, 1).astype(jnp.float32)

    mm_bytes = jnp.dtype(matmul_dtype).itemsize

    # ---- VMEM budget -> batch tile + vmem_limit_bytes -------------------------
    try:
        vmem_cap = int(pltpu.get_tpu_info().vmem_capacity_bytes)
    except Exception:
        vmem_cap = 64 * 1024 * 1024          # conservative (v7x per-TC)

    def vmem_estimate(bt):
        scratch = bt * (H + 2) * (W + 2) * Cmax * mm_bytes
        blocks = 2 * bt * H * W * Cin * 4 + 2 * bt * Cout * HW * 4  # dbl-buffered
        weights = 2 * (9 * Cin * Cout + 9 * Cout * Cout) * mm_bytes
        live = 3 * bt * HW * Cout * 4        # acc1 / h1 / acc2 live values
        return scratch + blocks + weights + live

    budget = int(0.4 * vmem_cap)
    B_t = 1
    for bt in range(1, N + 1):
        if N % bt == 0 and vmem_estimate(bt) <= budget:
            B_t = bt
    # Keep >= 2 grid steps when N >= 2 so a 2-TC chip (v7x) shards the 'parallel'
    # batch axis across both cores.
    while B_t > 1 and N // B_t < 2:
        B_t -= 1
        while N % B_t:
            B_t -= 1

    vmem_limit = int(min(0.75 * vmem_cap,
                         max(32 * 1024 * 1024, 2 * vmem_estimate(B_t))))

    kernel = functools.partial(_double_conv_kernel,
                               B_t=B_t, H=H, W=W, Cin=Cin, Cout=Cout)

    out = pl.pallas_call(
        kernel,
        out_shape=jax.ShapeDtypeStruct((N, Cout, HW), x_nchw.dtype),
        grid_spec=pltpu.PrefetchScalarGridSpec(
            num_scalar_prefetch=0,
            grid=(N // B_t,),
            in_specs=[
                pl.BlockSpec((B_t, H, W, Cin), lambda n: (n, 0, 0, 0)),
                pl.BlockSpec((9, Cin, Cout), lambda n: (0, 0, 0)),
                pl.BlockSpec((1, Cout), lambda n: (0, 0)),
                pl.BlockSpec((9, Cout, Cout), lambda n: (0, 0, 0)),
                pl.BlockSpec((Cout, 1), lambda n: (0, 0)),
            ],
            out_specs=pl.BlockSpec((B_t, Cout, HW), lambda n: (n, 0, 0)),
            scratch_shapes=[
                # One shared padded buffer for both conv stages (reuse instead of
                # separate stage-1/stage-2 allocations).
                pltpu.VMEM((B_t, H + 2, W + 2, Cmax), matmul_dtype),
            ],
        ),
        compiler_params=pltpu.CompilerParams(
            dimension_semantics=("parallel",),
            vmem_limit_bytes=vmem_limit,
        ),
    )(x_nhwc, w1r, b1r, w2r, b2r)

    # (N, Cout, H*W) -> (N, Cout, H, W): NCHW with no data movement.
    return out.reshape(N, Cout, H, W)


def init_params(key, in_channels, out_channels):
    k1, k2, k3, k4 = jax.random.split(key, 4)
    bound1 = 1.0 / (in_channels * 9) ** 0.5
    bound2 = 1.0 / (out_channels * 9) ** 0.5
    w1 = jax.random.uniform(k1, (out_channels, in_channels, 3, 3),
                            jnp.float32, -bound1, bound1)
    b1 = jax.random.uniform(k2, (out_channels,), jnp.float32, -bound1, bound1)
    w2 = jax.random.uniform(k3, (out_channels, out_channels, 3, 3),
                            jnp.float32, -bound2, bound2)
    b2 = jax.random.uniform(k4, (out_channels,), jnp.float32, -bound2, bound2)
    return (w1, b1, w2, b2)


def _reference(x_nchw, params):
    """Pure-JAX reference (NCHW conv) for correctness checking."""
    w1, b1, w2, b2 = params
    dn = lax.conv_dimension_numbers(x_nchw.shape, w1.shape,
                                    ("NCHW", "OIHW", "NCHW"))
    y = lax.conv_general_dilated(x_nchw, w1, (1, 1), ((1, 1), (1, 1)),
                                 dimension_numbers=dn)
    y = jnp.maximum(y + b1[None, :, None, None], 0.0)
    y = lax.conv_general_dilated(y, w2, (1, 1), ((1, 1), (1, 1)),
                                 dimension_numbers=dn)
    y = jnp.maximum(y + b2[None, :, None, None], 0.0)
    return y


if __name__ == "__main__":
    key = jax.random.PRNGKey(0)
    kx, kp = jax.random.split(key)

    N, Cin, Cout, H, W = 2, 4, 8, 16, 16
    x = jax.random.normal(kx, (N, Cin, H, W), jnp.float32)
    params = init_params(kp, Cin, Cout)

    ref = _reference(x, params)

    # f32 matmul path: exact parity with the reference.
    out = jax.block_until_ready(double_conv_forward(x, params))
    assert out.shape == (N, Cout, H, W)
    assert jnp.allclose(out, ref, atol=1e-4, rtol=1e-4), \
        float(jnp.max(jnp.abs(out - ref)))

    # bf16 matmul operands (f32 accumulation): ~2x MXU throughput on v6e/v7x;
    # tolerance is necessarily looser than the f32 path.
    out_bf16 = jax.block_until_ready(
        double_conv_forward(x, params, matmul_dtype=jnp.bfloat16))
    assert float(jnp.max(jnp.abs(out_bf16 - ref))) < 0.25

    print("KERNEL_OK")
</pallas_src>

<mosaic_0001>
module attributes {stable_mosaic.version = 11 : i64} {
  func.func @_double_conv_kernel(%arg0: i32, %arg1: memref<1x16x16x4xf32, #tpu.memory_space<vmem>>, %arg2: memref<9x4x8xf32, #tpu.memory_space<vmem>>, %arg3: memref<1x8xf32, #tpu.memory_space<vmem>>, %arg4: memref<9x8x8xf32, #tpu.memory_space<vmem>>, %arg5: memref<8x1xf32, #tpu.memory_space<vmem>>, %arg6: memref<1x8x256xf32, #tpu.memory_space<vmem>>, %arg7: memref<1x18x18x8xf32, #tpu.memory_space<vmem>>) attributes {dimension_semantics = [#tpu.dimension_semantics<parallel>], iteration_bounds = array<i64: 2>, scalar_prefetch = 0 : i64, scratch_operands = 1 : i64, tpu.core_type = #tpu.core_type<tc>, window_params = [{transform_indices = @transform_0, window_bounds = array<i64: 1, 16, 16, 4>}, {pipeline_mode = #tpu.pipeline_mode<synchronous>, transform_indices = @transform_1, window_bounds = array<i64: 9, 4, 8>}, {pipeline_mode = #tpu.pipeline_mode<synchronous>, transform_indices = @transform_2, window_bounds = array<i64: 1, 8>}, {pipeline_mode = #tpu.pipeline_mode<synchronous>, transform_indices = @transform_3, window_bounds = array<i64: 9, 8, 8>}, {pipeline_mode = #tpu.pipeline_mode<synchronous>, transform_indices = @transform_4, window_bounds = array<i64: 8, 1>}, {transform_indices = @transform_5, window_bounds = array<i64: 1, 8, 256>}]} {
    %cst = arith.constant 0.000000e+00 : f32
    %0 = vector.broadcast %cst : f32 to vector<1x1x18x8xf32>
    %c0 = arith.constant 0 : index
    %c0_0 = arith.constant 0 : index
    %c0_1 = arith.constant 0 : index
    %c0_2 = arith.constant 0 : index
    %1 = vector.load %arg7[%c0, %c0_0, %c0_1, %c0_2] : memref<1x18x18x8xf32, #tpu.memory_space<vmem>>, vector<1x1x18x8xf32>
    tpu.vector_store %arg7[%c0, %c0_0, %c0_1, %c0_2], %0 {strides = array<i32>} : memref<1x18x18x8xf32, #tpu.memory_space<vmem>>, vector<1x1x18x8xf32>,
    %cst_3 = arith.constant 0.000000e+00 : f32
    %2 = vector.broadcast %cst_3 : f32 to vector<1x1x18x8xf32>
    %c0_4 = arith.constant 0 : index
    %c17 = arith.constant 17 : index
    %c0_5 = arith.constant 0 : index
    %c0_6 = arith.constant 0 : index
    %3 = vector.load %arg7[%c0_4, %c17, %c0_5, %c0_6] : memref<1x18x18x8xf32, #tpu.memory_space<vmem>>, vector<1x1x18x8xf32>
    tpu.vector_store %arg7[%c0_4, %c17, %c0_5, %c0_6], %2 {strides = array<i32>} : memref<1x18x18x8xf32, #tpu.memory_space<vmem>>, vector<1x1x18x8xf32>,
    %cst_7 = arith.constant 0.000000e+00 : f32
    %4 = vector.broadcast %cst_7 : f32 to vector<1x16x1x8xf32>
    %c0_8 = arith.constant 0 : index
    %c1 = arith.constant 1 : index
    %c0_9 = arith.constant 0 : index
    %c0_10 = arith.constant 0 : index
    %5 = vector.load %arg7[%c0_8, %c1, %c0_9, %c0_10] : memref<1x18x18x8xf32, #tpu.memory_space<vmem>>, vector<1x16x1x8xf32>
    tpu.vector_store %arg7[%c0_8, %c1, %c0_9, %c0_10], %4 {strides = array<i32>} : memref<1x18x18x8xf32, #tpu.memory_space<vmem>>, vector<1x16x1x8xf32>,
    %cst_11 = arith.constant 0.000000e+00 : f32
    %6 = vector.broadcast %cst_11 : f32 to vector<1x16x1x8xf32>
    %c0_12 = arith.constant 0 : index
    %c1_13 = arith.constant 1 : index
    %c17_14 = arith.constant 17 : index
    %c0_15 = arith.constant 0 : index
    %7 = vector.load %arg7[%c0_12, %c1_13, %c17_14, %c0_15] : memref<1x18x18x8xf32, #tpu.memory_space<vmem>>, vector<1x16x1x8xf32>
    tpu.vector_store %arg7[%c0_12, %c1_13, %c17_14, %c0_15], %6 {strides = array<i32>} : memref<1x18x18x8xf32, #tpu.memory_space<vmem>>, vector<1x16x1x8xf32>,
    %c0_16 = arith.constant 0 : index
    %c0_17 = arith.constant 0 : index
    %c0_18 = arith.constant 0 : index
    %c0_19 = arith.constant 0 : index
    %8 = vector.load %arg1[%c0_16, %c0_17, %c0_18, %c0_19] : memref<1x16x16x4xf32, #tpu.memory_space<vmem>>, vector<1x16x16x4xf32>
    %c0_20 = arith.constant 0 : index
    %c1_21 = arith.constant 1 : index
    %c1_22 = arith.constant 1 : index
    %c0_23 = arith.constant 0 : index
    %9 = vector.load %arg7[%c0_20, %c1_21, %c1_22, %c0_23] : memref<1x18x18x8xf32, #tpu.memory_space<vmem>>, vector<1x16x16x4xf32>
    tpu.vector_store %arg7[%c0_20, %c1_21, %c1_22, %c0_23], %8 {strides = array<i32>} : memref<1x18x18x8xf32, #tpu.memory_space<vmem>>, vector<1x16x16x4xf32>,
    %cst_24 = arith.constant 0.000000e+00 : f32
    %10 = vector.broadcast %cst_24 : f32 to vector<256x8xf32>
    %c0_25 = arith.constant 0 : index
    %c0_26 = arith.constant 0 : index
    %c0_27 = arith.constant 0 : index
    %c0_28 = arith.constant 0 : index
    %11 = vector.load %arg7[%c0_25, %c0_26, %c0_27, %c0_28] : memref<1x18x18x8xf32, #tpu.memory_space<vmem>>, vector<1x16x16x4xf32>
    %12 = vector.shape_cast %11 : vector<1x16x16x4xf32> to vector<256x4xf32>
    %c0_29 = arith.constant 0 : index
    %c0_30 = arith.constant 0 : index
    %c0_31 = arith.constant 0 : index
    %13 = vector.load %arg2[%c0_29, %c0_30, %c0_31] : memref<9x4x8xf32, #tpu.memory_space<vmem>>, vector<1x4x8xf32>
    %14 = vector.shape_cast %13 : vector<1x4x8xf32> to vector<4x8xf32>
    %cst_32 = arith.constant dense<0.000000e+00> : vector<256x8xf32>
    %15 = tpu.matmul %12, %14, %cst_32 {dimension_numbers = #tpu.dot_dimension_numbers<[1], [0], [0], [1], [0, 0, 1, 1], [], []>} : vector<256x4xf32>, vector<4x8xf32>, vector<256x8xf32> -> vector<256x8xf32>
    %16 = arith.addf %10, %15 : vector<256x8xf32>
    %c0_33 = arith.constant 0 : index
    %c0_34 = arith.constant 0 : index
    %c1_35 = arith.constant 1 : index
    %c0_36 = arith.constant 0 : index
    %17 = vector.load %arg7[%c0_33, %c0_34, %c1_35, %c0_36] : memref<1x18x18x8xf32, #tpu.memory_space<vmem>>, vector<1x16x16x4xf32>
    %18 = vector.shape_cast %17 : vector<1x16x16x4xf32> to vector<256x4xf32>
    %c1_37 = arith.constant 1 : index
    %c0_38 = arith.constant 0 : index
    %c0_39 = arith.constant 0 : index
    %19 = vector.load %arg2[%c1_37, %c0_38, %c0_39] : memref<9x4x8xf32, #tpu.memory_space<vmem>>, vector<1x4x8xf32>
    %20 = vector.shape_cast %19 : vector<1x4x8xf32> to vector<4x8xf32>
    %cst_40 = arith.constant dense<0.000000e+00> : vector<256x8xf32>
    %21 = tpu.matmul %18, %20, %cst_40 {dimension_numbers = #tpu.dot_dimension_numbers<[1], [0], [0], [1], [0, 0, 1, 1], [], []>} : vector<256x4xf32>, vector<4x8xf32>, vector<256x8xf32> -> vector<256x8xf32>
    %22 = arith.addf %16, %21 : vector<256x8xf32>
    %c0_41 = arith.constant 0 : index
    %c0_42 = arith.constant 0 : index
    %c2 = arith.constant 2 : index
    %c0_43 = arith.constant 0 : index
    %23 = vector.load %arg7[%c0_41, %c0_42, %c2, %c0_43] : memref<1x18x18x8xf32, #tpu.memory_space<vmem>>, vector<1x16x16x4xf32>
    %24 = vector.shape_cast %23 : vector<1x16x16x4xf32> to vector<256x4xf32>
    %c2_44 = arith.constant 2 : index
    %c0_45 = arith.constant 0 : index
    %c0_46 = arith.constant 0 : index
    %25 = vector.load %arg2[%c2_44, %c0_45, %c0_46] : memref<9x4x8xf32, #tpu.memory_space<vmem>>, vector<1x4x8xf32>
    %26 = vector.shape_cast %25 : vector<1x4x8xf32> to vector<4x8xf32>
    %cst_47 = arith.constant dense<0.000000e+00> : vector<256x8xf32>
    %27 = tpu.matmul %24, %26, %cst_47 {dimension_numbers = #tpu.dot_dimension_numbers<[1], [0], [0], [1], [0, 0, 1, 1], [], []>} : vector<256x4xf32>, vector<4x8xf32>, vector<256x8xf32> -> vector<256x8xf32>
    %28 = arith.addf %22, %27 : vector<256x8xf32>
    %c0_48 = arith.constant 0 : index
    %c1_49 = arith.constant 1 : index
    %c0_50 = arith.constant 0 : index
    %c0_51 = arith.constant 0 : index
    %29 = vector.load %arg7[%c0_48, %c1_49, %c0_50, %c0_51] : memref<1x18x18x8xf32, #tpu.memory_space<vmem>>, vector<1x16x16x4xf32>
    %30 = vector.shape_cast %29 : vector<1x16x16x4xf32> to vector<256x4xf32>
    %c3 = arith.constant 3 : index
    %c0_52 = arith.constant 0 : index
    %c0_53 = arith.constant 0 : index
    %31 = vector.load %arg2[%c3, %c0_52, %c0_53] : memref<9x4x8xf32, #tpu.memory_space<vmem>>, vector<1x4x8xf32>
    %32 = vector.shape_cast %31 : vector<1x4x8xf32> to vector<4x8xf32>
    %cst_54 = arith.constant dense<0.000000e+00> : vector<256x8xf32>
    %33 = tpu.matmul %30, %32, %cst_54 {dimension_numbers = #tpu.dot_dimension_numbers<[1], [0], [0], [1], [0, 0, 1, 1], [], []>} : vector<256x4xf32>, vector<4x8xf32>, vector<256x8xf32> -> vector<256x8xf32>
    %34 = arith.addf %28, %33 : vector<256x8xf32>
    %c0_55 = arith.constant 0 : index
    %c1_56 = arith.constant 1 : index
    %c1_57 = arith.constant 1 : index
    %c0_58 = arith.constant 0 : index
    %35 = vector.load %arg7[%c0_55, %c1_56, %c1_57, %c0_58] : memref<1x18x18x8xf32, #tpu.memory_space<vmem>>, vector<1x16x16x4xf32>
    %36 = vector.shape_cast %35 : vector<1x16x16x4xf32> to vector<256x4xf32>
    %c4 = arith.constant 4 : index
    %c0_59 = arith.constant 0 : index
    %c0_60 = arith.constant 0 : index
    %37 = vector.load %arg2[%c4, %c0_59, %c0_60] : memref<9x4x8xf32, #tpu.memory_space<vmem>>, vector<1x4x8xf32>
    %38 = vector.shape_cast %37 : vector<1x4x8xf32> to vector<4x8xf32>
    %cst_61 = arith.constant dense<0.000000e+00> : vector<256x8xf32>
    %39 = tpu.matmul %36, %38, %cst_61 {dimension_numbers = #tpu.dot_dimension_numbers<[1], [0], [0], [1], [0, 0, 1, 1], [], []>} : vector<256x4xf32>, vector<4x8xf32>, vector<256x8xf32> -> vector<256x8xf32>
    %40 = arith.addf %34, %39 : vector<256x8xf32>
    %c0_62 = arith.constant 0 : index
    %c1_63 = arith.constant 1 : index
    %c2_64 = arith.constant 2 : index
    %c0_65 = arith.constant 0 : index
    %41 = vector.load %arg7[%c0_62, %c1_63, %c2_64, %c0_65] : memref<1x18x18x8xf32, #tpu.memory_space<vmem>>, vector<1x16x16x4xf32>
    %42 = vector.shape_cast %41 : vector<1x16x16x4xf32> to vector<256x4xf32>
    %c5 = arith.constant 5 : index
    %c0_66 = arith.constant 0 : index
    %c0_67 = arith.constant 0 : index
    %43 = vector.load %arg2[%c5, %c0_66, %c0_67] : memref<9x4x8xf32, #tpu.memory_space<vmem>>, vector<1x4x8xf32>
    %44 = vector.shape_cast %43 : vector<1x4x8xf32> to vector<4x8xf32>
    %cst_68 = arith.constant dense<0.000000e+00> : vector<256x8xf32>
    %45 = tpu.matmul %42, %44, %cst_68 {dimension_numbers = #tpu.dot_dimension_numbers<[1], [0], [0], [1], [0, 0, 1, 1], [], []>} : vector<256x4xf32>, vector<4x8xf32>, vector<256x8xf32> -> vector<256x8xf32>
    %46 = arith.addf %40, %45 : vector<256x8xf32>
    %c0_69 = arith.constant 0 : index
    %c2_70 = arith.constant 2 : index
    %c0_71 = arith.constant 0 : index
    %c0_72 = arith.constant 0 : index
    %47 = vector.load %arg7[%c0_69, %c2_70, %c0_71, %c0_72] : memref<1x18x18x8xf32, #tpu.memory_space<vmem>>, vector<1x16x16x4xf32>
    %48 = vector.shape_cast %47 : vector<1x16x16x4xf32> to vector<256x4xf32>
    %c6 = arith.constant 6 : index
    %c0_73 = arith.constant 0 : index
    %c0_74 = arith.constant 0 : index
    %49 = vector.load %arg2[%c6, %c0_73, %c0_74] : memref<9x4x8xf32, #tpu.memory_space<vmem>>, vector<1x4x8xf32>
    %50 = vector.shape_cast %49 : vector<1x4x8xf32> to vector<4x8xf32>
    %cst_75 = arith.constant dense<0.000000e+00> : vector<256x8xf32>
    %51 = tpu.matmul %48, %50, %cst_75 {dimension_numbers = #tpu.dot_dimension_numbers<[1], [0], [0], [1], [0, 0, 1, 1], [], []>} : vector<256x4xf32>, vector<4x8xf32>, vector<256x8xf32> -> vector<256x8xf32>
    %52 = arith.addf %46, %51 : vector<256x8xf32>
    %c0_76 = arith.constant 0 : index
    %c2_77 = arith.constant 2 : index
    %c1_78 = arith.constant 1 : index
    %c0_79 = arith.constant 0 : index
    %53 = vector.load %arg7[%c0_76, %c2_77, %c1_78, %c0_79] : memref<1x18x18x8xf32, #tpu.memory_space<vmem>>, vector<1x16x16x4xf32>
    %54 = vector.shape_cast %53 : vector<1x16x16x4xf32> to vector<256x4xf32>
    %c7 = arith.constant 7 : index
    %c0_80 = arith.constant 0 : index
    %c0_81 = arith.constant 0 : index
    %55 = vector.load %arg2[%c7, %c0_80, %c0_81] : memref<9x4x8xf32, #tpu.memory_space<vmem>>, vector<1x4x8xf32>
    %56 = vector.shape_cast %55 : vector<1x4x8xf32> to vector<4x8xf32>
    %cst_82 = arith.constant dense<0.000000e+00> : vector<256x8xf32>
    %57 = tpu.matmul %54, %56, %cst_82 {dimension_numbers = #tpu.dot_dimension_numbers<[1], [0], [0], [1], [0, 0, 1, 1], [], []>} : vector<256x4xf32>, vector<4x8xf32>, vector<256x8xf32> -> vector<256x8xf32>
    %58 = arith.addf %52, %57 : vector<256x8xf32>
    %c0_83 = arith.constant 0 : index
    %c2_84 = arith.constant 2 : index
    %c2_85 = arith.constant 2 : index
    %c0_86 = arith.constant 0 : index
    %59 = vector.load %arg7[%c0_83, %c2_84, %c2_85, %c0_86] : memref<1x18x18x8xf32, #tpu.memory_space<vmem>>, vector<1x16x16x4xf32>
    %60 = vector.shape_cast %59 : vector<1x16x16x4xf32> to vector<256x4xf32>
    %c8 = arith.constant 8 : index
    %c0_87 = arith.constant 0 : index
    %c0_88 = arith.constant 0 : index
    %61 = vector.load %arg2[%c8, %c0_87, %c0_88] : memref<9x4x8xf32, #tpu.memory_space<vmem>>, vector<1x4x8xf32>
    %62 = vector.shape_cast %61 : vector<1x4x8xf32> to vector<4x8xf32>
    %cst_89 = arith.constant dense<0.000000e+00> : vector<256x8xf32>
    %63 = tpu.matmul %60, %62, %cst_89 {dimension_numbers = #tpu.dot_dimension_numbers<[1], [0], [0], [1], [0, 0, 1, 1], [], []>} : vector<256x4xf32>, vector<4x8xf32>, vector<256x8xf32> -> vector<256x8xf32>
    %64 = arith.addf %58, %63 : vector<256x8xf32>
    %c0_90 = arith.constant 0 : index
    %c0_91 = arith.constant 0 : index
    %65 = vector.load %arg3[%c0_90, %c0_91] : memref<1x8xf32, #tpu.memory_space<vmem>>, vector<1x8xf32>
    %66 = vector.broadcast %65 : vector<1x8xf32> to vector<256x8xf32>
    %67 = arith.addf %64, %66 : vector<256x8xf32>
    %cst_92 = arith.constant 0.000000e+00 : f32
    %68 = vector.broadcast %cst_92 : f32 to vector<256x8xf32>
    %69 = arith.maximumf %67, %68 : vector<256x8xf32>
    %70 = vector.shape_cast %69 : vector<256x8xf32> to vector<1x16x16x8xf32>
    %c0_93 = arith.constant 0 : index
    %c1_94 = arith.constant 1 : index
    %c1_95 = arith.constant 1 : index
    %c0_96 = arith.constant 0 : index
    %71 = vector.load %arg7[%c0_93, %c1_94, %c1_95, %c0_96] : memref<1x18x18x8xf32, #tpu.memory_space<vmem>>, vector<1x16x16x8xf32>
    tpu.vector_store %arg7[%c0_93, %c1_94, %c1_95, %c0_96], %70 {strides = array<i32>} : memref<1x18x18x8xf32, #tpu.memory_space<vmem>>, vector<1x16x16x8xf32>,
    %cst_97 = arith.constant 0.000000e+00 : f32
    %72 = vector.broadcast %cst_97 : f32 to vector<8x256xf32>
    %c0_98 = arith.constant 0 : index
    %c0_99 = arith.constant 0 : index
    %c0_100 = arith.constant 0 : index
    %c0_101 = arith.constant 0 : index
    %73 = vector.load %arg7[%c0_98, %c0_99, %c0_100, %c0_101] : memref<1x18x18x8xf32, #tpu.memory_space<vmem>>, vector<1x16x16x8xf32>
    %74 = vector.shape_cast %73 : vector<1x16x16x8xf32> to vector<256x8xf32>
    %c0_102 = arith.constant 0 : index
    %c0_103 = arith.constant 0 : index
    %c0_104 = arith.constant 0 : index
    %75 = vector.load %arg4[%c0_102, %c0_103, %c0_104] : memref<9x8x8xf32, #tpu.memory_space<vmem>>, vector<1x8x8xf32>
    %76 = vector.shape_cast %75 : vector<1x8x8xf32> to vector<8x8xf32>
    %cst_105 = arith.constant dense<0.000000e+00> : vector<8x256xf32>
    %77 = tpu.matmul %76, %74, %cst_105 {dimension_numbers = #tpu.dot_dimension_numbers<[1], [1], [0], [0], [0, 0, 1, 0], [], []>} : vector<8x8xf32>, vector<256x8xf32>, vector<8x256xf32> -> vector<8x256xf32>
    %78 = arith.addf %72, %77 : vector<8x256xf32>
    %c0_106 = arith.constant 0 : index
    %c0_107 = arith.constant 0 : index
    %c1_108 = arith.constant 1 : index
    %c0_109 = arith.constant 0 : index
    %79 = vector.load %arg7[%c0_106, %c0_107, %c1_108, %c0_109] : memref<1x18x18x8xf32, #tpu.memory_space<vmem>>, vector<1x16x16x8xf32>
    %80 = vector.shape_cast %79 : vector<1x16x16x8xf32> to vector<256x8xf32>
    %c1_110 = arith.constant 1 : index
    %c0_111 = arith.constant 0 : index
    %c0_112 = arith.constant 0 : index
    %81 = vector.load %arg4[%c1_110, %c0_111, %c0_112] : memref<9x8x8xf32, #tpu.memory_space<vmem>>, vector<1x8x8xf32>
    %82 = vector.shape_cast %81 : vector<1x8x8xf32> to vector<8x8xf32>
    %cst_113 = arith.constant dense<0.000000e+00> : vector<8x256xf32>
    %83 = tpu.matmul %82, %80, %cst_113 {dimension_numbers = #tpu.dot_dimension_numbers<[1], [1], [0], [0], [0, 0, 1, 0], [], []>} : vector<8x8xf32>, vector<256x8xf32>, vector<8x256xf32> -> vector<8x256xf32>
    %84 = arith.addf %78, %83 : vector<8x256xf32>
    %c0_114 = arith.constant 0 : index
    %c0_115 = arith.constant 0 : index
    %c2_116 = arith.constant 2 : index
    %c0_117 = arith.constant 0 : index
    %85 = vector.load %arg7[%c0_114, %c0_115, %c2_116, %c0_117] : memref<1x18x18x8xf32, #tpu.memory_space<vmem>>, vector<1x16x16x8xf32>
    %86 = vector.shape_cast %85 : vector<1x16x16x8xf32> to vector<256x8xf32>
    %c2_118 = arith.constant 2 : index
    %c0_119 = arith.constant 0 : index
    %c0_120 = arith.constant 0 : index
    %87 = vector.load %arg4[%c2_118, %c0_119, %c0_120] : memref<9x8x8xf32, #tpu.memory_space<vmem>>, vector<1x8x8xf32>
    %88 = vector.shape_cast %87 : vector<1x8x8xf32> to vector<8x8xf32>
    %cst_121 = arith.constant dense<0.000000e+00> : vector<8x256xf32>
    %89 = tpu.matmul %88, %86, %cst_121 {dimension_numbers = #tpu.dot_dimension_numbers<[1], [1], [0], [0], [0, 0, 1, 0], [], []>} : vector<8x8xf32>, vector<256x8xf32>, vector<8x256xf32> -> vector<8x256xf32>
    %90 = arith.addf %84, %89 : vector<8x256xf32>
    %c0_122 = arith.constant 0 : index
    %c1_123 = arith.constant 1 : index
    %c0_124 = arith.constant 0 : index
    %c0_125 = arith.constant 0 : index
    %91 = vector.load %arg7[%c0_122, %c1_123, %c0_124, %c0_125] : memref<1x18x18x8xf32, #tpu.memory_space<vmem>>, vector<1x16x16x8xf32>
    %92 = vector.shape_cast %91 : vector<1x16x16x8xf32> to vector<256x8xf32>
    %c3_126 = arith.constant 3 : index
    %c0_127 = arith.constant 0 : index
    %c0_128 = arith.constant 0 : index
    %93 = vector.load %arg4[%c3_126, %c0_127, %c0_128] : memref<9x8x8xf32, #tpu.memory_space<vmem>>, vector<1x8x8xf32>
    %94 = vector.shape_cast %93 : vector<1x8x8xf32> to vector<8x8xf32>
    %cst_129 = arith.constant dense<0.000000e+00> : vector<8x256xf32>
    %95 = tpu.matmul %94, %92, %cst_129 {dimension_numbers = #tpu.dot_dimension_numbers<[1], [1], [0], [0], [0, 0, 1, 0], [], []>} : vector<8x8xf32>, vector<256x8xf32>, vector<8x256xf32> -> vector<8x256xf32>
    %96 = arith.addf %90, %95 : vector<8x256xf32>
    %c0_130 = arith.constant 0 : index
    %c1_131 = arith.constant 1 : index
    %c1_132 = arith.constant 1 : index
    %c0_133 = arith.constant 0 : index
    %97 = vector.load %arg7[%c0_130, %c1_131, %c1_132, %c0_133] : memref<1x18x18x8xf32, #tpu.memory_space<vmem>>, vector<1x16x16x8xf32>
    %98 = vector.shape_cast %97 : vector<1x16x16x8xf32> to vector<256x8xf32>
    %c4_134 = arith.constant 4 : index
    %c0_135 = arith.constant 0 : index
    %c0_136 = arith.constant 0 : index
    %99 = vector.load %arg4[%c4_134, %c0_135, %c0_136] : memref<9x8x8xf32, #tpu.memory_space<vmem>>, vector<1x8x8xf32>
    %100 = vector.shape_cast %99 : vector<1x8x8xf32> to vector<8x8xf32>
    %cst_137 = arith.constant dense<0.000000e+00> : vector<8x256xf32>
    %101 = tpu.matmul %100, %98, %cst_137 {dimension_numbers = #tpu.dot_dimension_numbers<[1], [1], [0], [0], [0, 0, 1, 0], [], []>} : vector<8x8xf32>, vector<256x8xf32>, vector<8x256xf32> -> vector<8x256xf32>
    %102 = arith.addf %96, %101 : vector<8x256xf32>
    %c0_138 = arith.constant 0 : index
    %c1_139 = arith.constant 1 : index
    %c2_140 = arith.constant 2 : index
    %c0_141 = arith.constant 0 : index
    %103 = vector.load %arg7[%c0_138, %c1_139, %c2_140, %c0_141] : memref<1x18x18x8xf32, #tpu.memory_space<vmem>>, vector<1x16x16x8xf32>
    %104 = vector.shape_cast %103 : vector<1x16x16x8xf32> to vector<256x8xf32>
    %c5_142 = arith.constant 5 : index
    %c0_143 = arith.constant 0 : index
    %c0_144 = arith.constant 0 : index
    %105 = vector.load %arg4[%c5_142, %c0_143, %c0_144] : memref<9x8x8xf32, #tpu.memory_space<vmem>>, vector<1x8x8xf32>
    %106 = vector.shape_cast %105 : vector<1x8x8xf32> to vector<8x8xf32>
    %cst_145 = arith.constant dense<0.000000e+00> : vector<8x256xf32>
    %107 = tpu.matmul %106, %104, %cst_145 {dimension_numbers = #tpu.dot_dimension_numbers<[1], [1], [0], [0], [0, 0, 1, 0], [], []>} : vector<8x8xf32>, vector<256x8xf32>, vector<8x256xf32> -> vector<8x256xf32>
    %108 = arith.addf %102, %107 : vector<8x256xf32>
    %c0_146 = arith.constant 0 : index
    %c2_147 = arith.constant 2 : index
    %c0_148 = arith.constant 0 : index
    %c0_149 = arith.constant 0 : index
    %109 = vector.load %arg7[%c0_146, %c2_147, %c0_148, %c0_149] : memref<1x18x18x8xf32, #tpu.memory_space<vmem>>, vector<1x16x16x8xf32>
    %110 = vector.shape_cast %109 : vector<1x16x16x8xf32> to vector<256x8xf32>
    %c6_150 = arith.constant 6 : index
    %c0_151 = arith.constant 0 : index
    %c0_152 = arith.constant 0 : index
    %111 = vector.load %arg4[%c6_150, %c0_151, %c0_152] : memref<9x8x8xf32, #tpu.memory_space<vmem>>, vector<1x8x8xf32>
    %112 = vector.shape_cast %111 : vector<1x8x8xf32> to vector<8x8xf32>
    %cst_153 = arith.constant dense<0.000000e+00> : vector<8x256xf32>
    %113 = tpu.matmul %112, %110, %cst_153 {dimension_numbers = #tpu.dot_dimension_numbers<[1], [1], [0], [0], [0, 0, 1, 0], [], []>} : vector<8x8xf32>, vector<256x8xf32>, vector<8x256xf32> -> vector<8x256xf32>
    %114 = arith.addf %108, %113 : vector<8x256xf32>
    %c0_154 = arith.constant 0 : index
    %c2_155 = arith.constant 2 : index
    %c1_156 = arith.constant 1 : index
    %c0_157 = arith.constant 0 : index
    %115 = vector.load %arg7[%c0_154, %c2_155, %c1_156, %c0_157] : memref<1x18x18x8xf32, #tpu.memory_space<vmem>>, vector<1x16x16x8xf32>
    %116 = vector.shape_cast %115 : vector<1x16x16x8xf32> to vector<256x8xf32>
    %c7_158 = arith.constant 7 : index
    %c0_159 = arith.constant 0 : index
    %c0_160 = arith.constant 0 : index
    %117 = vector.load %arg4[%c7_158, %c0_159, %c0_160] : memref<9x8x8xf32, #tpu.memory_space<vmem>>, vector<1x8x8xf32>
    %118 = vector.shape_cast %117 : vector<1x8x8xf32> to vector<8x8xf32>
    %cst_161 = arith.constant dense<0.000000e+00> : vector<8x256xf32>
    %119 = tpu.matmul %118, %116, %cst_161 {dimension_numbers = #tpu.dot_dimension_numbers<[1], [1], [0], [0], [0, 0, 1, 0], [], []>} : vector<8x8xf32>, vector<256x8xf32>, vector<8x256xf32> -> vector<8x256xf32>
    %120 = arith.addf %114, %119 : vector<8x256xf32>
    %c0_162 = arith.constant 0 : index
    %c2_163 = arith.constant 2 : index
    %c2_164 = arith.constant 2 : index
    %c0_165 = arith.constant 0 : index
    %121 = vector.load %arg7[%c0_162, %c2_163, %c2_164, %c0_165] : memref<1x18x18x8xf32, #tpu.memory_space<vmem>>, vector<1x16x16x8xf32>
    %122 = vector.shape_cast %121 : vector<1x16x16x8xf32> to vector<256x8xf32>
    %c8_166 = arith.constant 8 : index
    %c0_167 = arith.constant 0 : index
    %c0_168 = arith.constant 0 : index
    %123 = vector.load %arg4[%c8_166, %c0_167, %c0_168] : memref<9x8x8xf32, #tpu.memory_space<vmem>>, vector<1x8x8xf32>
    %124 = vector.shape_cast %123 : vector<1x8x8xf32> to vector<8x8xf32>
    %cst_169 = arith.constant dense<0.000000e+00> : vector<8x256xf32>
    %125 = tpu.matmul %124, %122, %cst_169 {dimension_numbers = #tpu.dot_dimension_numbers<[1], [1], [0], [0], [0, 0, 1, 0], [], []>} : vector<8x8xf32>, vector<256x8xf32>, vector<8x256xf32> -> vector<8x256xf32>
    %126 = arith.addf %120, %125 : vector<8x256xf32>
    %c0_170 = arith.constant 0 : index
    %c0_171 = arith.constant 0 : index
    %127 = vector.load %arg5[%c0_170, %c0_171] : memref<8x1xf32, #tpu.memory_space<vmem>>, vector<8x1xf32>
    %128 = vector.broadcast %127 : vector<8x1xf32> to vector<8x256xf32>
    %129 = arith.addf %126, %128 : vector<8x256xf32>
    %cst_172 = arith.constant 0.000000e+00 : f32
    %130 = vector.broadcast %cst_172 : f32 to vector<8x256xf32>
    %131 = arith.maximumf %129, %130 : vector<8x256xf32>
    %c0_173 = arith.constant 0 : index
    %c0_174 = arith.constant 0 : index
    %c0_175 = arith.constant 0 : index
    %132 = vector.load %arg6[%c0_173, %c0_174, %c0_175] : memref<1x8x256xf32, #tpu.memory_space<vmem>>, vector<1x8x256xf32>
    %133 = vector.shape_cast %132 : vector<1x8x256xf32> to vector<8x256xf32>
    %134 = vector.shape_cast %131 : vector<8x256xf32> to vector<1x8x256xf32>
    tpu.vector_store %arg6[%c0_173, %c0_174, %c0_175], %134 {strides = array<i32>} : memref<1x8x256xf32, #tpu.memory_space<vmem>>, vector<1x8x256xf32>,
    return
  }
  func.func @transform_0(%arg0: i32) -> (i32, i32, i32, i32) {
    %c0_i32 = arith.constant 0 : i32
    %c0_i32_0 = arith.constant 0 : i32
    %c0_i32_1 = arith.constant 0 : i32
    %c0_i32_2 = arith.constant 0 : i32
    return %arg0, %c0_i32, %c0_i32_0, %c0_i32_1 : i32, i32, i32, i32
  }
  func.func @transform_1(%arg0: i32) -> (i32, i32, i32) {
    %c0_i32 = arith.constant 0 : i32
    %c0_i32_0 = arith.constant 0 : i32
    %c0_i32_1 = arith.constant 0 : i32
    %c0_i32_2 = arith.constant 0 : i32
    return %c0_i32, %c0_i32_0, %c0_i32_1 : i32, i32, i32
  }
  func.func @transform_2(%arg0: i32) -> (i32, i32) {
    %c0_i32 = arith.constant 0 : i32
    %c0_i32_0 = arith.constant 0 : i32
    %c0_i32_1 = arith.constant 0 : i32
    return %c0_i32, %c0_i32_0 : i32, i32
  }
  func.func @transform_3(%arg0: i32) -> (i32, i32, i32) {
    %c0_i32 = arith.constant 0 : i32
    %c0_i32_0 = arith.constant 0 : i32
    %c0_i32_1 = arith.constant 0 : i32
    %c0_i32_2 = arith.constant 0 : i32
    return %c0_i32, %c0_i32_0, %c0_i32_1 : i32, i32, i32
  }
  func.func @transform_4(%arg0: i32) -> (i32, i32) {
    %c0_i32 = arith.constant 0 : i32
    %c0_i32_0 = arith.constant 0 : i32
    %c0_i32_1 = arith.constant 0 : i32
    return %c0_i32, %c0_i32_0 : i32, i32
  }
  func.func @transform_5(%arg0: i32) -> (i32, i32, i32) {
    %c0_i32 = arith.constant 0 : i32
    %c0_i32_0 = arith.constant 0 : i32
    %c0_i32_1 = arith.constant 0 : i32
    return %arg0, %c0_i32, %c0_i32_0 : i32, i32, i32
  }
}

</mosaic_0001>

<bundles_post_ra>
// kernel: tpu_custom_call.1
= control target key start
LH: loop header
LB: loop body
LE: loop exit
PB: predicated region body
PF: predicated region fallthrough
CT: control target
= control target key end

     0   :  { %10 = vsyncpa [#allocation4], 0  ;;  %s10089_s0 = inlined_call_operand.vmem [shape: f32[2,16,16,4], index: 0, kind: input, shape index: {}]   ;;  %s10090_s1 = inlined_call_operand.vmem [shape: f32[9,4,8], index: 1, kind: input, shape index: {}]   ;;  %s10091_s2 = inlined_call_operand.vmem [shape: f32[1,8], index: 2, kind: input, shape index: {}]   ;;  %s10092_s3 = inlined_call_operand.vmem [shape: f32[9,8,8], index: 3, kind: input, shape index: {}]   ;;  %s10093_s4 = inlined_call_operand.vmem [shape: f32[8,1], index: 4, kind: input, shape index: {}]   ;;  %s10094_s5 = inlined_call_operand.hbm [shape: f32[2,8,256], index: 5, kind: output, shape index: {}]  }
   0x1   :  { %12 = vsyncpa [#allocation4 + $0x1], 0  ;;  %s7631_s18 = smov 0   ;;  %s7633_s19 = smov 0  }
   0x2   :  { %s7635_s20 = smov 0   ;;  %s7637_s21 = smov 0  }
   0x3 LB: > { %s7652_s22 = sadd.s32 4294967295, %s7596_s21   ;;  %s5816_s23 = sadd.s32 4294967294, %s7596_s21   ;;  %s7596_s21 = sphi %s7637_s21, %s10430_s21   ;;  %s7592_s20 = sphi %s7635_s20, %s10429_s20   ;;  %s7588_s19 = sphi %s7633_s19, %s10428_s19   ;;  %s7584_s18 = sphi %s7631_s18, %s10427_s18  }
   0x4   : > { %s7656_s24 = sadd.s32 1, %s7596_s21   ;;  %s135_s25 = sadd.s32 1, %s7592_s20 }
   0x5   : > { %s132_s26 = ssub.s32 %s7596_s21, %s7656_s24  ;;  %p145_p0 = scmp.ne.s32.totalorder %s7592_s20, %s7588_s19 }
   0x6   : > { %p133_p1 = scmp.eq.s32.totalorder %s132_s26, 0  ;;  %p146_p2 = scmp.eq.s32.totalorder %s7652_s22, 1 }
   0x7   : > { %p151_p3 = scmp.ne.s32.totalorder %s7588_s19, %s7584_s18  ;;  %p152_p4 = scmp.eq.s32.totalorder %s5816_s23, 1 }
   0x8   : > { %s7667_s27 = scalar_select %p133_p1, %s7592_s20, %s135_s25  }
   0x9   : > { %p7669_p5 = por %p146_p2, %p145_p0  ;;  %p7673_p6 = por %p152_p4, %p151_p3 }
   0xa   : > { %p5819_p7 = scmp.ge.s32.totalorder %s7596_s21, 1  ;;  %p190_p8 = scmp.lt.s32.totalorder %s7596_s21, 3 }
   0xc   : > { %p191_p9 = pnand %p5819_p7, %p190_p8 }
   0xe   : > { %194 = sbr.rel (%p191_p9) target bundleno = 1098 (0x44a), region = 40 }
  0x13   : > { %v5823_v0 = vld [vmem:[%s10090_s1 + $0x4] sm:$0xf]  ;;  %vm494_vm0 = vcmask 1043456   ;;  %v363_v1 = vld [vmem:[%s10090_s1] sm:$0xf]  ;;  %vm223_vm1 = vcmask 64512  }
  0x14   : > { %7044 = vmatprep.subr.msk.mxu0 %vm494_vm0, %v5823_v0  ;;  %7094 = vmatprep.subr.msk.mxu1 %vm494_vm0, %v363_v1  ;;  %vm226_vm2 = vcmask 58368   ;;  %v7690_v2 = vld [vmem:[%s10090_s1 + $0x8] sm:$0xf]  ;;  %p218_p10 = scmp.lt.s32.totalorder %s7652_s22, 1  ;;  %v7598_v3 = vmov 0.0   ;;  %vm233_vm3 = vcmask 57344  }
  0x15   : > { %7045 = vmatpush3.msk.msra.mxu0 %vm494_vm0, %v5823_v0  ;;  %224 = vst.msk [vmem:[#allocation2] sm:$0xff] %vm223_vm1, %v7598_v3  ;;  %225 = vst.msk [vmem:[#allocation2 + $0x8] sm:$0xff] %vm223_vm1, %v7598_v3  ;;  %7095 = vmatpush3.msk.msra.mxu1 %vm494_vm0, %v363_v1  ;;  %v7702_v4 = vld [vmem:[%s10090_s1 + $0xc] sm:$0xf]  ;;  %vm298_vm4 = vcmask 31744   ;;  %s215_s23 = sand.u32 1, %s7588_s19  }
  0x16   : > { %229 = vst.msk [vmem:[#allocation2 + $0x198] sm:$0xff] %vm223_vm1, %v7598_v3  ;;  %230 = vst.msk [vmem:[#allocation2 + $0x1a0] sm:$0xff] %vm223_vm1, %v7598_v3  ;;  %7144 = vmatprep.subr.msk.mxu0 %vm494_vm0, %v7690_v2  ;;  %s7707_s13 = scalar_select %p218_p10, %s7652_s22, 1  ;;  %7194 = vmatprep.subr.msk.mxu1 %vm494_vm0, %v7702_v4  ;;  %v7761_v11 = vld [vmem:[%s10090_s1 + $0x10] sm:$0xf] }
  0x17   : > { %227 = vst.msk [vmem:[#allocation2 + $0x10] sm:$0x3] %vm226_vm2, %v7598_v3  ;;  %231 = vst.msk [vmem:[#allocation2 + $0x1a8] sm:$0x3] %vm226_vm2, %v7598_v3  ;;  %s5820_s25 = sshll.u32 %s215_s23, 4  ;;  %s6440_s26 = sshll.u32 %s7652_s22, 8 }
  0x18   : > { %234 = vst.msk [vmem:[#allocation2 + $0x18] sm:$0x1] %vm233_vm3, %v7598_v3  ;;  %235 = vst.msk [vmem:[#allocation2 + $0x30] sm:$0x1] %vm233_vm3, %v7598_v3  ;;  %s6439_s14 = sshll.u32 %s7707_s13, 8  ;;  %s217_s30 = scalar_lea.vmem [#allocation3], %s5820_s25 }
  0x19   : > { %236 = vst.msk [vmem:[#allocation2 + $0x48] sm:$0x1] %vm233_vm3, %v7598_v3  ;;  %237 = vst.msk [vmem:[#allocation2 + $0x60] sm:$0x1] %vm233_vm3, %v7598_v3  ;;  %s7747_s17 = scalar_lea.vmem %s10089_s0, %s6439_s14  ;;  %s5757_s6 = sshll.u32 %s217_s30, 4  ;;  %s5758_s6 = int_to_ptr.vmem [resolvable:$true] %s5757_s6 }
  0x1a   : > { %238 = vst.msk [vmem:[#allocation2 + $0x78] sm:$0x1] %vm233_vm3, %v7598_v3  ;;  %239 = vst.msk [vmem:[#allocation2 + $0x90] sm:$0x1] %vm233_vm3, %v7598_v3  ;;  %v266_v5 = vld [vmem:[%s7747_s17] sm:$0xff]  ;;  %v267_v6 = vld [vmem:[%s7747_s17 + $0x8] sm:$0xff]  ;;  %s5755_s9 = scalar_lea.hbm %s10094_s5, %s6440_s26 }
  0x1b   : > { %240 = vst.msk [vmem:[#allocation2 + $0xa8] sm:$0x1] %vm233_vm3, %v7598_v3  ;;  %241 = vst.msk [vmem:[#allocation2 + $0xc0] sm:$0x1] %vm233_vm3, %v7598_v3  ;;  %v268_v7 = vld [vmem:[%s7747_s17 + $0x10] sm:$0xff]  ;;  %v269_v8 = vld [vmem:[%s7747_s17 + $0x18] sm:$0xff] }
  0x1c   : > { %242 = vst.msk [vmem:[#allocation2 + $0xd8] sm:$0x1] %vm233_vm3, %v7598_v3  ;;  %243 = vst.msk [vmem:[#allocation2 + $0xf0] sm:$0x1] %vm233_vm3, %v7598_v3  ;;  %v270_v9 = vld [vmem:[%s7747_s17 + $0x20] sm:$0xff]  ;;  %v271_v10 = vld [vmem:[%s7747_s17 + $0x28] sm:$0xff] }
  0x1d   : > { %244 = vst.msk [vmem:[#allocation2 + $0x108] sm:$0x1] %vm233_vm3, %v7598_v3  ;;  %245 = vst.msk [vmem:[#allocation2 + $0x120] sm:$0x1] %vm233_vm3, %v7598_v3  ;;  %v364_v12 = vld [vmem:[#allocation2 + $0x1] sm:$0xff]  ;;  %v272_v16 = vld [vmem:[%s7747_s17 + $0x30] sm:$0xff] }
  0x1e   : > { %246 = vst.msk [vmem:[#allocation2 + $0x138] sm:$0x1] %vm233_vm3, %v7598_v3  ;;  %247 = vst.msk [vmem:[#allocation2 + $0x150] sm:$0x1] %vm233_vm3, %v7598_v3  ;;  %v331_v13 = vld [vmem:[#allocation2] sm:$0xff]  ;;  %v365_v14 = vld [vmem:[#allocation2 + $0x9] sm:$0xff]  ;;  %7046 = vmatprep.mubr.msk.f32.mxu0 %vm298_vm4, %v364_v12 }
  0x1f   : > { %248 = vst.msk [vmem:[#allocation2 + $0x168] sm:$0x1] %vm233_vm3, %v7598_v3  ;;  %249 = vst.msk [vmem:[#allocation2 + $0x180] sm:$0x1] %vm233_vm3, %v7598_v3  ;;  %7096 = vmatprep.mubr.msk.f32.mxu1 %vm298_vm4, %v331_v13  ;;  %v332_v15 = vld [vmem:[#allocation2 + $0x8] sm:$0xff]  ;;  %v273_v17 = vld [vmem:[%s7747_s17 + $0x38] sm:$0xff]  ;;  %7047 = vmatmul.mubr.msk.f32.vlgmr.msra.gmra.mxu0 %vm298_vm4, %v365_v14 }
  0x20   : > { %250 = vst.msk [vmem:[#allocation2 + $0x29] sm:$0x1] %vm233_vm3, %v7598_v3  ;;  %251 = vst.msk [vmem:[#allocation2 + $0x41] sm:$0x1] %vm233_vm3, %v7598_v3  ;;  %7097 = vmatmul.mubr.msk.f32.vlgmr.msra.gmra.mxu1 %vm298_vm4, %v332_v15  ;;  %v274_v18 = vld [vmem:[%s7747_s17 + $0x40] sm:$0xff]  ;;  %v275_v19 = vld [vmem:[%s7747_s17 + $0x48] sm:$0xff]  ;;  %7145 = vmatpush3.msk.msra.mxu0 %vm494_vm0, %v7690_v2 }
  0x21   : > { %252 = vst.msk [vmem:[#allocation2 + $0x59] sm:$0x1] %vm233_vm3, %v7598_v3  ;;  %253 = vst.msk [vmem:[#allocation2 + $0x71] sm:$0x1] %vm233_vm3, %v7598_v3  ;;  %v276_v20 = vld [vmem:[%s7747_s17 + $0x50] sm:$0xff]  ;;  %v277_v21 = vld [vmem:[%s7747_s17 + $0x58] sm:$0xff]  ;;  %7195 = vmatpush3.msk.msra.mxu1 %vm494_vm0, %v7702_v4  ;;  %7244 = vmatprep.subr.msk.mxu0 %vm494_vm0, %v7761_v11 }
  0x22   : > { %254 = vst.msk [vmem:[#allocation2 + $0x89] sm:$0x1] %vm233_vm3, %v7598_v3  ;;  %255 = vst.msk [vmem:[#allocation2 + $0xa1] sm:$0x1] %vm233_vm3, %v7598_v3  ;;  %v278_v22 = vld [vmem:[%s7747_s17 + $0x60] sm:$0xff]  ;;  %v279_v23 = vld [vmem:[%s7747_s17 + $0x68] sm:$0xff] }
  0x23   : > { %256 = vst.msk [vmem:[#allocation2 + $0xb9] sm:$0x1] %vm233_vm3, %v7598_v3  ;;  %257 = vst.msk [vmem:[#allocation2 + $0xd1] sm:$0x1] %vm233_vm3, %v7598_v3  ;;  %v280_v24 = vld [vmem:[%s7747_s17 + $0x70] sm:$0xff]  ;;  %v281_v25 = vld [vmem:[%s7747_s17 + $0x78] sm:$0xff] }
  0x24   : > { %258 = vst.msk [vmem:[#allocation2 + $0xe9] sm:$0x1] %vm233_vm3, %v7598_v3  ;;  %259 = vst.msk [vmem:[#allocation2 + $0x101] sm:$0x1] %vm233_vm3, %v7598_v3  ;;  %v282_v26 = vld [vmem:[%s7747_s17 + $0x80] sm:$0xff]  ;;  %v283_v27 = vld [vmem:[%s7747_s17 + $0x88] sm:$0xff] }
  0x25   : > { %260 = vst.msk [vmem:[#allocation2 + $0x119] sm:$0x1] %vm233_vm3, %v7598_v3  ;;  %261 = vst.msk [vmem:[#allocation2 + $0x131] sm:$0x1] %vm233_vm3, %v7598_v3  ;;  %v284_v28 = vld [vmem:[%s7747_s17 + $0x90] sm:$0xff]  ;;  %v285_v29 = vld [vmem:[%s7747_s17 + $0x98] sm:$0xff] }
  0x26   : > { %262 = vst.msk [vmem:[#allocation2 + $0x149] sm:$0x1] %vm233_vm3, %v7598_v3  ;;  %263 = vst.msk [vmem:[#allocation2 + $0x161] sm:$0x1] %vm233_vm3, %v7598_v3  ;;  %v286_v50 = vld [vmem:[%s7747_s17 + $0xa0] sm:$0xff]  ;;  %v287_v51 = vld [vmem:[%s7747_s17 + $0xa8] sm:$0xff] }
  0x27   : > { %264 = vst.msk [vmem:[#allocation2 + $0x179] sm:$0x1] %vm233_vm3, %v7598_v3  ;;  %265 = vst.msk [vmem:[#allocation2 + $0x191] sm:$0x1] %vm233_vm3, %v7598_v3  ;;  %v288_v53 = vld [vmem:[%s7747_s17 + $0xb0] sm:$0xff]  ;;  %v289_v54 = vld [vmem:[%s7747_s17 + $0xb8] sm:$0xff] }
  0x28   : > { %299 = vst.msk [vmem:[#allocation2 + $0x19] sm:$0xff] %vm298_vm4, %v266_v5  ;;  %300 = vst.msk [vmem:[#allocation2 + $0x21] sm:$0xff] %vm298_vm4, %v267_v6  ;;  %v290_v55 = vld [vmem:[%s7747_s17 + $0xc0] sm:$0xff]  ;;  %v291_v56 = vld [vmem:[%s7747_s17 + $0xc8] sm:$0xff]  ;;  %s5743_s10 = scalar_lea.sflag [#allocation4], %s215_s23  ;;  %s7536_s11 = scalar_lea.vmem %s5758_s6, 256 }
  0x29   : > { %301 = vst.msk [vmem:[#allocation2 + $0x31] sm:$0xff] %vm298_vm4, %v268_v7  ;;  %302 = vst.msk [vmem:[#allocation2 + $0x39] sm:$0xff] %vm298_vm4, %v269_v8  ;;  %v292_v57 = vld [vmem:[%s7747_s17 + $0xd0] sm:$0xff]  ;;  %v293_v58 = vld [vmem:[%s7747_s17 + $0xd8] sm:$0xff]  ;;  %p7537_p11 = scmp.ne.s32.totalorder %s5758_s6, %s7536_s11  ;;  %s7600_s12 = smov [#allocation3]  }
  0x2a   : > { %303 = vst.msk [vmem:[#allocation2 + $0x49] sm:$0xff] %vm298_vm4, %v270_v9  ;;  %304 = vst.msk [vmem:[#allocation2 + $0x51] sm:$0xff] %vm298_vm4, %v271_v10  ;;  %v294_v60 = vld [vmem:[%s7747_s17 + $0xe0] sm:$0xff]  ;;  %v295_v61 = vld [vmem:[%s7747_s17 + $0xe8] sm:$0xff]  ;;  %s7540_s22 = sshll.u32 %s7600_s12, 4  ;;  %s7541_s22 = int_to_ptr.vmem [resolvable:$false] %s7540_s22 }
  0x2b   : > { %305 = vst.msk [vmem:[#allocation2 + $0x61] sm:$0xff] %vm298_vm4, %v272_v16  ;;  %306 = vst.msk [vmem:[#allocation2 + $0x69] sm:$0xff] %vm298_vm4, %v273_v17  ;;  %v296_v15 = vld [vmem:[%s7747_s17 + $0xf0] sm:$0xff]  ;;  %v297_v17 = vld [vmem:[%s7747_s17 + $0xf8] sm:$0xff]  ;;  %p7538_p12 = pnand %p7537_p11, %p7669_p5  ;;  %s7542_s13 = scalar_lea.vmem %s7541_s22, 512 }
  0x2c   : > { %307 = vst.msk [vmem:[#allocation2 + $0x79] sm:$0xff] %vm298_vm4, %v274_v18  ;;  %308 = vst.msk [vmem:[#allocation2 + $0x81] sm:$0xff] %vm298_vm4, %v275_v19  ;;  %v7976_v16 = vld [vmem:[%s10090_s1 + $0x14] sm:$0xf]  ;;  %p7543_p0 = scmp.lt.s32.totalorder %s5758_s6, %s7541_s22  ;;  %p7544_p1 = scmp.lt.s32.totalorder %s7542_s13, %s7536_s11 }
  0x2d   : > { %309 = vst.msk [vmem:[#allocation2 + $0x91] sm:$0xff] %vm298_vm4, %v276_v20  ;;  %310 = vst.msk [vmem:[#allocation2 + $0x99] sm:$0xff] %vm298_vm4, %v277_v21  ;;  %7294 = vmatprep.subr.msk.mxu1 %vm494_vm0, %v7976_v16  ;;  %p7539_p13 = pneg %p7538_p12 }
  0x2e   : > { %311 = vst.msk [vmem:[#allocation2 + $0xa9] sm:$0xff] %vm298_vm4, %v278_v22  ;;  %312 = vst.msk [vmem:[#allocation2 + $0xb1] sm:$0xff] %vm298_vm4, %v279_v23  ;;  %p7545_p2 = por %p7544_p1, %p7543_p0 }
  0x2f   : > { %313 = vst.msk [vmem:[#allocation2 + $0xc1] sm:$0xff] %vm298_vm4, %v280_v24  ;;  %314 = vst.msk [vmem:[#allocation2 + $0xc9] sm:$0xff] %vm298_vm4, %v281_v25  ;;  %v7801_v30 = vld [vmem:[#allocation2 + $0x19] sm:$0xff]  ;;  %v7805_v32 = vld [vmem:[#allocation2 + $0x21] sm:$0xff] }
  0x30   : > { %315 = vst.msk [vmem:[#allocation2 + $0xd9] sm:$0xff] %vm298_vm4, %v282_v26  ;;  %v7803_v31 = vld [vmem:[#allocation2 + $0x18] sm:$0xff]  ;;  %316 = vst.msk [vmem:[#allocation2 + $0xe1] sm:$0xff] %vm298_vm4, %v283_v27  ;;  %7049 = vmatprep.mubr.msk.f32.mxu0 %vm298_vm4, %v7801_v30  ;;  %v7814_v33 = vld [vmem:[#allocation2 + $0x20] sm:$0xff]  ;;  %p7546_p3 = pnand %p7545_p2, %p7539_p13 }
  0x31   : > { %317 = vst.msk [vmem:[#allocation2 + $0xf1] sm:$0xff] %vm298_vm4, %v284_v28  ;;  %318 = vst.msk [vmem:[#allocation2 + $0xf9] sm:$0xff] %vm298_vm4, %v285_v29  ;;  %7099 = vmatprep.mubr.msk.f32.mxu1 %vm298_vm4, %v7803_v31  ;;  %v7816_v34 = vld [vmem:[#allocation2 + $0x31] sm:$0xff]  ;;  %7050 = vmatmul.mubr.msk.f32.gmra.mxu0 %vm298_vm4, %v7805_v32  ;;  %v7828_v36 = vld [vmem:[#allocation2 + $0x39] sm:$0xff] }
  0x32   : > { %v7818_v35 = vld [vmem:[#allocation2 + $0x30] sm:$0xff]  ;;  %7100 = vmatmul.mubr.msk.f32.gmra.mxu1 %vm298_vm4, %v7814_v33  ;;  %7052 = vmatprep.mubr.msk.f32.mxu0 %vm298_vm4, %v7816_v34  ;;  %v7830_v37 = vld [vmem:[#allocation2 + $0x38] sm:$0xff]  ;;  %v7834_v39 = vld [vmem:[#allocation2 + $0x48] sm:$0xff]  ;;  %319 = vst.msk [vmem:[#allocation2 + $0x109] sm:$0xff] %vm298_vm4, %v286_v50 }
  0x33   : > { %10173 = vst [vmem:[#allocation6_spill] sm:$0xff] %v7818_v35  ;;  %7102 = vmatprep.mubr.msk.f32.mxu1 %vm298_vm4, %v7818_v35  ;;  %10174 = vst [vmem:[#allocation7_spill] sm:$0xff] %v7830_v37  ;;  %v7832_v38 = vld [vmem:[#allocation2 + $0x49] sm:$0xff]  ;;  %v7844_v40 = vld [vmem:[#allocation2 + $0x51] sm:$0xff] }
  0x34   : > { %10175 = vst [vmem:[#allocation8_spill] sm:$0xff] %v7834_v39  ;;  %v7846_v41 = vld [vmem:[#allocation2 + $0x50] sm:$0xff]  ;;  %v7848_v42 = vld [vmem:[#allocation2 + $0x61] sm:$0xff]  ;;  %v7864_v46 = vld [vmem:[#allocation2 + $0x79] sm:$0xff] }
  0x35   : > { %7053 = vmatmul.mubr.msk.f32.gmra.mxu0 %vm298_vm4, %v7828_v36  ;;  %10176 = vst [vmem:[#allocation9_spill] sm:$0xff] %v7846_v41  ;;  %v7850_v43 = vld [vmem:[#allocation2 + $0x60] sm:$0xff]  ;;  %v7860_v44 = vld [vmem:[#allocation2 + $0x69] sm:$0xff]  ;;  %v7866_v47 = vld [vmem:[#allocation2 + $0x78] sm:$0xff] }
  0x36   : > { %7103 = vmatmul.mubr.msk.f32.gmra.mxu1 %vm298_vm4, %v7830_v37  ;;  %7055 = vmatprep.mubr.msk.f32.mxu0 %vm298_vm4, %v7832_v38  ;;  %10177 = vst [vmem:[#allocation10_spill] sm:$0xff] %v7850_v43  ;;  %v7862_v45 = vld [vmem:[#allocation2 + $0x68] sm:$0xff]  ;;  %10179 = vst [vmem:[#allocation12_spill] sm:$0xff] %v7866_v47  ;;  %v7870_v49 = vld [vmem:[#allocation2 + $0x80] sm:$0xff] }
  0x37   : > { %7105 = vmatprep.mubr.msk.f32.mxu1 %vm298_vm4, %v7834_v39  ;;  %10178 = vst [vmem:[#allocation11_spill] sm:$0xff] %v7862_v45  ;;  %v7868_v48 = vld [vmem:[#allocation2 + $0x81] sm:$0xff]  ;;  %10180 = vst [vmem:[#allocation13_spill] sm:$0xff] %v7870_v49  ;;  %v7878_v52 = vld [vmem:[#allocation2 + $0x91] sm:$0xff] }
  0x38   : > { %320 = vst.msk [vmem:[#allocation2 + $0x111] sm:$0xff] %vm298_vm4, %v287_v51  ;;  %321 = vst.msk [vmem:[#allocation2 + $0x121] sm:$0xff] %vm298_vm4, %v288_v53  ;;  %v7895_v59 = vld [vmem:[#allocation2 + $0x90] sm:$0xff]  ;;  %v7912_v62 = vld [vmem:[#allocation2 + $0x99] sm:$0xff] }
  0x39   : > { %7056 = vmatmul.mubr.msk.f32.gmra.mxu0 %vm298_vm4, %v7844_v40  ;;  %322 = vst.msk [vmem:[#allocation2 + $0x129] sm:$0xff] %vm298_vm4, %v289_v54  ;;  %323 = vst.msk [vmem:[#allocation2 + $0x139] sm:$0xff] %vm298_vm4, %v290_v55  ;;  %v7914_v63 = vld [vmem:[#allocation2 + $0x98] sm:$0xff]  ;;  %v7916_v0 = vld [vmem:[#allocation2 + $0xa9] sm:$0xff] }
  0x3a   : > { %7106 = vmatmul.mubr.msk.f32.gmra.mxu1 %vm298_vm4, %v7846_v41  ;;  %7058 = vmatprep.mubr.msk.f32.mxu0 %vm298_vm4, %v7848_v42  ;;  %10181 = vst [vmem:[#allocation14_spill] sm:$0xff] %v7895_v59  ;;  %324 = vst.msk [vmem:[#allocation2 + $0x141] sm:$0xff] %vm298_vm4, %v291_v56  ;;  %v7918_v1 = vld [vmem:[#allocation2 + $0xa8] sm:$0xff]  ;;  %v7928_v2 = vld [vmem:[#allocation2 + $0xb1] sm:$0xff] }
  0x3b   : > { %7108 = vmatprep.mubr.msk.f32.mxu1 %vm298_vm4, %v7850_v43  ;;  %325 = vst.msk [vmem:[#allocation2 + $0x151] sm:$0xff] %vm298_vm4, %v292_v57  ;;  %326 = vst.msk [vmem:[#allocation2 + $0x159] sm:$0xff] %vm298_vm4, %v293_v58  ;;  %v7930_v3 = vld [vmem:[#allocation2 + $0xb0] sm:$0xff]  ;;  %v7932_v4 = vld [vmem:[#allocation2 + $0xc1] sm:$0xff] }
  0x3c   : > { %327 = vst.msk [vmem:[#allocation2 + $0x169] sm:$0xff] %vm298_vm4, %v294_v60  ;;  %328 = vst.msk [vmem:[#allocation2 + $0x171] sm:$0xff] %vm298_vm4, %v295_v61  ;;  %v7934_v5 = vld [vmem:[#allocation2 + $0xc0] sm:$0xff]  ;;  %v7944_v6 = vld [vmem:[#allocation2 + $0xc9] sm:$0xff] }
  0x3d   : > { %7059 = vmatmul.mubr.msk.f32.gmra.mxu0 %vm298_vm4, %v7860_v44  ;;  %10182 = vst [vmem:[#allocation15_spill] sm:$0xff] %v7914_v63  ;;  %10183 = vst [vmem:[#allocation16_spill] sm:$0xff] %v7918_v1  ;;  %v7946_v7 = vld [vmem:[#allocation2 + $0xc8] sm:$0xff]  ;;  %v7948_v8 = vld [vmem:[#allocation2 + $0xd9] sm:$0xff] }
  0x3e   : > { %7109 = vmatmul.mubr.msk.f32.gmra.mxu1 %vm298_vm4, %v7862_v45  ;;  %7061 = vmatprep.mubr.msk.f32.mxu0 %vm298_vm4, %v7864_v46  ;;  %10184 = vst [vmem:[#allocation17_spill] sm:$0xff] %v7930_v3  ;;  %10185 = vst [vmem:[#allocation18_spill] sm:$0xff] %v7934_v5  ;;  %v7950_v9 = vld [vmem:[#allocation2 + $0xd8] sm:$0xff]  ;;  %v7960_v10 = vld [vmem:[#allocation2 + $0xe1] sm:$0xff] }
  0x3f   : > { %7111 = vmatprep.mubr.msk.f32.mxu1 %vm298_vm4, %v7866_v47  ;;  %10186 = vst [vmem:[#allocation19_spill] sm:$0xff] %v7946_v7  ;;  %10187 = vst [vmem:[#allocation20_spill] sm:$0xff] %v7950_v9  ;;  %v7962_v12 = vld [vmem:[#allocation2 + $0xe0] sm:$0xff]  ;;  %v7964_v13 = vld [vmem:[#allocation2 + $0xf1] sm:$0xff] }
  0x40   : > { %10188 = vst [vmem:[#allocation21_spill] sm:$0xff] %v7962_v12  ;;  %v7966_v14 = vld [vmem:[#allocation2 + $0xf0] sm:$0xff]  ;;  %v7983_v18 = vld [vmem:[#allocation2 + $0xf9] sm:$0xff]  ;;  %329 = vst.msk [vmem:[#allocation2 + $0x181] sm:$0xff] %vm298_vm4, %v296_v15 }
  0x41   : > { %7062 = vmatmul.mubr.msk.f32.gmra.mxu0 %vm298_vm4, %v7868_v48  ;;  %10189 = vst [vmem:[#allocation22_spill] sm:$0xff] %v7966_v14  ;;  %v7985_v19 = vld [vmem:[#allocation2 + $0xf8] sm:$0xff]  ;;  %330 = vst.msk [vmem:[#allocation2 + $0x189] sm:$0xff] %vm298_vm4, %v297_v17  ;;  %v7989_v20 = vld [vmem:[#allocation2 + $0x109] sm:$0xff] }
  0x42   : > { %7112 = vmatmul.mubr.msk.f32.gmra.mxu1 %vm298_vm4, %v7870_v49  ;;  %7064 = vmatprep.mubr.msk.f32.mxu0 %vm298_vm4, %v7878_v52  ;;  %10190 = vst [vmem:[#allocation23_spill] sm:$0xff] %v7985_v19  ;;  %v7991_v21 = vld [vmem:[#allocation2 + $0x108] sm:$0xff]  ;;  %v8003_v22 = vld [vmem:[#allocation2 + $0x111] sm:$0xff]  ;;  %v8009_v25 = vld [vmem:[#allocation2 + $0x120] sm:$0xff] }
  0x43   : > { %7114 = vmatprep.mubr.msk.f32.mxu1 %vm298_vm4, %v7895_v59  ;;  %10191 = vst [vmem:[#allocation24_spill] sm:$0xff] %v7991_v21  ;;  %v8005_v23 = vld [vmem:[#allocation2 + $0x110] sm:$0xff]  ;;  %v8007_v24 = vld [vmem:[#allocation2 + $0x121] sm:$0xff]  ;;  %10193 = vst [vmem:[#allocation26_spill] sm:$0xff] %v8009_v25 }
  0x44   : > { %10192 = vst [vmem:[#allocation25_spill] sm:$0xff] %v8005_v23  ;;  %v8019_v26 = vld [vmem:[#allocation2 + $0x129] sm:$0xff]  ;;  %v8023_v28 = vld [vmem:[#allocation2 + $0x139] sm:$0xff]  ;;  %v8035_v50 = vld [vmem:[#allocation2 + $0x141] sm:$0xff] }
  0x45   : > { %7065 = vmatmul.mubr.msk.f32.gmra.mxu0 %vm298_vm4, %v7912_v62  ;;  %v8021_v27 = vld [vmem:[#allocation2 + $0x128] sm:$0xff]  ;;  %v8025_v29 = vld [vmem:[#allocation2 + $0x138] sm:$0xff]  ;;  %v8037_v51 = vld [vmem:[#allocation2 + $0x140] sm:$0xff] }
  0x46   : > { %7115 = vmatmul.mubr.msk.f32.gmra.mxu1 %vm298_vm4, %v7914_v63  ;;  %7067 = vmatprep.mubr.msk.f32.mxu0 %vm298_vm4, %v7916_v0  ;;  %10194 = vst [vmem:[#allocation27_spill] sm:$0xff] %v8021_v27  ;;  %10195 = vst [vmem:[#allocation28_spill] sm:$0xff] %v8025_v29  ;;  %v8039_v53 = vld [vmem:[#allocation2 + $0x151] sm:$0xff]  ;;  %v8051_v55 = vld [vmem:[#allocation2 + $0x159] sm:$0xff] }
  0x47   : > { %7117 = vmatprep.mubr.msk.f32.mxu1 %vm298_vm4, %v7918_v1  ;;  %10196 = vst [vmem:[#allocation29_spill] sm:$0xff] %v8037_v51  ;;  %v8041_v54 = vld [vmem:[#allocation2 + $0x150] sm:$0xff]  ;;  %v8053_v56 = vld [vmem:[#allocation2 + $0x158] sm:$0xff]  ;;  %v8057_v58 = vld [vmem:[#allocation2 + $0x168] sm:$0xff] }
  0x48   : > { %10197 = vst [vmem:[#allocation30_spill] sm:$0xff] %v8041_v54  ;;  %10198 = vst [vmem:[#allocation31_spill] sm:$0xff] %v8053_v56  ;;  %v8055_v57 = vld [vmem:[#allocation2 + $0x169] sm:$0xff]  ;;  %v8067_v60 = vld [vmem:[#allocation2 + $0x171] sm:$0xff] }
  0x49   : > { %7068 = vmatmul.mubr.msk.f32.gmra.mxu0 %vm298_vm4, %v7928_v2  ;;  %10199 = vst [vmem:[#allocation32_spill] sm:$0xff] %v8055_v57  ;;  %10200 = vst [vmem:[#allocation33_spill] sm:$0xff] %v8067_v60  ;;  %v8069_v61 = vld [vmem:[#allocation2 + $0x170] sm:$0xff]  ;;  %v1047_v15 = vld [vmem:[#allocation2 + $0x2] sm:$0xff] }
  0x4a   : > { %7118 = vmatmul.mubr.msk.f32.gmra.mxu1 %vm298_vm4, %v7930_v3  ;;  %7070 = vmatprep.mubr.msk.f32.mxu0 %vm298_vm4, %v7932_v4  ;;  %v1048_v17 = vld [vmem:[#allocation2 + $0xa] sm:$0xff] }
  0x4b   : > { %7120 = vmatprep.mubr.msk.f32.mxu1 %vm298_vm4, %v7934_v5 }
  0x4d   : > { %7071 = vmatmul.mubr.msk.f32.gmra.mxu0 %vm298_vm4, %v7944_v6 }
  0x4e   : > { %7121 = vmatmul.mubr.msk.f32.gmra.mxu1 %vm298_vm4, %v7946_v7  ;;  %7073 = vmatprep.mubr.msk.f32.mxu0 %vm298_vm4, %v7948_v8 }
  0x4f   : > { %7123 = vmatprep.mubr.msk.f32.mxu1 %vm298_vm4, %v7950_v9 }
  0x51   : > { %7074 = vmatmul.mubr.msk.f32.gmra.mxu0 %vm298_vm4, %v7960_v10 }
  0x52   : > { %7124 = vmatmul.mubr.msk.f32.gmra.mxu1 %vm298_vm4, %v7962_v12  ;;  %7076 = vmatprep.mubr.msk.f32.mxu0 %vm298_vm4, %v7964_v13 }
  0x53   : > { %7126 = vmatprep.mubr.msk.f32.mxu1 %vm298_vm4, %v7966_v14 }
  0x55   : > { %7077 = vmatmul.mubr.msk.f32.gmra.mxu0 %vm298_vm4, %v7983_v18 }
  0x56   : > { %7127 = vmatmul.mubr.msk.f32.gmra.mxu1 %vm298_vm4, %v7985_v19  ;;  %7079 = vmatprep.mubr.msk.f32.mxu0 %vm298_vm4, %v7989_v20 }
  0x57   : > { %7129 = vmatprep.mubr.msk.f32.mxu1 %vm298_vm4, %v7991_v21 }
  0x59   : > { %7080 = vmatmul.mubr.msk.f32.gmra.mxu0 %vm298_vm4, %v8003_v22 }
  0x5a   : > { %7130 = vmatmul.mubr.msk.f32.gmra.mxu1 %vm298_vm4, %v8005_v23  ;;  %7082 = vmatprep.mubr.msk.f32.mxu0 %vm298_vm4, %v8007_v24 }
  0x5b   : > { %7132 = vmatprep.mubr.msk.f32.mxu1 %vm298_vm4, %v8009_v25 }
  0x5d   : > { %7083 = vmatmul.mubr.msk.f32.gmra.mxu0 %vm298_vm4, %v8019_v26 }
  0x5e   : > { %7133 = vmatmul.mubr.msk.f32.gmra.mxu1 %vm298_vm4, %v8021_v27  ;;  %7085 = vmatprep.mubr.msk.f32.mxu0 %vm298_vm4, %v8023_v28 }
  0x5f   : > { %7135 = vmatprep.mubr.msk.f32.mxu1 %vm298_vm4, %v8025_v29 }
  0x61   : > { %7086 = vmatmul.mubr.msk.f32.gmra.mxu0 %vm298_vm4, %v8035_v50 }
  0x62   : > { %7136 = vmatmul.mubr.msk.f32.gmra.mxu1 %vm298_vm4, %v8037_v51  ;;  %7088 = vmatprep.mubr.msk.f32.mxu0 %vm298_vm4, %v8039_v53 }
  0x63   : > { %7138 = vmatprep.mubr.msk.f32.mxu1 %vm298_vm4, %v8041_v54 }
  0x65   : > { %7089 = vmatmul.mubr.msk.f32.gmra.mxu0 %vm298_vm4, %v8051_v55 }
  0x66   : > { %7139 = vmatmul.mubr.msk.f32.gmra.mxu1 %vm298_vm4, %v8053_v56  ;;  %7091 = vmatprep.mubr.msk.f32.mxu0 %vm298_vm4, %v8055_v57  ;;  %v8078_v57 = vld [vmem:[#allocation2 + $0x1a] sm:$0xff] }
  0x67   : > { %7141 = vmatprep.mubr.msk.f32.mxu1 %vm298_vm4, %v8057_v58 }
  0x69   : > { %7092 = vmatmul.mubr.msk.f32.gmra.mxu0 %vm298_vm4, %v8067_v60  ;;  %v8086_v60 = vld [vmem:[%s10090_s1 + $0x18] sm:$0xf] }
  0x6a   : > { %7142 = vmatmul.mubr.msk.f32.gmra.mxu1 %vm298_vm4, %v8069_v61  ;;  %7146 = vmatprep.mubr.msk.f32.mxu0 %vm298_vm4, %v1047_v15  ;;  %v8091_v15 = vld [vmem:[%s10090_s1 + $0x1c] sm:$0xf] }
  0x6b   : > { %7196 = vmatprep.mubr.msk.f32.mxu1 %vm298_vm4, %v7803_v31  ;;  %v8097_v31 = vld [vmem:[#allocation2 + $0x22] sm:$0xff] }
  0x6d   : > { %7147 = vmatmul.mubr.msk.f32.vlgmr.msra.gmra.mxu0 %vm298_vm4, %v1048_v17  ;;  %v8127_v17 = vld [vmem:[#allocation2 + $0x52] sm:$0xff] }
  0x6e   : > { %7197 = vmatmul.mubr.msk.f32.vlgmr.msra.gmra.mxu1 %vm298_vm4, %v7814_v33  ;;  %7245 = vmatpush3.msk.msra.mxu0 %vm494_vm0, %v7761_v11  ;;  %v8101_v33 = vld [vmem:[#allocation2 + $0x32] sm:$0xff]  ;;  %v8115_v11 = vld [vmem:[#allocation2 + $0x3a] sm:$0xff] }
  0x6f   : > { %7149 = vmatprep.mubr.msk.f32.mxu0 %vm298_vm4, %v8078_v57  ;;  %7199 = vmatprep.mubr.msk.f32.mxu1 %vm298_vm4, %v7818_v35  ;;  %v8265_v35 = vld [vmem:[#allocation2 + $0x180] sm:$0xff] }
  0x70   : > { %7295 = vmatpush3.msk.msra.mxu1 %vm494_vm0, %v7976_v16  ;;  %7344 = vmatprep.subr.msk.mxu0 %vm494_vm0, %v8086_v60  ;;  %v8119_v16 = vld [vmem:[#allocation2 + $0x4a] sm:$0xff]  ;;  %10201 = vst [vmem:[#allocation34_spill] sm:$0xff] %v8265_v35 }
  0x71   : > { %7394 = vmatprep.subr.msk.mxu1 %vm494_vm0, %v8091_v15  ;;  %7150 = vmatmul.mubr.msk.f32.gmra.mxu0 %vm298_vm4, %v8097_v31 }
  0x72   : > { %7200 = vmatmul.mubr.msk.f32.gmra.mxu1 %vm298_vm4, %v7830_v37  ;;  %7152 = vmatprep.mubr.msk.f32.mxu0 %vm298_vm4, %v8101_v33  ;;  %v8131_v37 = vld [vmem:[#allocation2 + $0x62] sm:$0xff] }
  0x73   : > { %7202 = vmatprep.mubr.msk.f32.mxu1 %vm298_vm4, %v7834_v39  ;;  %v8143_v39 = vld [vmem:[#allocation2 + $0x7a] sm:$0xff] }
  0x75   : > { %7153 = vmatmul.mubr.msk.f32.gmra.mxu0 %vm298_vm4, %v8115_v11 }
  0x76   : > { %7203 = vmatmul.mubr.msk.f32.gmra.mxu1 %vm298_vm4, %v7846_v41  ;;  %7155 = vmatprep.mubr.msk.f32.mxu0 %vm298_vm4, %v8119_v16  ;;  %v8139_v41 = vld [vmem:[#allocation2 + $0x6a] sm:$0xff] }
  0x77   : > { %7205 = vmatprep.mubr.msk.f32.mxu1 %vm298_vm4, %v7850_v43  ;;  %v8155_v43 = vld [vmem:[#allocation2 + $0x92] sm:$0xff] }
  0x79   : > { %7156 = vmatmul.mubr.msk.f32.gmra.mxu0 %vm298_vm4, %v8127_v17 }
  0x7a   : > { %7206 = vmatmul.mubr.msk.f32.gmra.mxu1 %vm298_vm4, %v7862_v45  ;;  %7158 = vmatprep.mubr.msk.f32.mxu0 %vm298_vm4, %v8131_v37  ;;  %v8151_v45 = vld [vmem:[#allocation2 + $0x82] sm:$0xff] }
  0x7b   : > { %7208 = vmatprep.mubr.msk.f32.mxu1 %vm298_vm4, %v7866_v47  ;;  %v8167_v47 = vld [vmem:[#allocation2 + $0xaa] sm:$0xff] }
  0x7d   : > { %7159 = vmatmul.mubr.msk.f32.gmra.mxu0 %vm298_vm4, %v8139_v41 }
  0x7e   : > { %7209 = vmatmul.mubr.msk.f32.gmra.mxu1 %vm298_vm4, %v7870_v49  ;;  %7161 = vmatprep.mubr.msk.f32.mxu0 %vm298_vm4, %v8143_v39  ;;  %v8163_v49 = vld [vmem:[#allocation2 + $0x9a] sm:$0xff] }
  0x7f   : > { %7211 = vmatprep.mubr.msk.f32.mxu1 %vm298_vm4, %v7895_v59  ;;  %v8179_v59 = vld [vmem:[#allocation2 + $0xc2] sm:$0xff] }
  0x81   : > { %7162 = vmatmul.mubr.msk.f32.gmra.mxu0 %vm298_vm4, %v8151_v45 }
  0x82   : > { %7212 = vmatmul.mubr.msk.f32.gmra.mxu1 %vm298_vm4, %v7914_v63  ;;  %7164 = vmatprep.mubr.msk.f32.mxu0 %vm298_vm4, %v8155_v43  ;;  %v8175_v63 = vld [vmem:[#allocation2 + $0xb2] sm:$0xff] }
  0x83   : > { %7214 = vmatprep.mubr.msk.f32.mxu1 %vm298_vm4, %v7918_v1  ;;  %v8191_v1 = vld [vmem:[#allocation2 + $0xda] sm:$0xff] }
  0x85   : > { %7165 = vmatmul.mubr.msk.f32.gmra.mxu0 %vm298_vm4, %v8163_v49 }
  0x86   : > { %7215 = vmatmul.mubr.msk.f32.gmra.mxu1 %vm298_vm4, %v7930_v3  ;;  %7167 = vmatprep.mubr.msk.f32.mxu0 %vm298_vm4, %v8167_v47  ;;  %v8187_v3 = vld [vmem:[#allocation2 + $0xca] sm:$0xff] }
  0x87   : > { %7217 = vmatprep.mubr.msk.f32.mxu1 %vm298_vm4, %v7934_v5  ;;  %v8203_v5 = vld [vmem:[#allocation2 + $0xf2] sm:$0xff] }
  0x89   : > { %7168 = vmatmul.mubr.msk.f32.gmra.mxu0 %vm298_vm4, %v8175_v63 }
  0x8a   : > { %7218 = vmatmul.mubr.msk.f32.gmra.mxu1 %vm298_vm4, %v7946_v7  ;;  %7170 = vmatprep.mubr.msk.f32.mxu0 %vm298_vm4, %v8179_v59  ;;  %v8199_v7 = vld [vmem:[#allocation2 + $0xe2] sm:$0xff] }
  0x8b   : > { %7220 = vmatprep.mubr.msk.f32.mxu1 %vm298_vm4, %v7950_v9  ;;  %v8215_v9 = vld [vmem:[#allocation2 + $0x10a] sm:$0xff] }
  0x8d   : > { %7171 = vmatmul.mubr.msk.f32.gmra.mxu0 %vm298_vm4, %v8187_v3 }
  0x8e   : > { %7221 = vmatmul.mubr.msk.f32.gmra.mxu1 %vm298_vm4, %v7962_v12  ;;  %7173 = vmatprep.mubr.msk.f32.mxu0 %vm298_vm4, %v8191_v1  ;;  %v8211_v12 = vld [vmem:[#allocation2 + $0xfa] sm:$0xff] }
  0x8f   : > { %7223 = vmatprep.mubr.msk.f32.mxu1 %vm298_vm4, %v7966_v14  ;;  %v8227_v14 = vld [vmem:[#allocation2 + $0x122] sm:$0xff] }
  0x91   : > { %7174 = vmatmul.mubr.msk.f32.gmra.mxu0 %vm298_vm4, %v8199_v7 }
  0x92   : > { %7224 = vmatmul.mubr.msk.f32.gmra.mxu1 %vm298_vm4, %v7985_v19  ;;  %7176 = vmatprep.mubr.msk.f32.mxu0 %vm298_vm4, %v8203_v5  ;;  %v8223_v19 = vld [vmem:[#allocation2 + $0x112] sm:$0xff] }
  0x93   : > { %7226 = vmatprep.mubr.msk.f32.mxu1 %vm298_vm4, %v7991_v21  ;;  %v8239_v21 = vld [vmem:[#allocation2 + $0x13a] sm:$0xff] }
  0x95   : > { %7177 = vmatmul.mubr.msk.f32.gmra.mxu0 %vm298_vm4, %v8211_v12 }
  0x96   : > { %7227 = vmatmul.mubr.msk.f32.gmra.mxu1 %vm298_vm4, %v8005_v23  ;;  %7179 = vmatprep.mubr.msk.f32.mxu0 %vm298_vm4, %v8215_v9  ;;  %v8235_v23 = vld [vmem:[#allocation2 + $0x12a] sm:$0xff] }
  0x97   : > { %7229 = vmatprep.mubr.msk.f32.mxu1 %vm298_vm4, %v8009_v25  ;;  %v8251_v25 = vld [vmem:[#allocation2 + $0x152] sm:$0xff] }
  0x99   : > { %7180 = vmatmul.mubr.msk.f32.gmra.mxu0 %vm298_vm4, %v8223_v19 }
  0x9a   : > { %7230 = vmatmul.mubr.msk.f32.gmra.mxu1 %vm298_vm4, %v8021_v27  ;;  %7182 = vmatprep.mubr.msk.f32.mxu0 %vm298_vm4, %v8227_v14  ;;  %v8247_v27 = vld [vmem:[#allocation2 + $0x142] sm:$0xff] }
  0x9b   : > { %7232 = vmatprep.mubr.msk.f32.mxu1 %vm298_vm4, %v8025_v29  ;;  %v8263_v29 = vld [vmem:[#allocation2 + $0x16a] sm:$0xff] }
  0x9d   : > { %7183 = vmatmul.mubr.msk.f32.gmra.mxu0 %vm298_vm4, %v8235_v23 }
  0x9e   : > { %7233 = vmatmul.mubr.msk.f32.gmra.mxu1 %vm298_vm4, %v8037_v51  ;;  %7185 = vmatprep.mubr.msk.f32.mxu0 %vm298_vm4, %v8239_v21  ;;  %v8259_v51 = vld [vmem:[#allocation2 + $0x15a] sm:$0xff] }
  0x9f   : > { %7235 = vmatprep.mubr.msk.f32.mxu1 %vm298_vm4, %v8041_v54  ;;  %v8277_v54 = vld [vmem:[#allocation2 + $0x188] sm:$0xff] }
  0xa1   : > { %7186 = vmatmul.mubr.msk.f32.gmra.mxu0 %vm298_vm4, %v8247_v27 }
  0xa2   : > { %7236 = vmatmul.mubr.msk.f32.gmra.mxu1 %vm298_vm4, %v8053_v56  ;;  %7188 = vmatprep.mubr.msk.f32.mxu0 %vm298_vm4, %v8251_v25  ;;  %v8273_v56 = vld [vmem:[#allocation2 + $0x172] sm:$0xff] }
  0xa3   : > { %7238 = vmatprep.mubr.msk.f32.mxu1 %vm298_vm4, %v8057_v58 }
  0xa5   : > { %7189 = vmatmul.mubr.msk.f32.gmra.mxu0 %vm298_vm4, %v8259_v51 }
  0xa6   : > { %7239 = vmatmul.mubr.msk.f32.gmra.mxu1 %vm298_vm4, %v8069_v61  ;;  %7191 = vmatprep.mubr.msk.f32.mxu0 %vm298_vm4, %v8263_v29 }
  0xa7   : > { %7241 = vmatprep.mubr.msk.f32.mxu1 %vm298_vm4, %v8265_v35  ;;  %v8294_v35 = vld [vmem:[%s10090_s1 + $0x20] sm:$0xf] }
  0xa9   : > { %7192 = vmatmul.mubr.msk.f32.gmra.mxu0 %vm298_vm4, %v8273_v56 }
  0xaa   : > { %7242 = vmatmul.mubr.msk.f32.gmra.mxu1 %vm298_vm4, %v8277_v54  ;;  %7246 = vmatprep.mubr.msk.f32.mxu0 %vm298_vm4, %v7801_v30  ;;  %v10202_v30 = vld [vmem:[#allocation32_spill] sm:$0xff] }
  0xab   : > { %7296 = vmatprep.mubr.msk.f32.mxu1 %vm298_vm4, %v8078_v57 }
  0xad   : > { %7247 = vmatmul.mubr.msk.f32.vlgmr.msra.gmra.mxu0 %vm298_vm4, %v7805_v32  ;;  %v8410_v32 = vld [vmem:[#allocation2 + $0x181] sm:$0xff] }
  0xae   : > { %7297 = vmatmul.mubr.msk.f32.vlgmr.msra.gmra.mxu1 %vm298_vm4, %v8097_v31  ;;  %7345 = vmatpush3.msk.msra.mxu0 %vm494_vm0, %v8086_v60  ;;  %v10208_v60 = vld [vmem:[#allocation8_spill] sm:$0xff]  ;;  %v10209_v31 = vld [vmem:[#allocation9_spill] sm:$0xff] }
  0xaf   : > { %7249 = vmatprep.mubr.msk.f32.mxu0 %vm298_vm4, %v7816_v34  ;;  %7299 = vmatprep.mubr.msk.f32.mxu1 %vm298_vm4, %v8101_v33 }
  0xb0   : > { %7395 = vmatpush3.msk.msra.mxu1 %vm494_vm0, %v8091_v15  ;;  %7444 = vmatprep.subr.msk.mxu0 %vm494_vm0, %v8294_v35 }
  0xb1   : > { %7250 = vmatmul.mubr.msk.f32.gmra.mxu0 %vm298_vm4, %v7828_v36 }
  0xb2   : > { %7300 = vmatmul.mubr.msk.f32.gmra.mxu1 %vm298_vm4, %v8115_v11  ;;  %7252 = vmatprep.mubr.msk.f32.mxu0 %vm298_vm4, %v7832_v38 }
  0xb3   : > { %7302 = vmatprep.mubr.msk.f32.mxu1 %vm298_vm4, %v8119_v16 }
  0xb5   : > { %7253 = vmatmul.mubr.msk.f32.gmra.mxu0 %vm298_vm4, %v7844_v40 }
  0xb6   : > { %7303 = vmatmul.mubr.msk.f32.gmra.mxu1 %vm298_vm4, %v8127_v17  ;;  %7255 = vmatprep.mubr.msk.f32.mxu0 %vm298_vm4, %v7848_v42 }
  0xb7   : > { %7305 = vmatprep.mubr.msk.f32.mxu1 %vm298_vm4, %v8131_v37 }
  0xb9   : > { %7256 = vmatmul.mubr.msk.f32.gmra.mxu0 %vm298_vm4, %v7860_v44 }
  0xba   : > { %7306 = vmatmul.mubr.msk.f32.gmra.mxu1 %vm298_vm4, %v8139_v41  ;;  %7258 = vmatprep.mubr.msk.f32.mxu0 %vm298_vm4, %v7864_v46 }
  0xbb   : > { %7308 = vmatprep.mubr.msk.f32.mxu1 %vm298_vm4, %v8143_v39 }
  0xbd   : > { %7259 = vmatmul.mubr.msk.f32.gmra.mxu0 %vm298_vm4, %v7868_v48 }
  0xbe   : > { %7309 = vmatmul.mubr.msk.f32.gmra.mxu1 %vm298_vm4, %v8151_v45  ;;  %7261 = vmatprep.mubr.msk.f32.mxu0 %vm298_vm4, %v7878_v52 }
  0xbf   : > { %7311 = vmatprep.mubr.msk.f32.mxu1 %vm298_vm4, %v8155_v43 }
  0xc1   : > { %7262 = vmatmul.mubr.msk.f32.gmra.mxu0 %vm298_vm4, %v7912_v62 }
  0xc2   : > { %7312 = vmatmul.mubr.msk.f32.gmra.mxu1 %vm298_vm4, %v8163_v49  ;;  %7264 = vmatprep.mubr.msk.f32.mxu0 %vm298_vm4, %v7916_v0 }
  0xc3   : > { %7314 = vmatprep.mubr.msk.f32.mxu1 %vm298_vm4, %v8167_v47 }
  0xc5   : > { %7265 = vmatmul.mubr.msk.f32.gmra.mxu0 %vm298_vm4, %v7928_v2 }
  0xc6   : > { %7315 = vmatmul.mubr.msk.f32.gmra.mxu1 %vm298_vm4, %v8175_v63  ;;  %7267 = vmatprep.mubr.msk.f32.mxu0 %vm298_vm4, %v7932_v4 }
  0xc7   : > { %7317 = vmatprep.mubr.msk.f32.mxu1 %vm298_vm4, %v8179_v59 }
  0xc9   : > { %7268 = vmatmul.mubr.msk.f32.gmra.mxu0 %vm298_vm4, %v7944_v6 }
  0xca   : > { %7318 = vmatmul.mubr.msk.f32.gmra.mxu1 %vm298_vm4, %v8187_v3  ;;  %7270 = vmatprep.mubr.msk.f32.mxu0 %vm298_vm4, %v7948_v8 }
  0xcb   : > { %7320 = vmatprep.mubr.msk.f32.mxu1 %vm298_vm4, %v8191_v1 }
  0xcd   : > { %7271 = vmatmul.mubr.msk.f32.gmra.mxu0 %vm298_vm4, %v7960_v10 }
  0xce   : > { %7321 = vmatmul.mubr.msk.f32.gmra.mxu1 %vm298_vm4, %v8199_v7  ;;  %7273 = vmatprep.mubr.msk.f32.mxu0 %vm298_vm4, %v7964_v13 }
  0xcf   : > { %7323 = vmatprep.mubr.msk.f32.mxu1 %vm298_vm4, %v8203_v5 }
  0xd1   : > { %7274 = vmatmul.mubr.msk.f32.gmra.mxu0 %vm298_vm4, %v7983_v18 }
  0xd2   : > { %7324 = vmatmul.mubr.msk.f32.gmra.mxu1 %vm298_vm4, %v8211_v12  ;;  %7276 = vmatprep.mubr.msk.f32.mxu0 %vm298_vm4, %v7989_v20  ;;  %v10204_v12 = vld [vmem:[#allocation33_spill] sm:$0xff] }
  0xd3   : > { %7326 = vmatprep.mubr.msk.f32.mxu1 %vm298_vm4, %v8215_v9  ;;  %v8412_v9 = vld [vmem:[#allocation2 + $0x182] sm:$0xff] }
  0xd4   : > { %10203 = vst [vmem:[#allocation32_spill] sm:$0xff] %v8412_v9 }
  0xd5   : > { %7277 = vmatmul.mubr.msk.f32.gmra.mxu0 %vm298_vm4, %v8003_v22 }
  0xd6   : > { %7327 = vmatmul.mubr.msk.f32.gmra.mxu1 %vm298_vm4, %v8223_v19  ;;  %7279 = vmatprep.mubr.msk.f32.mxu0 %vm298_vm4, %v8007_v24  ;;  %v8424_v19 = vld [vmem:[#allocation2 + $0x18a] sm:$0xff] }
  0xd7   : > { %7329 = vmatprep.mubr.msk.f32.mxu1 %vm298_vm4, %v8227_v14  ;;  %v8420_v14 = vld [vmem:[#allocation2 + $0x189] sm:$0xff]  ;;  %10205 = vst [vmem:[#allocation33_spill] sm:$0xff] %v8424_v19 }
  0xd9   : > { %7280 = vmatmul.mubr.msk.f32.gmra.mxu0 %vm298_vm4, %v8019_v26 }
  0xda   : > { %7330 = vmatmul.mubr.msk.f32.gmra.mxu1 %vm298_vm4, %v8235_v23  ;;  %7282 = vmatprep.mubr.msk.f32.mxu0 %vm298_vm4, %v8023_v28 }
  0xdb   : > { %7332 = vmatprep.mubr.msk.f32.mxu1 %vm298_vm4, %v8239_v21  ;;  %v10206_v21 = vld [vmem:[#allocation6_spill] sm:$0xff] }
  0xdd   : > { %7283 = vmatmul.mubr.msk.f32.gmra.mxu0 %vm298_vm4, %v8035_v50 }
  0xde   : > { %7333 = vmatmul.mubr.msk.f32.gmra.mxu1 %vm298_vm4, %v8247_v27  ;;  %7285 = vmatprep.mubr.msk.f32.mxu0 %vm298_vm4, %v8039_v53 }
  0xdf   : > { %7335 = vmatprep.mubr.msk.f32.mxu1 %vm298_vm4, %v8251_v25  ;;  %v7048_v23 = vpop.f32.mrf.mxu0 }
  0xe0   : > { %v7098_v25 = vpop.f32.mrf.mxu1 }
  0xe1   : > { %7286 = vmatmul.mubr.msk.f32.gmra.mxu0 %vm298_vm4, %v8051_v55  ;;  %v8434_v27 = vadd.f32 %v7098_v25, %v7048_v23 }
  0xe2   : > { %7336 = vmatmul.mubr.msk.f32.gmra.mxu1 %vm298_vm4, %v8259_v51  ;;  %7288 = vmatprep.mubr.msk.f32.mxu0 %vm298_vm4, %v10202_v30  ;;  %v888_v51 = vpop.f32.mrf.mxu1 }
  0xe3   : > { %7338 = vmatprep.mubr.msk.f32.mxu1 %vm298_vm4, %v8263_v29  ;;  %v564_v29 = vpop.f32.mrf.mxu0 }
  0xe4   : > { %v8440_v57 = vadd.f32 %v888_v51, %v564_v29  ;;  %v10211_v51 = vld [vmem:[#allocation11_spill] sm:$0xff] }
  0xe5   : > { %7289 = vmatmul.mubr.msk.f32.gmra.mxu0 %vm298_vm4, %v10204_v12 }
  0xe6   : > { %7339 = vmatmul.mubr.msk.f32.gmra.mxu1 %vm298_vm4, %v8273_v56  ;;  %7291 = vmatprep.mubr.msk.f32.mxu0 %vm298_vm4, %v8410_v32  ;;  %v10207_v56 = vld [vmem:[#allocation7_spill] sm:$0xff] }
  0xe7   : > { %7341 = vmatprep.mubr.msk.f32.mxu1 %vm298_vm4, %v8412_v9 }
  0xe9   : > { %7292 = vmatmul.mubr.msk.f32.gmra.mxu0 %vm298_vm4, %v8420_v14 }
  0xea   : > { %7342 = vmatmul.mubr.msk.f32.gmra.mxu1 %vm298_vm4, %v8424_v19  ;;  %7346 = vmatprep.mubr.msk.f32.mxu0 %vm298_vm4, %v10206_v21  ;;  %v10210_v21 = vld [vmem:[#allocation10_spill] sm:$0xff] }
  0xeb   : > { %7396 = vmatprep.mubr.msk.f32.mxu1 %vm298_vm4, %v7816_v34 }
  0xed   : > { %7347 = vmatmul.mubr.msk.f32.vlgmr.msra.gmra.mxu0 %vm298_vm4, %v10207_v56  ;;  %v10212_v56 = vld [vmem:[#allocation12_spill] sm:$0xff] }
  0xee   : > { %7397 = vmatmul.mubr.msk.f32.vlgmr.msra.gmra.mxu1 %vm298_vm4, %v7828_v36  ;;  %7445 = vmatpush3.msk.msra.mxu0 %vm494_vm0, %v8294_v35 }
  0xef   : > { %7349 = vmatprep.mubr.msk.f32.mxu0 %vm298_vm4, %v10208_v60  ;;  %7399 = vmatprep.mubr.msk.f32.mxu1 %vm298_vm4, %v7832_v38 }
  0xf1   : > { %v7051_v34 = vpop.f32.mrf.mxu0  ;;  %7350 = vmatmul.mubr.msk.f32.gmra.mxu0 %vm298_vm4, %v10209_v31 }
  0xf2   : > { %v7101_v15 = vpop.f32.mrf.mxu1  ;;  %7400 = vmatmul.mubr.msk.f32.gmra.mxu1 %vm298_vm4, %v7844_v40  ;;  %7352 = vmatprep.mubr.msk.f32.mxu0 %vm298_vm4, %v10210_v21  ;;  %v10213_v21 = vld [vmem:[#allocation13_spill] sm:$0xff] }
  0xf3   : > { %v8452_v36 = vadd.f32 %v7101_v15, %v7051_v34  ;;  %7402 = vmatprep.mubr.msk.f32.mxu1 %vm298_vm4, %v7848_v42  ;;  %v574_v35 = vpop.f32.mrf.mxu0 }
  0xf4   : > { %v898_v23 = vpop.f32.mrf.mxu1 }
  0xf5   : > { %v8458_v25 = vadd.f32 %v898_v23, %v574_v35  ;;  %v7054_v38 = vpop.f32.mrf.mxu0  ;;  %7353 = vmatmul.mubr.msk.f32.gmra.mxu0 %vm298_vm4, %v10211_v51  ;;  %v10214_v35 = vld [vmem:[#allocation14_spill] sm:$0xff] }
  0xf6   : > { %v7104_v29 = vpop.f32.mrf.mxu1  ;;  %7403 = vmatmul.mubr.msk.f32.gmra.mxu1 %vm298_vm4, %v7860_v44  ;;  %7355 = vmatprep.mubr.msk.f32.mxu0 %vm298_vm4, %v10212_v56  ;;  %v10215_v56 = vld [vmem:[#allocation15_spill] sm:$0xff] }
  0xf7   : > { %v8464_v40 = vadd.f32 %v7104_v29, %v7054_v38  ;;  %7405 = vmatprep.mubr.msk.f32.mxu1 %vm298_vm4, %v7864_v46  ;;  %v584_v42 = vpop.f32.mrf.mxu0 }
  0xf8   : > { %v908_v60 = vpop.f32.mrf.mxu1 }
  0xf9   : > { %v8470_v34 = vadd.f32 %v908_v60, %v584_v42  ;;  %v7057_v15 = vpop.f32.mrf.mxu0  ;;  %7356 = vmatmul.mubr.msk.f32.gmra.mxu0 %vm298_vm4, %v10213_v21  ;;  %v10216_v42 = vld [vmem:[#allocation16_spill] sm:$0xff] }
  0xfa   : > { %v7107_v31 = vpop.f32.mrf.mxu1  ;;  %7406 = vmatmul.mubr.msk.f32.gmra.mxu1 %vm298_vm4, %v7868_v48  ;;  %7358 = vmatprep.mubr.msk.f32.mxu0 %vm298_vm4, %v10214_v35  ;;  %v10217_v35 = vld [vmem:[#allocation17_spill] sm:$0xff] }
  0xfb   : > { %v8476_v44 = vadd.f32 %v7107_v31, %v7057_v15  ;;  %7408 = vmatprep.mubr.msk.f32.mxu1 %vm298_vm4, %v7878_v52  ;;  %v594_v46 = vpop.f32.mrf.mxu0 }
  0xfc   : > { %v918_v23 = vpop.f32.mrf.mxu1 }
  0xfd   : > { %v8482_v38 = vadd.f32 %v918_v23, %v594_v46  ;;  %v7060_v29 = vpop.f32.mrf.mxu0  ;;  %7359 = vmatmul.mubr.msk.f32.gmra.mxu0 %vm298_vm4, %v10215_v56  ;;  %v10218_v46 = vld [vmem:[#allocation18_spill] sm:$0xff] }
  0xfe   : > { %v7110_v51 = vpop.f32.mrf.mxu1  ;;  %7409 = vmatmul.mubr.msk.f32.gmra.mxu1 %vm298_vm4, %v7912_v62  ;;  %7361 = vmatprep.mubr.msk.f32.mxu0 %vm298_vm4, %v10216_v42  ;;  %v10219_v42 = vld [vmem:[#allocation19_spill] sm:$0xff] }
  0xff   : > { %v8488_v48 = vadd.f32 %v7110_v51, %v7060_v29  ;;  %7411 = vmatprep.mubr.msk.f32.mxu1 %vm298_vm4, %v7916_v0  ;;  %v604_v52 = vpop.f32.mrf.mxu0 }
 0x100   : > { %v928_v60 = vpop.f32.mrf.mxu1 }
 0x101   : > { %v8494_v15 = vadd.f32 %v928_v60, %v604_v52  ;;  %v7063_v31 = vpop.f32.mrf.mxu0  ;;  %7362 = vmatmul.mubr.msk.f32.gmra.mxu0 %vm298_vm4, %v10217_v35  ;;  %v10220_v52 = vld [vmem:[#allocation20_spill] sm:$0xff] }
 0x102   : > { %v7113_v21 = vpop.f32.mrf.mxu1  ;;  %7412 = vmatmul.mubr.msk.f32.gmra.mxu1 %vm298_vm4, %v7928_v2  ;;  %7364 = vmatprep.mubr.msk.f32.mxu0 %vm298_vm4, %v10218_v46  ;;  %v10221_v46 = vld [vmem:[#allocation21_spill] sm:$0xff] }
 0x103   : > { %v8500_v62 = vadd.f32 %v7113_v21, %v7063_v31  ;;  %7414 = vmatprep.mubr.msk.f32.mxu1 %vm298_vm4, %v7932_v4  ;;  %v614_v0 = vpop.f32.mrf.mxu0 }
 0x104   : > { %v938_v23 = vpop.f32.mrf.mxu1 }
 0x105   : > { %v8506_v29 = vadd.f32 %v938_v23, %v614_v0  ;;  %v7066_v51 = vpop.f32.mrf.mxu0  ;;  %7365 = vmatmul.mubr.msk.f32.gmra.mxu0 %vm298_vm4, %v10219_v42  ;;  %v10222_v0 = vld [vmem:[#allocation22_spill] sm:$0xff] }
 0x106   : > { %v7116_v56 = vpop.f32.mrf.mxu1  ;;  %7415 = vmatmul.mubr.msk.f32.gmra.mxu1 %vm298_vm4, %v7944_v6  ;;  %7367 = vmatprep.mubr.msk.f32.mxu0 %vm298_vm4, %v10220_v52  ;;  %v10223_v52 = vld [vmem:[#allocation23_spill] sm:$0xff] }
 0x107   : > { %v8512_v2 = vadd.f32 %v7116_v56, %v7066_v51  ;;  %7417 = vmatprep.mubr.msk.f32.mxu1 %vm298_vm4, %v7948_v8  ;;  %v624_v4 = vpop.f32.mrf.mxu0 }
 0x108   : > { %v948_v60 = vpop.f32.mrf.mxu1 }
 0x109   : > { %v8518_v31 = vadd.f32 %v948_v60, %v624_v4  ;;  %v7069_v21 = vpop.f32.mrf.mxu0  ;;  %7368 = vmatmul.mubr.msk.f32.gmra.mxu0 %vm298_vm4, %v10221_v46  ;;  %v10224_v4 = vld [vmem:[#allocation24_spill] sm:$0xff]  ;;  %v10225_v46 = vld [vmem:[#allocation25_spill] sm:$0xff] }
 0x10a   : > { %v7119_v35 = vpop.f32.mrf.mxu1  ;;  %7418 = vmatmul.mubr.msk.f32.gmra.mxu1 %vm298_vm4, %v7960_v10  ;;  %7370 = vmatprep.mubr.msk.f32.mxu0 %vm298_vm4, %v10222_v0  ;;  %v10226_v0 = vld [vmem:[#allocation26_spill] sm:$0xff] }
 0x10b   : > { %v8524_v6 = vadd.f32 %v7119_v35, %v7069_v21  ;;  %7420 = vmatprep.mubr.msk.f32.mxu1 %vm298_vm4, %v7964_v13  ;;  %v634_v8 = vpop.f32.mrf.mxu0 }
 0x10c   : > { %v958_v23 = vpop.f32.mrf.mxu1 }
 0x10d   : > { %v8530_v51 = vadd.f32 %v958_v23, %v634_v8  ;;  %v7072_v56 = vpop.f32.mrf.mxu0  ;;  %7371 = vmatmul.mubr.msk.f32.gmra.mxu0 %vm298_vm4, %v10223_v52  ;;  %v10228_v52 = vld [vmem:[#allocation28_spill] sm:$0xff] }
 0x10e   : > { %v7122_v42 = vpop.f32.mrf.mxu1  ;;  %7421 = vmatmul.mubr.msk.f32.gmra.mxu1 %vm298_vm4, %v7983_v18  ;;  %7373 = vmatprep.mubr.msk.f32.mxu0 %vm298_vm4, %v10224_v4 }
 0x10f   : > { %v8536_v10 = vadd.f32 %v7122_v42, %v7072_v56  ;;  %7423 = vmatprep.mubr.msk.f32.mxu1 %vm298_vm4, %v7989_v20  ;;  %v8542_v13 = vpop.f32.mrf.mxu0  ;;  %v10227_v42 = vld [vmem:[#allocation27_spill] sm:$0xff] }
 0x110   : > { %v8544_v60 = vpop.f32.mrf.mxu1 }
 0x111   : > { %v7075_v21 = vpop.f32.mrf.mxu0  ;;  %7374 = vmatmul.mubr.msk.f32.gmra.mxu0 %vm298_vm4, %v10225_v46  ;;  %v10229_v46 = vld [vmem:[#allocation29_spill] sm:$0xff] }
 0x112   : > { %v7125_v35 = vpop.f32.mrf.mxu1  ;;  %7424 = vmatmul.mubr.msk.f32.gmra.mxu1 %vm298_vm4, %v8003_v22  ;;  %7376 = vmatprep.mubr.msk.f32.mxu0 %vm298_vm4, %v10226_v0  ;;  %v10230_v0 = vld [vmem:[#allocation30_spill] sm:$0xff] }
 0x113   : > { %v8550_v18 = vadd.f32 %v7125_v35, %v7075_v21  ;;  %7426 = vmatprep.mubr.msk.f32.mxu1 %vm298_vm4, %v8007_v24  ;;  %v8556_v20 = vpop.f32.mrf.mxu0 }
 0x114   : > { %v8558_v8 = vpop.f32.mrf.mxu1 }
 0x115   : > { %v7078_v23 = vpop.f32.mrf.mxu0  ;;  %7377 = vmatmul.mubr.msk.f32.gmra.mxu0 %vm298_vm4, %v10227_v42 }
 0x116   : > { %v7128_v56 = vpop.f32.mrf.mxu1  ;;  %7427 = vmatmul.mubr.msk.f32.gmra.mxu1 %vm298_vm4, %v8019_v26  ;;  %7379 = vmatprep.mubr.msk.f32.mxu0 %vm298_vm4, %v10228_v52  ;;  %v10231_v52 = vld [vmem:[#allocation31_spill] sm:$0xff] }
 0x117   : > { %v8564_v22 = vadd.f32 %v7128_v56, %v7078_v23  ;;  %7429 = vmatprep.mubr.msk.f32.mxu1 %vm298_vm4, %v8023_v28  ;;  %v8570_v24 = vpop.f32.mrf.mxu0 }
 0x118   : > { %v8572_v4 = vpop.f32.mrf.mxu1 }
 0x119   : > { %v7081_v21 = vpop.f32.mrf.mxu0  ;;  %7380 = vmatmul.mubr.msk.f32.gmra.mxu0 %vm298_vm4, %v10229_v46 }
 0x11a   : > { %v7131_v35 = vpop.f32.mrf.mxu1  ;;  %7430 = vmatmul.mubr.msk.f32.gmra.mxu1 %vm298_vm4, %v8035_v50  ;;  %7382 = vmatprep.mubr.msk.f32.mxu0 %vm298_vm4, %v10230_v0  ;;  %v10232_v0 = vld [vmem:[#allocation34_spill] sm:$0xff] }
 0x11b   : > { %v8578_v26 = vadd.f32 %v7131_v35, %v7081_v21  ;;  %7432 = vmatprep.mubr.msk.f32.mxu1 %vm298_vm4, %v8039_v53  ;;  %v8584_v28 = vpop.f32.mrf.mxu0 }
 0x11c   : > { %v8586_v23 = vpop.f32.mrf.mxu1 }
 0x11d   : > { %v7084_v56 = vpop.f32.mrf.mxu0  ;;  %7383 = vmatmul.mubr.msk.f32.gmra.mxu0 %vm298_vm4, %v10231_v52 }
 0x11e   : > { %v7134_v42 = vpop.f32.mrf.mxu1  ;;  %7433 = vmatmul.mubr.msk.f32.gmra.mxu1 %vm298_vm4, %v8051_v55  ;;  %7385 = vmatprep.mubr.msk.f32.mxu0 %vm298_vm4, %v8057_v58 }
 0x11f   : > { %v8592_v50 = vadd.f32 %v7134_v42, %v7084_v56  ;;  %7435 = vmatprep.mubr.msk.f32.mxu1 %vm298_vm4, %v10202_v30  ;;  %v8598_v53 = vpop.f32.mrf.mxu0  ;;  %v2638_v56 = vld [vmem:[#allocation2 + $0x198] sm:$0xff] }
 0x120   : > { %v8600_v21 = vpop.f32.mrf.mxu1  ;;  %v3028_v42 = vld [vmem:[#allocation2 + $0x199] sm:$0xff] }
 0x121   : > { %v7087_v35 = vpop.f32.mrf.mxu0  ;;  %7386 = vmatmul.mubr.msk.f32.gmra.mxu0 %vm298_vm4, %v8069_v61 }
 0x122   : > { %v7137_v46 = vpop.f32.mrf.mxu1  ;;  %7436 = vmatmul.mubr.msk.f32.gmra.mxu1 %vm298_vm4, %v10204_v12  ;;  %7388 = vmatprep.mubr.msk.f32.mxu0 %vm298_vm4, %v10232_v0  ;;  %v2639_v12 = vld [vmem:[#allocation2 + $0x1a0] sm:$0xff] }
 0x123   : > { %v8606_v55 = vadd.f32 %v7137_v46, %v7087_v35  ;;  %7438 = vmatprep.mubr.msk.f32.mxu1 %vm298_vm4, %v8410_v32  ;;  %v694_v58 = vpop.f32.mrf.mxu0  ;;  %v3029_v32 = vld [vmem:[#allocation2 + $0x1a1] sm:$0xff] }
 0x124   : > { %v1018_v30 = vpop.f32.mrf.mxu1 }
 0x125   : > { %v8612_v52 = vadd.f32 %v1018_v30, %v694_v58  ;;  %v7090_v19 = vpop.f32.mrf.mxu0  ;;  %7389 = vmatmul.mubr.msk.f32.gmra.mxu0 %vm298_vm4, %v8277_v54 }
 0x126   : > { %v7140_v9 = vpop.f32.mrf.mxu1  ;;  %7439 = vmatmul.mubr.msk.f32.gmra.mxu1 %vm298_vm4, %v8420_v14  ;;  %7391 = vmatprep.mubr.msk.f32.mxu0 %vm298_vm4, %v2638_v56 }
 0x127   : > { %v8618_v61 = vadd.f32 %v7140_v9, %v7090_v19  ;;  %7441 = vmatprep.mubr.msk.f32.mxu1 %vm298_vm4, %v3028_v42  ;;  %v704_v35 = vpop.f32.mrf.mxu0 }
 0x128   : > { %v1028_v46 = vpop.f32.mrf.mxu1 }
 0x129   : > { %v8622_v0 = vadd.f32 %v1028_v46, %v704_v35  ;;  %v7093_v58 = vpop.f32.mrf.mxu0  ;;  %7392 = vmatmul.mubr.msk.f32.gmra.mxu0 %vm298_vm4, %v2639_v12 }
 0x12a   : > { %v7143_v30 = vpop.f32.mrf.mxu1  ;;  %7442 = vmatmul.mubr.msk.f32.gmra.mxu1 %vm298_vm4, %v3029_v32  ;;  %7446 = vmatprep.mubr.msk.f32.mxu0 %vm298_vm4, %v8101_v33 }
 0x12b   : > { %v8626_v54 = vadd.f32 %v7143_v30, %v7093_v58  ;;  %v714_v9 = vpop.f32.mrf.mxu0 }
 0x12c   : > { %v1038_v14 = vpop.f32.mrf.mxu1 }
 0x12d   : > { %v8630_v19 = vadd.f32 %v1038_v14, %v714_v9  ;;  %v7148_v56 = vpop.f32.mrf.mxu0  ;;  %7447 = vmatmul.mubr.msk.f32.vlgmr.msra.gmra.mxu0 %vm298_vm4, %v8115_v11 }
 0x12e   : > { %v7198_v42 = vpop.f32.mrf.mxu1  ;;  %v1406_v35 = vadd.f32 %v7148_v56, %v8434_v27  ;;  %7449 = vmatprep.mubr.msk.f32.mxu0 %vm298_vm4, %v8119_v16 }
 0x12f   : > { %v1246_v12 = vpop.f32.mrf.mxu0 }
 0x130   : > { %v1636_v32 = vpop.f32.mrf.mxu1  ;;  %v1405_v46 = vadd.f32 %v1246_v12, %v8440_v57  ;;  %v8638_v58 = vadd.f32 %v7198_v42, %v1406_v35 }
 0x131   : > { %v7151_v33 = vpop.f32.mrf.mxu0  ;;  %7450 = vmatmul.mubr.msk.f32.gmra.mxu0 %vm298_vm4, %v8127_v17 }
 0x132   : > { %v7201_v30 = vpop.f32.mrf.mxu1  ;;  %v1408_v9 = vadd.f32 %v7151_v33, %v8452_v36  ;;  %v8643_v11 = vadd.f32 %v1636_v32, %v1405_v46  ;;  %7452 = vmatprep.mubr.msk.f32.mxu0 %vm298_vm4, %v8131_v37 }
 0x133   : > { %v1256_v27 = vpop.f32.mrf.mxu0 }
 0x134   : > { %v1646_v16 = vpop.f32.mrf.mxu1  ;;  %v1407_v14 = vadd.f32 %v1256_v27, %v8458_v25  ;;  %v8648_v56 = vadd.f32 %v7201_v30, %v1408_v9 }
 0x135   : > { %v7154_v57 = vpop.f32.mrf.mxu0  ;;  %7453 = vmatmul.mubr.msk.f32.gmra.mxu0 %vm298_vm4, %v8139_v41 }
 0x136   : > { %v7204_v42 = vpop.f32.mrf.mxu1  ;;  %v1410_v17 = vadd.f32 %v7154_v57, %v8464_v40  ;;  %v8653_v35 = vadd.f32 %v1646_v16, %v1407_v14  ;;  %7455 = vmatprep.mubr.msk.f32.mxu0 %vm298_vm4, %v8143_v39 }
 0x137   : > { %v1266_v36 = vpop.f32.mrf.mxu0 }
 0x138   : > { %v1656_v37 = vpop.f32.mrf.mxu1  ;;  %v1409_v12 = vadd.f32 %v1266_v36, %v8470_v34  ;;  %v8658_v32 = vadd.f32 %v7204_v42, %v1410_v17 }
 0x139   : > { %v7157_v25 = vpop.f32.mrf.mxu0  ;;  %7456 = vmatmul.mubr.msk.f32.gmra.mxu0 %vm298_vm4, %v8151_v45 }
 0x13a   : > { %v7207_v46 = vpop.f32.mrf.mxu1  ;;  %v1412_v41 = vadd.f32 %v7157_v25, %v8476_v44  ;;  %v8663_v33 = vadd.f32 %v1656_v37, %v1409_v12  ;;  %7458 = vmatprep.mubr.msk.f32.mxu0 %vm298_vm4, %v8155_v43 }
 0x13b   : > { %v1276_v40 = vpop.f32.mrf.mxu0 }
 0x13c   : > { %v1666_v39 = vpop.f32.mrf.mxu1  ;;  %v1411_v30 = vadd.f32 %v1276_v40, %v8482_v38  ;;  %v8668_v9 = vadd.f32 %v7207_v46, %v1412_v41 }
 0x13d   : > { %v7160_v34 = vpop.f32.mrf.mxu0  ;;  %7459 = vmatmul.mubr.msk.f32.gmra.mxu0 %vm298_vm4, %v8163_v49 }
 0x13e   : > { %v7210_v27 = vpop.f32.mrf.mxu1  ;;  %v1414_v45 = vadd.f32 %v7160_v34, %v8488_v48  ;;  %v8673_v16 = vadd.f32 %v1666_v39, %v1411_v30  ;;  %7461 = vmatprep.mubr.msk.f32.mxu0 %vm298_vm4, %v8167_v47  ;;  %v3406_v34 = vld [vmem:[#allocation2 + $0x10a] sm:$0xff] }
 0x13f   : > { %v1286_v44 = vpop.f32.mrf.mxu0 }
 0x140   : > { %v1676_v43 = vpop.f32.mrf.mxu1  ;;  %v1413_v14 = vadd.f32 %v1286_v44, %v8494_v15  ;;  %v8678_v57 = vadd.f32 %v7210_v27, %v1414_v45 }
 0x141   : > { %v7163_v38 = vpop.f32.mrf.mxu0  ;;  %7462 = vmatmul.mubr.msk.f32.gmra.mxu0 %vm298_vm4, %v8175_v63 }
 0x142   : > { %v7213_v42 = vpop.f32.mrf.mxu1  ;;  %v1416_v49 = vadd.f32 %v7163_v38, %v8500_v62  ;;  %v8683_v17 = vadd.f32 %v1676_v43, %v1413_v14  ;;  %7464 = vmatprep.mubr.msk.f32.mxu0 %vm298_vm4, %v8179_v59 }
 0x143   : > { %v1296_v48 = vpop.f32.mrf.mxu0 }
 0x144   : > { %v1686_v47 = vpop.f32.mrf.mxu1  ;;  %v1415_v36 = vadd.f32 %v1296_v48, %v8506_v29  ;;  %v8688_v37 = vadd.f32 %v7213_v42, %v1416_v49  ;;  %v3408_v42 = vld [vmem:[#allocation2 + $0x122] sm:$0xff] }
 0x145   : > { %v7166_v15 = vpop.f32.mrf.mxu0  ;;  %7465 = vmatmul.mubr.msk.f32.gmra.mxu0 %vm298_vm4, %v8187_v3 }
 0x146   : > { %v7216_v12 = vpop.f32.mrf.mxu1  ;;  %v1418_v63 = vadd.f32 %v7166_v15, %v8512_v2  ;;  %v8693_v25 = vadd.f32 %v1686_v47, %v1415_v36  ;;  %7467 = vmatprep.mubr.msk.f32.mxu0 %vm298_vm4, %v8191_v1  ;;  %v3405_v2 = vld [vmem:[#allocation2 + $0xfa] sm:$0xff]  ;;  %v3409_v36 = vld [vmem:[#allocation2 + $0x12a] sm:$0xff] }
 0x147   : > { %v1306_v62 = vpop.f32.mrf.mxu0 }
 0x148   : > { %v1696_v59 = vpop.f32.mrf.mxu1  ;;  %v1417_v46 = vadd.f32 %v1306_v62, %v8518_v31  ;;  %v8698_v41 = vadd.f32 %v7216_v12, %v1418_v63  ;;  %v3410_v63 = vld [vmem:[#allocation2 + $0x13a] sm:$0xff] }
 0x149   : > { %v7169_v29 = vpop.f32.mrf.mxu0  ;;  %7468 = vmatmul.mubr.msk.f32.gmra.mxu0 %vm298_vm4, %v8199_v7 }
 0x14a   : > { %v7219_v40 = vpop.f32.mrf.mxu1  ;;  %v1420_v3 = vadd.f32 %v7169_v29, %v8524_v6  ;;  %v8703_v39 = vadd.f32 %v1696_v59, %v1417_v46  ;;  %7470 = vmatprep.mubr.msk.f32.mxu0 %vm298_vm4, %v8203_v5  ;;  %v969_v6 = vadd.f32 %v8544_v60, %v8542_v13  ;;  %v3407_v5 = vld [vmem:[#allocation2 + $0x112] sm:$0xff]  ;;  %v979_v13 = vadd.f32 %v8558_v8, %v8556_v20 }
 0x14b   : > { %v1316_v1 = vpop.f32.mrf.mxu0  ;;  %v989_v20 = vadd.f32 %v8572_v4, %v8570_v24  ;;  %v999_v24 = vadd.f32 %v8586_v23, %v8584_v28  ;;  %v1009_v28 = vadd.f32 %v8600_v21, %v8598_v53  ;;  %v10233_v53 = vld [vmem:[#allocation32_spill] sm:$0xff] }
 0x14c   : > { %v1706_v30 = vpop.f32.mrf.mxu1  ;;  %v1419_v31 = vadd.f32 %v1316_v1, %v8530_v51  ;;  %v8708_v27 = vadd.f32 %v7219_v40, %v1420_v3  ;;  %v3411_v40 = vld [vmem:[#allocation2 + $0x142] sm:$0xff]  ;;  %v3412_v1 = vld [vmem:[#allocation2 + $0x152] sm:$0xff] }
 0x14d   : > { %v7172_v45 = vpop.f32.mrf.mxu0  ;;  %7471 = vmatmul.mubr.msk.f32.gmra.mxu0 %vm298_vm4, %v3405_v2 }
 0x14e   : > { %v7222_v7 = vpop.f32.mrf.mxu1  ;;  %v1422_v44 = vadd.f32 %v7172_v45, %v8536_v10  ;;  %v8714_v43 = vadd.f32 %v1706_v30, %v1419_v31  ;;  %7473 = vmatprep.mubr.msk.f32.mxu0 %vm298_vm4, %v3406_v34 }
 0x14f   : > { %v1326_v14 = vpop.f32.mrf.mxu0 }
 0x150   : > { %v1716_v38 = vpop.f32.mrf.mxu1  ;;  %v1421_v51 = vadd.f32 %v1326_v14, %v969_v6  ;;  %v8717_v49 = vadd.f32 %v7222_v7, %v1422_v44  ;;  %v3413_v7 = vld [vmem:[#allocation2 + $0x15a] sm:$0xff] }
 0x151   : > { %v7175_v48 = vpop.f32.mrf.mxu0  ;;  %7474 = vmatmul.mubr.msk.f32.gmra.mxu0 %vm298_vm4, %v3407_v5  ;;  %v3414_v5 = vld [vmem:[#allocation2 + $0x16a] sm:$0xff] }
 0x152   : > { %v7225_v47 = vpop.f32.mrf.mxu1  ;;  %v1424_v10 = vadd.f32 %v7175_v48, %v8550_v18  ;;  %v8723_v60 = vadd.f32 %v1716_v38, %v1421_v51  ;;  %7476 = vmatprep.mubr.msk.f32.mxu0 %vm298_vm4, %v3408_v42  ;;  %v3415_v48 = vld [vmem:[#allocation2 + $0x172] sm:$0xff] }
 0x153   : > { %v1336_v15 = vpop.f32.mrf.mxu0 }
 0x154   : > { %v1726_v12 = vpop.f32.mrf.mxu1  ;;  %v1423_v62 = vadd.f32 %v1336_v15, %v979_v13  ;;  %v8726_v59 = vadd.f32 %v7225_v47, %v1424_v10 }
 0x155   : > { %v7178_v46 = vpop.f32.mrf.mxu0  ;;  %7477 = vmatmul.mubr.msk.f32.gmra.mxu0 %vm298_vm4, %v3409_v36 }
 0x156   : > { %v7228_v29 = vpop.f32.mrf.mxu1  ;;  %v1426_v18 = vadd.f32 %v7178_v46, %v8564_v22  ;;  %v8732_v8 = vadd.f32 %v1726_v12, %v1423_v62  ;;  %7479 = vmatprep.mubr.msk.f32.mxu0 %vm298_vm4, %v3410_v63  ;;  %v3418_v46 = vld [vmem:[#allocation2 + $0x19a] sm:$0xff] }
 0x157   : > { %v1346_v3 = vpop.f32.mrf.mxu0 }
 0x158   : > { %v1736_v2 = vpop.f32.mrf.mxu1  ;;  %v1425_v30 = vadd.f32 %v1346_v3, %v989_v20  ;;  %v8735_v34 = vadd.f32 %v7228_v29, %v1426_v18 }
 0x159   : > { %v7181_v31 = vpop.f32.mrf.mxu0  ;;  %7480 = vmatmul.mubr.msk.f32.gmra.mxu0 %vm298_vm4, %v3411_v40  ;;  %v10234_v40 = vld [vmem:[#allocation33_spill] sm:$0xff] }
 0x15a   : > { %v7231_v45 = vpop.f32.mrf.mxu1  ;;  %v1428_v22 = vadd.f32 %v7181_v31, %v8578_v26  ;;  %v8741_v4 = vadd.f32 %v1736_v2, %v1425_v30  ;;  %7482 = vmatprep.mubr.msk.f32.mxu0 %vm298_vm4, %v3412_v1  ;;  %v3419_v1 = vld [vmem:[#allocation2 + $0x1a2] sm:$0xff] }
 0x15b   : > { %v1356_v6 = vpop.f32.mrf.mxu0 }
 0x15c   : > { %v1746_v44 = vpop.f32.mrf.mxu1  ;;  %v1427_v14 = vadd.f32 %v1356_v6, %v999_v24  ;;  %v8744_v38 = vadd.f32 %v7231_v45, %v1428_v22 }
 0x15d   : > { %v7184_v42 = vpop.f32.mrf.mxu0  ;;  %7483 = vmatmul.mubr.msk.f32.gmra.mxu0 %vm298_vm4, %v3413_v7 }
 0x15e   : > { %v7234_v51 = vpop.f32.mrf.mxu1  ;;  %v1430_v26 = vadd.f32 %v7184_v42, %v8592_v50  ;;  %v8750_v23 = vadd.f32 %v1746_v44, %v1427_v14  ;;  %7485 = vmatprep.mubr.msk.f32.mxu0 %vm298_vm4, %v3414_v5 }
 0x15f   : > { %v1366_v47 = vpop.f32.mrf.mxu0 }
 0x160   : > { %v1756_v13 = vpop.f32.mrf.mxu1  ;;  %v1429_v10 = vadd.f32 %v1366_v47, %v1009_v28  ;;  %v8753_v36 = vadd.f32 %v7234_v51, %v1430_v26 }
 0x161   : > { %v7187_v15 = vpop.f32.mrf.mxu0  ;;  %7486 = vmatmul.mubr.msk.f32.gmra.mxu0 %vm298_vm4, %v3415_v48 }
 0x162   : > { %v7237_v12 = vpop.f32.mrf.mxu1  ;;  %v1432_v63 = vadd.f32 %v7187_v15, %v8606_v55  ;;  %v8757_v62 = vadd.f32 %v1756_v13, %v1429_v10  ;;  %7488 = vmatprep.mubr.msk.f32.mxu0 %vm298_vm4, %v10233_v53 }
 0x163   : > { %v1376_v50 = vpop.f32.mrf.mxu0 }
 0x164   : > { %v1766_v21 = vpop.f32.mrf.mxu1  ;;  %v1431_v29 = vadd.f32 %v1376_v50, %v8612_v52  ;;  %v8762_v20 = vadd.f32 %v7237_v12, %v1432_v63 }
 0x165   : > { %v7190_v18 = vpop.f32.mrf.mxu0  ;;  %7489 = vmatmul.mubr.msk.f32.gmra.mxu0 %vm298_vm4, %v10234_v40 }
 0x166   : > { %v7240_v3 = vpop.f32.mrf.mxu1  ;;  %v1434_v2 = vadd.f32 %v7190_v18, %v8618_v61  ;;  %v8767_v55 = vadd.f32 %v1766_v21, %v1431_v29  ;;  %7491 = vmatprep.mubr.msk.f32.mxu0 %vm298_vm4, %v3418_v46 }
 0x167   : > { %v1386_v30 = vpop.f32.mrf.mxu0 }
 0x168   : > { %v1776_v31 = vpop.f32.mrf.mxu1  ;;  %v1433_v45 = vadd.f32 %v1386_v30, %v8622_v0  ;;  %v8771_v24 = vadd.f32 %v7240_v3, %v1434_v2 }
 0x169   : > { %v7193_v52 = vpop.f32.mrf.mxu0  ;;  %7492 = vmatmul.mubr.msk.f32.gmra.mxu0 %vm298_vm4, %v3419_v1 }
 0x16a   : > { %v7243_v22 = vpop.f32.mrf.mxu1  ;;  %v1436_v7 = vadd.f32 %v7193_v52, %v8626_v54  ;;  %v8775_v6 = vadd.f32 %v1776_v31, %v1433_v45 }
 0x16b   : > { %v1396_v61 = vpop.f32.mrf.mxu0 }
 0x16c   : > { %v1786_v44 = vpop.f32.mrf.mxu1  ;;  %v1435_v5 = vadd.f32 %v1396_v61, %v8630_v19  ;;  %v8778_v14 = vadd.f32 %v7243_v22, %v1436_v7 }
 0x16d   : > { %v7248_v42 = vpop.f32.mrf.mxu0 }
 0x16e   : > { %v8780_v51 = vpop.f32.mrf.mxu1  ;;  %v8782_v0 = vadd.f32 %v1786_v44, %v1435_v5  ;;  %v8785_v28 = vadd.f32 %v7248_v42, %v8638_v58 }
 0x16f   : > { %v2026_v26 = vpop.f32.mrf.mxu0 }
 0x170   : > { %v8787_v48 = vpop.f32.mrf.mxu1  ;;  %v8790_v54 = vadd.f32 %v2026_v26, %v8643_v11 }
 0x171   : > { %v7251_v47 = vpop.f32.mrf.mxu0 }
 0x172   : > { %v8792_v13 = vpop.f32.mrf.mxu1  ;;  %v8795_v19 = vadd.f32 %v7251_v47, %v8648_v56 }
 0x173   : > { %v2036_v10 = vpop.f32.mrf.mxu0 }
 0x174   : > { %v8797_v15 = vpop.f32.mrf.mxu1  ;;  %v8800_v12 = vadd.f32 %v2036_v10, %v8653_v35 }
 0x175   : > { %v7254_v58 = vpop.f32.mrf.mxu0 }
 0x176   : > { %v8802_v63 = vpop.f32.mrf.mxu1  ;;  %v8805_v53 = vadd.f32 %v7254_v58, %v8658_v32 }
 0x177   : > { %v2046_v11 = vpop.f32.mrf.mxu0 }
 0x178   : > { %v8807_v50 = vpop.f32.mrf.mxu1  ;;  %v8810_v21 = vadd.f32 %v2046_v11, %v8663_v33 }
 0x179   : > { %v7257_v56 = vpop.f32.mrf.mxu0 }
 0x17a   : > { %v8812_v46 = vpop.f32.mrf.mxu1  ;;  %v8815_v29 = vadd.f32 %v7257_v56, %v8668_v9 }
 0x17b   : > { %v2056_v35 = vpop.f32.mrf.mxu0 }
 0x17c   : > { %v8817_v18 = vpop.f32.mrf.mxu1  ;;  %v8820_v40 = vadd.f32 %v2056_v35, %v8673_v16 }
 0x17d   : > { %v7260_v32 = vpop.f32.mrf.mxu0 }
 0x17e   : > { %v8822_v3 = vpop.f32.mrf.mxu1  ;;  %v8825_v2 = vadd.f32 %v7260_v32, %v8678_v57 }
 0x17f   : > { %v2066_v33 = vpop.f32.mrf.mxu0 }
 0x180   : > { %v8827_v1 = vpop.f32.mrf.mxu1  ;;  %v8830_v30 = vadd.f32 %v2066_v33, %v8683_v17 }
 0x181   : > { %v7263_v9 = vpop.f32.mrf.mxu0 }
 0x182   : > { %v8832_v31 = vpop.f32.mrf.mxu1  ;;  %v8835_v45 = vadd.f32 %v7263_v9, %v8688_v37 }
 0x183   : > { %v2076_v16 = vpop.f32.mrf.mxu0 }
 0x184   : > { %v8837_v52 = vpop.f32.mrf.mxu1  ;;  %v8840_v22 = vadd.f32 %v2076_v16, %v8693_v25 }
 0x185   : > { %v7266_v57 = vpop.f32.mrf.mxu0 }
 0x186   : > { %v8842_v7 = vpop.f32.mrf.mxu1  ;;  %v8845_v61 = vadd.f32 %v7266_v57, %v8698_v41 }
 0x187   : > { %v2086_v17 = vpop.f32.mrf.mxu0 }
 0x188   : > { %v8847_v44 = vpop.f32.mrf.mxu1  ;;  %v8850_v5 = vadd.f32 %v2086_v17, %v8703_v39 }
 0x189   : > { %v7269_v37 = vpop.f32.mrf.mxu0 }
 0x18a   : > { %v8852_v42 = vpop.f32.mrf.mxu1  ;;  %v8855_v26 = vadd.f32 %v7269_v37, %v8708_v27 }
 0x18b   : > { %10235 = vst [vmem:[#allocation6_spill] sm:$0xff] %v8852_v42  ;;  %v2096_v25 = vpop.f32.mrf.mxu0 }
 0x18c   : > { %v8857_v47 = vpop.f32.mrf.mxu1  ;;  %v8860_v10 = vadd.f32 %v2096_v25, %v8714_v43 }
 0x18d   : > { %10236 = vst [vmem:[#allocation7_spill] sm:$0xff] %v8857_v47  ;;  %v7272_v41 = vpop.f32.mrf.mxu0 }
 0x18e   : > { %10237 = vst [vmem:[#allocation8_spill] sm:$0xff] %v8860_v10  ;;  %v8862_v58 = vpop.f32.mrf.mxu1  ;;  %v8865_v11 = vadd.f32 %v7272_v41, %v8717_v49 }
 0x18f   : > { %10238 = vst [vmem:[#allocation9_spill] sm:$0xff] %v8862_v58  ;;  %v2106_v39 = vpop.f32.mrf.mxu0 }
 0x190   : > { %10239 = vst [vmem:[#allocation10_spill] sm:$0xff] %v8865_v11  ;;  %v8867_v56 = vpop.f32.mrf.mxu1  ;;  %v8870_v35 = vadd.f32 %v2106_v39, %v8723_v60 }
 0x191   : > { %10240 = vst [vmem:[#allocation11_spill] sm:$0xff] %v8867_v56  ;;  %v7275_v27 = vpop.f32.mrf.mxu0 }
 0x192   : > { %10241 = vst [vmem:[#allocation12_spill] sm:$0xff] %v8870_v35  ;;  %v8872_v32 = vpop.f32.mrf.mxu1  ;;  %v8875_v33 = vadd.f32 %v7275_v27, %v8726_v59 }
 0x193   : > { %10242 = vst [vmem:[#allocation13_spill] sm:$0xff] %v8872_v32  ;;  %v2116_v43 = vpop.f32.mrf.mxu0 }
 0x194   : > { %10243 = vst [vmem:[#allocation14_spill] sm:$0xff] %v8875_v33  ;;  %v8877_v9 = vpop.f32.mrf.mxu1  ;;  %v8880_v16 = vadd.f32 %v2116_v43, %v8732_v8 }
 0x195   : > { %10244 = vst [vmem:[#allocation15_spill] sm:$0xff] %v8877_v9  ;;  %v7278_v49 = vpop.f32.mrf.mxu0 }
 0x196   : > { %10245 = vst [vmem:[#allocation16_spill] sm:$0xff] %v8880_v16  ;;  %v8882_v57 = vpop.f32.mrf.mxu1  ;;  %v8885_v17 = vadd.f32 %v7278_v49, %v8735_v34 }
 0x197   : > { %10246 = vst [vmem:[#allocation17_spill] sm:$0xff] %v8882_v57  ;;  %v2126_v60 = vpop.f32.mrf.mxu0 }
 0x198   : > { %10247 = vst [vmem:[#allocation18_spill] sm:$0xff] %v8885_v17  ;;  %v8887_v37 = vpop.f32.mrf.mxu1  ;;  %v8890_v25 = vadd.f32 %v2126_v60, %v8741_v4 }
 0x199   : > { %10248 = vst [vmem:[#allocation19_spill] sm:$0xff] %v8887_v37  ;;  %v7281_v59 = vpop.f32.mrf.mxu0 }
 0x19a   : > { %10249 = vst [vmem:[#allocation20_spill] sm:$0xff] %v8890_v25  ;;  %v8892_v41 = vpop.f32.mrf.mxu1  ;;  %v8895_v39 = vadd.f32 %v7281_v59, %v8744_v38 }
 0x19b   : > { %10250 = vst [vmem:[#allocation21_spill] sm:$0xff] %v8892_v41  ;;  %v2136_v8 = vpop.f32.mrf.mxu0 }
 0x19c   : > { %10251 = vst [vmem:[#allocation22_spill] sm:$0xff] %v8895_v39  ;;  %v8897_v27 = vpop.f32.mrf.mxu1  ;;  %v8900_v43 = vadd.f32 %v2136_v8, %v8750_v23 }
 0x19d   : > { %10252 = vst [vmem:[#allocation23_spill] sm:$0xff] %v8897_v27  ;;  %v7284_v34 = vpop.f32.mrf.mxu0 }
 0x19e   : > { %10253 = vst [vmem:[#allocation24_spill] sm:$0xff] %v8900_v43  ;;  %v8902_v49 = vpop.f32.mrf.mxu1  ;;  %v8905_v37 = vadd.f32 %v7284_v34, %v8753_v36 }
 0x19f   : > { %10254 = vst [vmem:[#allocation25_spill] sm:$0xff] %v8902_v49  ;;  %v2146_v4 = vpop.f32.mrf.mxu0 }
 0x1a0   : > { %10255 = vst [vmem:[#allocation26_spill] sm:$0xff] %v8905_v37  ;;  %v8907_v60 = vpop.f32.mrf.mxu1  ;;  %v8910_v41 = vadd.f32 %v2146_v4, %v8757_v62 }
 0x1a1   : > { %10256 = vst [vmem:[#allocation27_spill] sm:$0xff] %v8907_v60  ;;  %v7287_v38 = vpop.f32.mrf.mxu0 }
 0x1a2   : > { %10257 = vst [vmem:[#allocation28_spill] sm:$0xff] %v8910_v41  ;;  %v8912_v59 = vpop.f32.mrf.mxu1  ;;  %v8915_v27 = vadd.f32 %v7287_v38, %v8762_v20 }
 0x1a3   : > { %10258 = vst [vmem:[#allocation29_spill] sm:$0xff] %v8912_v59  ;;  %v2156_v23 = vpop.f32.mrf.mxu0 }
 0x1a4   : > { %10259 = vst [vmem:[#allocation30_spill] sm:$0xff] %v8915_v27  ;;  %v8917_v8 = vpop.f32.mrf.mxu1  ;;  %v8920_v49 = vadd.f32 %v2156_v23, %v8767_v55 }
 0x1a5   : > { %10260 = vst [vmem:[#allocation31_spill] sm:$0xff] %v8917_v8  ;;  %v7290_v36 = vpop.f32.mrf.mxu0 }
 0x1a6   : > { %10261 = vst [vmem:[#allocation34_spill] sm:$0xff] %v8920_v49  ;;  %v8922_v34 = vpop.f32.mrf.mxu1  ;;  %v8925_v60 = vadd.f32 %v7290_v36, %v8771_v24 }
 0x1a7   : > { %10262 = vst [vmem:[#allocation32_spill] sm:$0xff] %v8922_v34  ;;  %v2166_v62 = vpop.f32.mrf.mxu0 }
 0x1a8   : > { %10263 = vst [vmem:[#allocation33_spill] sm:$0xff] %v8925_v60  ;;  %v8927_v4 = vpop.f32.mrf.mxu1  ;;  %v8930_v59 = vadd.f32 %v2166_v62, %v8775_v6 }
 0x1a9   : > { %10264 = vst [vmem:[#allocation35_spill] sm:$0xff] %v8927_v4  ;;  %v7293_v20 = vpop.f32.mrf.mxu0 }
 0x1aa   : > { %10265 = vst [vmem:[#allocation36_spill] sm:$0xff] %v8930_v59  ;;  %v8932_v38 = vpop.f32.mrf.mxu1  ;;  %v8935_v8 = vadd.f32 %v7293_v20, %v8778_v14 }
 0x1ab   : > { %10266 = vst [vmem:[#allocation37_spill] sm:$0xff] %v8932_v38  ;;  %v2176_v55 = vpop.f32.mrf.mxu0 }
 0x1ac   : > { %10267 = vst [vmem:[#allocation38_spill] sm:$0xff] %v8935_v8  ;;  %v8937_v23 = vpop.f32.mrf.mxu1  ;;  %v8940_v34 = vadd.f32 %v2176_v55, %v8782_v0 }
 0x1ad   : > { %10268 = vst [vmem:[#allocation39_spill] sm:$0xff] %v8937_v23  ;;  %v7348_v24 = vpop.f32.mrf.mxu0 }
 0x1ae   : > { %10269 = vst [vmem:[#allocation40_spill] sm:$0xff] %v8940_v34  ;;  %v7398_v36 = vpop.f32.mrf.mxu1 }
 0x1af   : > { %v2807_v60 = vpop.f32.mrf.mxu0 }
 0x1b0   : > { %v3197_v49 = vpop.f32.mrf.mxu1 }
 0x1b1   : > { %v7351_v4 = vpop.f32.mrf.mxu0 }
 0x1b2   : > { %v7401_v6 = vpop.f32.mrf.mxu1 }
 0x1b3   : > { %v2817_v27 = vpop.f32.mrf.mxu0 }
 0x1b4   : > { %v8942_v59 = vpop.f32.mrf.mxu1 }
 0x1b5   : > { %v7354_v62 = vpop.f32.mrf.mxu0 }
 0x1b6   : > { %v8946_v14 = vpop.f32.mrf.mxu1 }
 0x1b7   : > { %v2827_v38 = vpop.f32.mrf.mxu0 }
 0x1b8   : > { %v8952_v0 = vpop.f32.mrf.mxu1 }
 0x1b9   : > { %v8944_v41 = vpop.f32.mrf.mxu0 }
 0x1ba   : > { %v8958_v8 = vpop.f32.mrf.mxu1 }
 0x1bb   : > { %v8948_v20 = vpop.f32.mrf.mxu0 }
 0x1bc   : > { %v8964_v39 = vpop.f32.mrf.mxu1 }
 0x1bd   : > { %v8950_v23 = vpop.f32.mrf.mxu0 }
 0x1be   : > { %v8970_v17 = vpop.f32.mrf.mxu1 }
 0x1bf   : > { %v8954_v55 = vpop.f32.mrf.mxu0 }
 0x1c0   : > { %v8976_v32 = vpop.f32.mrf.mxu1 }
 0x1c1   : > { %v8956_v34 = vpop.f32.mrf.mxu0 }
 0x1c2   : > { %v8982_v35 = vpop.f32.mrf.mxu1 }
 0x1c3   : > { %v8960_v37 = vpop.f32.mrf.mxu0 }
 0x1c4   : > { %v8988_v47 = vpop.f32.mrf.mxu1 }
 0x1c5   : > { %v8962_v43 = vpop.f32.mrf.mxu0  ;;  %10278 = vst [vmem:[#allocation49_spill] sm:$0xff] %v8988_v47 }
 0x1c7   : > { %v8966_v25 = vpop.f32.mrf.mxu0 }
 0x1c8   : > { %10270 = vst [vmem:[#allocation41_spill] sm:$0xff] %v8966_v25 }
 0x1c9   : > { %v8968_v57 = vpop.f32.mrf.mxu0 }
 0x1ca   : > { %10271 = vst [vmem:[#allocation42_spill] sm:$0xff] %v8968_v57 }
 0x1cb   : > { %v8972_v9 = vpop.f32.mrf.mxu0 }
 0x1cc   : > { %10272 = vst [vmem:[#allocation43_spill] sm:$0xff] %v8972_v9  ;;  %v8994_v9 = vpop.f32.mrf.mxu1 }
 0x1cd   : > { %v8974_v16 = vpop.f32.mrf.mxu0 }
 0x1ce   : > { %10273 = vst [vmem:[#allocation44_spill] sm:$0xff] %v8974_v16 }
 0x1cf   : > { %v8978_v33 = vpop.f32.mrf.mxu0 }
 0x1d0   : > { %10274 = vst [vmem:[#allocation45_spill] sm:$0xff] %v8978_v33  ;;  %v9000_v33 = vpop.f32.mrf.mxu1 }
 0x1d1   : > { %v8980_v56 = vpop.f32.mrf.mxu0  ;;  %10283 = vst [vmem:[#allocation54_spill] sm:$0xff] %v9000_v33 }
 0x1d2   : > { %10275 = vst [vmem:[#allocation46_spill] sm:$0xff] %v8980_v56 }
 0x1d3   : > { %v8984_v58 = vpop.f32.mrf.mxu0 }
 0x1d4   : > { %10276 = vst [vmem:[#allocation47_spill] sm:$0xff] %v8984_v58  ;;  %v9006_v58 = vpop.f32.mrf.mxu1 }
 0x1d5   : > { %v8986_v11 = vpop.f32.mrf.mxu0  ;;  %10286 = vst [vmem:[#allocation57_spill] sm:$0xff] %v9006_v58 }
 0x1d6   : > { %10277 = vst [vmem:[#allocation48_spill] sm:$0xff] %v8986_v11 }
 0x1d7   : > { %v8990_v57 = vpop.f32.mrf.mxu0 }
 0x1d8   : > { %10279 = vst [vmem:[#allocation50_spill] sm:$0xff] %v8990_v57  ;;  %v9014_v57 = vpop.f32.mrf.mxu1 }
 0x1d9   : > { %v8992_v10 = vpop.f32.mrf.mxu0  ;;  %10289 = vst [vmem:[#allocation60_spill] sm:$0xff] %v9014_v57 }
 0x1da   : > { %10280 = vst [vmem:[#allocation51_spill] sm:$0xff] %v8992_v10  ;;  %v2576_v10 = vadd.f32 %v8780_v51, %v8785_v28  ;;  %v2577_v51 = vadd.f32 %v8797_v15, %v8800_v12 }
 0x1db   : > { %v8996_v16 = vpop.f32.mrf.mxu0 }
 0x1dc   : > { %10281 = vst [vmem:[#allocation52_spill] sm:$0xff] %v8996_v16  ;;  %v2967_v33 = vadd.f32 %v7348_v24, %v2576_v10 }
 0x1dd   : > { %v8998_v25 = vpop.f32.mrf.mxu0 }
 0x1de   : > { %10282 = vst [vmem:[#allocation53_spill] sm:$0xff] %v8998_v25  ;;  %v2575_v25 = vadd.f32 %v8787_v48, %v8790_v54  ;;  %v3357_v28 = vadd.f32 %v7398_v36, %v2967_v33  ;;  %v9035_v54 = vld [vmem:[%s10091_s2] ss:$0 sm:$0xff] }
 0x1df   : > { %v9002_v56 = vpop.f32.mrf.mxu0 }
 0x1e0   : > { %10284 = vst [vmem:[#allocation55_spill] sm:$0xff] %v9002_v56  ;;  %v2966_v58 = vadd.f32 %v2807_v60, %v2575_v25  ;;  %v2579_v25 = vadd.f32 %v8807_v50, %v8810_v21  ;;  %v9049_v50 = vld [vmem:[%s10092_s3 + $0x8] sm:$0xff]  ;;  %v2581_v21 = vadd.f32 %v8817_v18, %v8820_v40  ;;  %v9064_v18 = vld [vmem:[%s10092_s3] sm:$0xff]  ;;  %v2584_v40 = vadd.f32 %v8822_v3, %v8825_v2 }
 0x1e1   : > { %v9004_v42 = vpop.f32.mrf.mxu0  ;;  %6770 = vmatprep.mubr.msk.f32.mxu1 %vm223_vm1, %v9049_v50  ;;  %6804 = vmatprep.mubr.msk.f32.mxu0 %vm223_vm1, %v9064_v18 }
 0x1e2   : > { %10285 = vst [vmem:[#allocation56_spill] sm:$0xff] %v9004_v42  ;;  %v2578_v42 = vadd.f32 %v8792_v13, %v8795_v19  ;;  %v3356_v13 = vadd.f32 %v3197_v49, %v2966_v58  ;;  %v2968_v19 = vadd.f32 %v2817_v27, %v2577_v51  ;;  %v2970_v33 = vadd.f32 %v2827_v38, %v2579_v25 }
 0x1e3   : > { %v9008_v11 = vpop.f32.mrf.mxu0 }
 0x1e4   : > { %10287 = vst [vmem:[#allocation58_spill] sm:$0xff] %v9008_v11  ;;  %v9024_v11 = vpop.f32.mrf.mxu1  ;;  %v2969_v57 = vadd.f32 %v7351_v4, %v2578_v42  ;;  %v3358_v58 = vadd.f32 %v8942_v59, %v2968_v19  ;;  %v2975_v19 = vadd.f32 %v8950_v23, %v2584_v40 }
 0x1e5   : > { %v9010_v47 = vpop.f32.mrf.mxu0 }
 0x1e6   : > { %10288 = vst [vmem:[#allocation59_spill] sm:$0xff] %v9010_v47  ;;  %v9039_v24 = vpop.f32.mrf.mxu1  ;;  %v3359_v12 = vadd.f32 %v7401_v6, %v2969_v57 }
 0x1e7   : > { %v9016_v16 = vpop.f32.mrf.mxu0 }
 0x1e8   : > { %10290 = vst [vmem:[#allocation61_spill] sm:$0xff] %v9016_v16  ;;  %v2580_v16 = vadd.f32 %v8802_v63, %v8805_v53  ;;  %v2582_v53 = vadd.f32 %v8812_v46, %v8815_v29  ;;  %v9054_v57 = vpop.f32.mrf.mxu1 }
 0x1e9   : > { %v9020_v56 = vpop.f32.mrf.mxu0 }
 0x1ea   : > { %v2971_v60 = vadd.f32 %v7354_v62, %v2580_v16  ;;  %v2973_v29 = vadd.f32 %v8944_v41, %v2582_v53  ;;  %v3360_v62 = vadd.f32 %v8952_v0, %v2970_v33  ;;  %v2972_v41 = vadd.f32 %v8948_v20, %v2581_v21  ;;  %v9077_v3 = vpop.f32.mrf.mxu1 }
 0x1eb   : > { %v9026_v47 = vpop.f32.mrf.mxu0 }
 0x1ec   : > { %v3361_v16 = vadd.f32 %v8946_v14, %v2971_v60  ;;  %v3363_v0 = vadd.f32 %v8958_v8, %v2973_v29  ;;  %v2586_v60 = vadd.f32 %v8832_v31, %v8835_v45  ;;  %v9091_v53 = vpop.f32.mrf.mxu1 }
 0x1ed   : > { %v7448_v48 = vpop.f32.mrf.mxu0 }
 0x1ee   : > { %v3747_v10 = vadd.f32 %v7448_v48, %v3357_v28  ;;  %v2977_v31 = vadd.f32 %v8956_v34, %v2586_v60  ;;  %v9105_v21 = vpop.f32.mrf.mxu1  ;;  %v10299_v60 = vld [vmem:[#allocation54_spill] sm:$0xff] }
 0x1ef   : > { %v3587_v15 = vpop.f32.mrf.mxu0 }
 0x1f0   : > { %v3786_v42 = vadd.f32 %v9035_v54, %v3747_v10  ;;  %v3746_v63 = vadd.f32 %v3587_v15, %v3356_v13  ;;  %v2583_v13 = vadd.f32 %v8827_v1, %v8830_v30  ;;  %v3362_v1 = vadd.f32 %v8964_v39, %v2972_v41 }
 0x1f1   : > { %v7451_v4 = vpop.f32.mrf.mxu0 }
 0x1f2   : > { %v3818_v27 = vmax.f32 %v3786_v42, 0.0  ;;  %v3785_v49 = vadd.f32 %v9035_v54, %v3746_v63  ;;  %v3749_v36 = vadd.f32 %v7451_v4, %v3359_v12  ;;  %v2974_v15 = vadd.f32 %v8954_v55, %v2583_v13 }
 0x1f3   : > { %v3597_v46 = vpop.f32.mrf.mxu0  ;;  %v2585_v42 = vadd.f32 %v8837_v52, %v8840_v22  ;;  %v3365_v63 = vadd.f32 %v8970_v17, %v2975_v19  ;;  %v2588_v4 = vadd.f32 %v8842_v7, %v8845_v61  ;;  %v3367_v7 = vadd.f32 %v8982_v35, %v2977_v31  ;;  %v10303_v31 = vld [vmem:[#allocation44_spill] sm:$0xff] }
 0x1f4   : > { %3850 = vst.msk [vmem:[#allocation2 + $0x21] sm:$0xff] %vm223_vm1, %v3818_v27  ;;  %v3817_v59 = vmax.f32 %v3785_v49, 0.0  ;;  %v3788_v38 = vadd.f32 %v9035_v54, %v3749_v36  ;;  %v3748_v6 = vadd.f32 %v3597_v46, %v3358_v58  ;;  %v3364_v58 = vadd.f32 %v8976_v32, %v2974_v15  ;;  %v10291_v46 = vld [vmem:[#allocation6_spill] sm:$0xff] }
 0x1f5   : > { %v7454_v14 = vpop.f32.mrf.mxu0  ;;  %v2976_v52 = vadd.f32 %v8960_v37, %v2585_v42  ;;  %v2587_v49 = vadd.f32 %v8847_v44, %v8850_v5  ;;  %v2979_v36 = vadd.f32 %v8962_v43, %v2588_v4  ;;  %v2590_v29 = vadd.f32 %v10291_v46, %v8855_v26  ;;  %v10293_v44 = vld [vmem:[#allocation49_spill] sm:$0xff]  ;;  %v10296_v26 = vld [vmem:[#allocation42_spill] sm:$0xff]  ;;  %v10301_v42 = vld [vmem:[#allocation12_spill] sm:$0xff] }
 0x1f6   : > { %3849 = vst.msk [vmem:[#allocation2 + $0x19] sm:$0xff] %vm223_vm1, %v3817_v59  ;;  %v3820_v51 = vmax.f32 %v3788_v38, 0.0  ;;  %v3787_v28 = vadd.f32 %v9035_v54, %v3748_v6  ;;  %v3751_v48 = vadd.f32 %v7454_v14, %v3361_v16  ;;  %v10292_v59 = vld [vmem:[#allocation41_spill] sm:$0xff]  ;;  %v10295_v14 = vld [vmem:[#allocation7_spill] sm:$0xff] }
 0x1f7   : > { %v3607_v2 = vpop.f32.mrf.mxu0  ;;  %v2978_v38 = vadd.f32 %v10292_v59, %v2587_v49  ;;  %v3366_v5 = vadd.f32 %v10293_v44, %v2976_v52  ;;  %v2981_v13 = vadd.f32 %v10296_v26, %v2590_v29  ;;  %v10304_v4 = vld [vmem:[#allocation57_spill] sm:$0xff]  ;;  %v10309_v59 = vld [vmem:[#allocation16_spill] sm:$0xff] }
 0x1f8   : > { %3852 = vst.msk [vmem:[#allocation2 + $0x39] sm:$0xff] %vm223_vm1, %v3820_v51  ;;  %v3819_v10 = vmax.f32 %v3787_v28, 0.0  ;;  %v3790_v20 = vadd.f32 %v9035_v54, %v3751_v48  ;;  %v3750_v25 = vadd.f32 %v3607_v2, %v3360_v62  ;;  %v10294_v62 = vld [vmem:[#allocation8_spill] sm:$0xff]  ;;  %v3369_v51 = vadd.f32 %v8994_v9, %v2979_v36  ;;  %v9119_v28 = vpop.f32.mrf.mxu1  ;;  %v10307_v36 = vld [vmem:[#allocation45_spill] sm:$0xff] }
 0x1f9   : > { %v7457_v12 = vpop.f32.mrf.mxu0  ;;  %v2589_v41 = vadd.f32 %v10295_v14, %v10294_v62  ;;  %v3368_v15 = vadd.f32 %v10299_v60, %v2978_v38  ;;  %v10310_v38 = vld [vmem:[#allocation15_spill] sm:$0xff] }
 0x1fa   : > { %3851 = vst.msk [vmem:[#allocation2 + $0x31] sm:$0xff] %vm223_vm1, %v3819_v10  ;;  %v3822_v30 = vmax.f32 %v3790_v20, 0.0  ;;  %v3789_v23 = vadd.f32 %v9035_v54, %v3750_v25  ;;  %v3753_v8 = vadd.f32 %v7457_v12, %v3363_v0  ;;  %v10297_v10 = vld [vmem:[#allocation10_spill] sm:$0xff]  ;;  %v10298_v20 = vld [vmem:[#allocation9_spill] sm:$0xff]  ;;  %v10316_v60 = vld [vmem:[#allocation19_spill] sm:$0xff] }
 0x1fb   : > { %v3617_v33 = vpop.f32.mrf.mxu0  ;;  %v2592_v25 = vadd.f32 %v10298_v20, %v10297_v10 }
 0x1fc   : > { %3854 = vst.msk [vmem:[#allocation2 + $0x51] sm:$0xff] %vm223_vm1, %v3822_v30  ;;  %v3821_v45 = vmax.f32 %v3789_v23, 0.0  ;;  %v3792_v39 = vadd.f32 %v9035_v54, %v3753_v8  ;;  %v3752_v55 = vadd.f32 %v3617_v33, %v3362_v1  ;;  %v10300_v1 = vld [vmem:[#allocation43_spill] sm:$0xff] }
 0x1fd   : > { %v7460_v27 = vpop.f32.mrf.mxu0  ;;  %v2980_v30 = vadd.f32 %v10300_v1, %v2589_v41 }
 0x1fe   : > { %3853 = vst.msk [vmem:[#allocation2 + $0x49] sm:$0xff] %vm223_vm1, %v3821_v45  ;;  %v3824_v22 = vmax.f32 %v3792_v39, 0.0  ;;  %v3791_v17 = vadd.f32 %v9035_v54, %v3752_v55  ;;  %v3755_v34 = vadd.f32 %v7460_v27, %v3365_v63  ;;  %v10302_v63 = vld [vmem:[#allocation11_spill] sm:$0xff]  ;;  %v2983_v45 = vadd.f32 %v10303_v31, %v2592_v25  ;;  %v9133_v39 = vpop.f32.mrf.mxu1  ;;  %v10315_v25 = vld [vmem:[#allocation20_spill] sm:$0xff] }
 0x1ff   : > { %v3627_v16 = vpop.f32.mrf.mxu0  ;;  %v2591_v33 = vadd.f32 %v10302_v63, %v10301_v42  ;;  %v10318_v63 = vld [vmem:[#allocation22_spill] sm:$0xff] }
 0x200   : > { %3856 = vst.msk [vmem:[#allocation2 + $0x69] sm:$0xff] %vm223_vm1, %v3824_v22  ;;  %v3823_v61 = vmax.f32 %v3791_v17, 0.0  ;;  %v3794_v32 = vadd.f32 %v9035_v54, %v3755_v34  ;;  %v3754_v37 = vadd.f32 %v3627_v16, %v3364_v58  ;;  %v3371_v58 = vadd.f32 %v10304_v4, %v2981_v13  ;;  %v10305_v17 = vld [vmem:[#allocation14_spill] sm:$0xff]  ;;  %v10306_v34 = vld [vmem:[#allocation13_spill] sm:$0xff] }
 0x201   : > { %v7463_v6 = vpop.f32.mrf.mxu0  ;;  %v2594_v49 = vadd.f32 %v10306_v34, %v10305_v17  ;;  %v2982_v16 = vadd.f32 %v10307_v36, %v2591_v33  ;;  %v3373_v44 = vadd.f32 %v9024_v11, %v2983_v45  ;;  %v10319_v33 = vld [vmem:[#allocation21_spill] sm:$0xff]  ;;  %v10320_v45 = vld [vmem:[#allocation50_spill] sm:$0xff]  ;;  %v10322_v17 = vld [vmem:[#allocation23_spill] sm:$0xff] }
 0x202   : > { %3855 = vst.msk [vmem:[#allocation2 + $0x61] sm:$0xff] %vm223_vm1, %v3823_v61  ;;  %v3826_v43 = vmax.f32 %v3794_v32, 0.0  ;;  %v3793_v40 = vadd.f32 %v9035_v54, %v3754_v37  ;;  %v3757_v35 = vadd.f32 %v7463_v6, %v3367_v7  ;;  %v10308_v61 = vld [vmem:[#allocation60_spill] sm:$0xff]  ;;  %v2593_v6 = vadd.f32 %v10310_v38, %v10309_v59 }
 0x203   : > { %v3637_v48 = vpop.f32.mrf.mxu0  ;;  %v3370_v32 = vadd.f32 %v10308_v61, %v2980_v30  ;;  %v3372_v13 = vadd.f32 %v9039_v24, %v2982_v16  ;;  %v2598_v31 = vadd.f32 %v10319_v33, %v10318_v63 }
 0x204   : > { %3858 = vst.msk [vmem:[#allocation2 + $0x81] sm:$0xff] %vm223_vm1, %v3826_v43  ;;  %v3825_v19 = vmax.f32 %v3793_v40, 0.0  ;;  %v3796_v2 = vadd.f32 %v9035_v54, %v3757_v35  ;;  %v3756_v0 = vadd.f32 %v3637_v48, %v3366_v5  ;;  %v9147_v5 = vpop.f32.mrf.mxu1  ;;  %v10311_v40 = vld [vmem:[#allocation46_spill] sm:$0xff]  ;;  %v10313_v48 = vld [vmem:[#allocation17_spill] sm:$0xff] }
 0x205   : > { %v7466_v12 = vpop.f32.mrf.mxu0  ;;  %v2985_v35 = vadd.f32 %v10311_v40, %v2594_v49 }
 0x206   : > { %3857 = vst.msk [vmem:[#allocation2 + $0x79] sm:$0xff] %vm223_vm1, %v3825_v19  ;;  %v3828_v9 = vmax.f32 %v3796_v2, 0.0  ;;  %v3795_v23 = vadd.f32 %v9035_v54, %v3756_v0  ;;  %v3759_v8 = vadd.f32 %v7466_v12, %v3369_v51  ;;  %v10312_v51 = vld [vmem:[#allocation18_spill] sm:$0xff]  ;;  %v10314_v2 = vld [vmem:[#allocation47_spill] sm:$0xff]  ;;  %v10317_v12 = vld [vmem:[#allocation48_spill] sm:$0xff]  ;;  %v3317_v30 = vpop.f32.mrf.mxu1 }
 0x207   : > { %v3647_v55 = vpop.f32.mrf.mxu0  ;;  %v2596_v26 = vadd.f32 %v10313_v48, %v10312_v51  ;;  %v2984_v0 = vadd.f32 %v10314_v2, %v2593_v6  ;;  %v10329_v51 = vld [vmem:[#allocation53_spill] sm:$0xff] }
 0x208   : > { %3860 = vst.msk [vmem:[#allocation2 + $0x99] sm:$0xff] %vm223_vm1, %v3828_v9  ;;  %v3827_v27 = vmax.f32 %v3795_v23, 0.0  ;;  %v3798_v52 = vadd.f32 %v9035_v54, %v3759_v8  ;;  %v3758_v22 = vadd.f32 %v3647_v55, %v3368_v15  ;;  %v2595_v15 = vadd.f32 %v10316_v60, %v10315_v25  ;;  %v7437_v36 = vpop.f32.mrf.mxu1  ;;  %v10332_v25 = vld [vmem:[#allocation55_spill] sm:$0xff] }
 0x209   : > { %v7469_v7 = vpop.f32.mrf.mxu0  ;;  %v2987_v1 = vadd.f32 %v10317_v12, %v2596_v26  ;;  %v3375_v23 = vadd.f32 %v9054_v57, %v2985_v35 }
 0x20a   : > { %3859 = vst.msk [vmem:[#allocation2 + $0x91] sm:$0xff] %vm223_vm1, %v3827_v27  ;;  %v3830_v37 = vmax.f32 %v3798_v52, 0.0  ;;  %v3797_v46 = vadd.f32 %v9035_v54, %v3758_v22  ;;  %v3761_v29 = vadd.f32 %v7469_v7, %v3371_v58  ;;  %v2986_v55 = vadd.f32 %v10320_v45, %v2595_v15  ;;  %v10321_v22 = vld [vmem:[#allocation24_spill] sm:$0xff]  ;;  %v10323_v7 = vld [vmem:[#allocation51_spill] sm:$0xff]  ;;  %v3327_v26 = vpop.f32.mrf.mxu1 }
 0x20b   : > { %v3657_v43 = vpop.f32.mrf.mxu0  ;;  %v3374_v58 = vadd.f32 %v9077_v3, %v2984_v0  ;;  %v2597_v34 = vadd.f32 %v10322_v17, %v10321_v22  ;;  %v3377_v49 = vadd.f32 %v9091_v53, %v2987_v1  ;;  %v2989_v61 = vadd.f32 %v10323_v7, %v2598_v31  ;;  %v10335_v31 = vld [vmem:[#allocation56_spill] sm:$0xff]  ;;  %v10338_v17 = vld [vmem:[#allocation58_spill] sm:$0xff] }
 0x20c   : > { %3862 = vst.msk [vmem:[#allocation2 + $0xb1] sm:$0xff] %vm223_vm1, %v3830_v37  ;;  %v3829_v62 = vmax.f32 %v3797_v46, 0.0  ;;  %v3800_v14 = vadd.f32 %v9035_v54, %v3761_v29  ;;  %v3760_v41 = vadd.f32 %v3657_v43, %v3370_v32  ;;  %v10324_v46 = vld [vmem:[#allocation26_spill] sm:$0xff]  ;;  %v10325_v29 = vld [vmem:[#allocation25_spill] sm:$0xff]  ;;  %v3376_v38 = vadd.f32 %v9105_v21, %v2986_v55  ;;  %v7440_v63 = vpop.f32.mrf.mxu1  ;;  %v10339_v7 = vld [vmem:[#allocation36_spill] sm:$0xff] }
 0x20d   : > { %v7472_v19 = vpop.f32.mrf.mxu0  ;;  %v2600_v59 = vadd.f32 %v10325_v29, %v10324_v46 }
 0x20e   : > { %3861 = vst.msk [vmem:[#allocation2 + $0xa9] sm:$0xff] %vm223_vm1, %v3829_v62  ;;  %v3832_v11 = vmax.f32 %v3800_v14, 0.0  ;;  %v3799_v10 = vadd.f32 %v9035_v54, %v3760_v41  ;;  %v3763_v20 = vadd.f32 %v7472_v19, %v3373_v44  ;;  %v10326_v44 = vld [vmem:[#allocation52_spill] sm:$0xff]  ;;  %v10328_v14 = vld [vmem:[#allocation27_spill] sm:$0xff]  ;;  %v3379_v19 = vadd.f32 %v9119_v28, %v2989_v61  ;;  %v3337_v46 = vpop.f32.mrf.mxu1 }
 0x20f   : > { %v3667_v9 = vpop.f32.mrf.mxu0  ;;  %v2988_v43 = vadd.f32 %v10326_v44, %v2597_v34  ;;  %v10327_v62 = vld [vmem:[#allocation28_spill] sm:$0xff]  ;;  %v2991_v48 = vadd.f32 %v10329_v51, %v2600_v59  ;;  %v10340_v61 = vld [vmem:[#allocation35_spill] sm:$0xff]  ;;  %v10342_v44 = vld [vmem:[#allocation38_spill] sm:$0xff] }
 0x210   : > { %3864 = vst.msk [vmem:[#allocation2 + $0xc9] sm:$0xff] %vm223_vm1, %v3832_v11  ;;  %v3831_v24 = vmax.f32 %v3799_v10, 0.0  ;;  %v3802_v8 = vadd.f32 %v9035_v54, %v3763_v20  ;;  %v3762_v42 = vadd.f32 %v3667_v9, %v3372_v13  ;;  %v2599_v41 = vadd.f32 %v10328_v14, %v10327_v62  ;;  %v10330_v11 = vld [vmem:[#allocation30_spill] sm:$0xff]  ;;  %v10331_v10 = vld [vmem:[#allocation29_spill] sm:$0xff] }
 0x211   : > { %v7475_v4 = vpop.f32.mrf.mxu0  ;;  %v2602_v20 = vadd.f32 %v10331_v10, %v10330_v11  ;;  %v3378_v12 = vadd.f32 %v9133_v39, %v2988_v43  ;;  %v10343_v43 = vld [vmem:[#allocation37_spill] sm:$0xff] }
 0x212   : > { %3863 = vst.msk [vmem:[#allocation2 + $0xc1] sm:$0xff] %vm223_vm1, %v3831_v24  ;;  %v3834_v27 = vmax.f32 %v3802_v8, 0.0  ;;  %v3801_v52 = vadd.f32 %v9035_v54, %v3762_v42  ;;  %v3765_v57 = vadd.f32 %v7475_v4, %v3375_v23  ;;  %v2990_v60 = vadd.f32 %v10332_v25, %v2599_v41  ;;  %v10333_v23 = vld [vmem:[#allocation34_spill] sm:$0xff]  ;;  %v10334_v24 = vld [vmem:[#allocation31_spill] sm:$0xff] }
 0x213   : > { %v3677_v16 = vpop.f32.mrf.mxu0  ;;  %v2601_v8 = vadd.f32 %v10334_v24, %v10333_v23  ;;  %v3381_v42 = vadd.f32 %v9147_v5, %v2991_v48  ;;  %v2993_v45 = vadd.f32 %v10335_v31, %v2602_v20 }
 0x214   : > { %3866 = vst.msk [vmem:[#allocation2 + $0xe1] sm:$0xff] %vm223_vm1, %v3834_v27  ;;  %v3833_v32 = vmax.f32 %v3801_v52, 0.0  ;;  %v3804_v3 = vadd.f32 %v9035_v54, %v3765_v57  ;;  %v3764_v37 = vadd.f32 %v3677_v16, %v3374_v58  ;;  %v10336_v58 = vld [vmem:[#allocation33_spill] sm:$0xff]  ;;  %v10337_v27 = vld [vmem:[#allocation32_spill] sm:$0xff]  ;;  %v3380_v57 = vadd.f32 %v3317_v30, %v2990_v60 }
 0x215   : > { %v7478_v6 = vpop.f32.mrf.mxu0  ;;  %v2604_v52 = vadd.f32 %v10337_v27, %v10336_v58  ;;  %v2992_v34 = vadd.f32 %v10338_v17, %v2601_v8  ;;  %v3383_v59 = vadd.f32 %v7437_v36, %v2993_v45  ;;  %v10345_v36 = vld [vmem:[#allocation40_spill] sm:$0xff]  ;;  %v9237_v17 = vld [vmem:[#allocation2 + $0xb1] sm:$0xff] }
 0x216   : > { %3865 = vst.msk [vmem:[#allocation2 + $0xd9] sm:$0xff] %vm223_vm1, %v3833_v32  ;;  %v3836_v53 = vmax.f32 %v3804_v3, 0.0  ;;  %v3803_v40 = vadd.f32 %v9035_v54, %v3764_v37  ;;  %v3767_v35 = vadd.f32 %v7478_v6, %v3377_v49  ;;  %v2603_v32 = vadd.f32 %v10340_v61, %v10339_v7  ;;  %v10341_v3 = vld [vmem:[#allocation59_spill] sm:$0xff]  ;;  %v9265_v61 = vld [vmem:[#allocation2 + $0xa8] sm:$0xff] }
 0x217   : > { %v3687_v13 = vpop.f32.mrf.mxu0  ;;  %v2995_v37 = vadd.f32 %v10341_v3, %v2604_v52  ;;  %v3382_v14 = vadd.f32 %v3327_v26, %v2992_v34  ;;  %10350 = vst [vmem:[#allocation8_spill] sm:$0xff] %v9265_v61  ;;  %v9273_v3 = vld [vmem:[#allocation2 + $0x99] sm:$0xff] }
 0x218   : > { %3868 = vst.msk [vmem:[#allocation2 + $0xf9] sm:$0xff] %vm223_vm1, %v3836_v53  ;;  %v3835_v21 = vmax.f32 %v3803_v40, 0.0  ;;  %v3806_v2 = vadd.f32 %v9035_v54, %v3767_v35  ;;  %v3766_v0 = vadd.f32 %v3687_v13, %v3376_v38  ;;  %v2606_v53 = vadd.f32 %v10343_v43, %v10342_v44  ;;  %v10344_v40 = vld [vmem:[#allocation61_spill] sm:$0xff]  ;;  %v10346_v13 = vld [vmem:[#allocation39_spill] sm:$0xff] }
 0x219   : > { %v7481_v15 = vpop.f32.mrf.mxu0  ;;  %v2994_v35 = vadd.f32 %v10344_v40, %v2603_v32  ;;  %v9305_v44 = vld [vmem:[#allocation2 + $0x81] sm:$0xff] }
 0x21a   : > { %3867 = vst.msk [vmem:[#allocation2 + $0xf1] sm:$0xff] %vm223_vm1, %v3835_v21  ;;  %v3838_v1 = vmax.f32 %v3806_v2, 0.0  ;;  %v3805_v9 = vadd.f32 %v9035_v54, %v3766_v0  ;;  %v3769_v28 = vadd.f32 %v7481_v15, %v3379_v19  ;;  %v2605_v19 = vadd.f32 %v10346_v13, %v10345_v36  ;;  %v7443_v2 = vpop.f32.mrf.mxu1  ;;  %v9345_v36 = vld [vmem:[#allocation2 + $0x68] sm:$0xff] }
 0x21b   : > { %v3697_v33 = vpop.f32.mrf.mxu0  ;;  %v3385_v21 = vadd.f32 %v7440_v63, %v2995_v37  ;;  %v2997_v11 = vadd.f32 %v9020_v56, %v2606_v53  ;;  %v3384_v25 = vadd.f32 %v3337_v46, %v2994_v35  ;;  %v9281_v46 = vld [vmem:[#allocation2 + $0x98] sm:$0xff]  ;;  %v9313_v53 = vld [vmem:[#allocation2 + $0x80] sm:$0xff]  ;;  %10360 = vst [vmem:[#allocation57_spill] sm:$0xff] %v9345_v36 }
 0x21c   : > { %3870 = vst.msk [vmem:[#allocation2 + $0x111] sm:$0xff] %vm223_vm1, %v3838_v1  ;;  %v3837_v55 = vmax.f32 %v3805_v9, 0.0  ;;  %v3808_v39 = vadd.f32 %v9035_v54, %v3769_v28  ;;  %v3768_v4 = vadd.f32 %v3697_v33, %v3378_v12  ;;  %v2996_v15 = vadd.f32 %v9026_v47, %v2605_v19  ;;  %v3347_v28 = vpop.f32.mrf.mxu1  ;;  %10352 = vst [vmem:[#allocation42_spill] sm:$0xff] %v9281_v46  ;;  %v9321_v35 = vld [vmem:[#allocation2 + $0x79] sm:$0xff]  ;;  %v9353_v19 = vld [vmem:[#allocation2 + $0x61] sm:$0xff] }
 0x21d   : > { %v7484_v22 = vpop.f32.mrf.mxu0  ;;  %v3387_v24 = vadd.f32 %v7443_v2, %v2997_v11  ;;  %10356 = vst [vmem:[#allocation43_spill] sm:$0xff] %v9313_v53  ;;  %v9361_v2 = vld [vmem:[#allocation2 + $0x60] sm:$0xff]  ;;  %v9369_v11 = vld [vmem:[#allocation2 + $0x51] sm:$0xff] }
 0x21e   : > { %3869 = vst.msk [vmem:[#allocation2 + $0x109] sm:$0xff] %vm223_vm1, %v3837_v55  ;;  %v3840_v5 = vmax.f32 %v3808_v39, 0.0  ;;  %v3807_v49 = vadd.f32 %v9035_v54, %v3768_v4  ;;  %v3771_v16 = vadd.f32 %v7484_v22, %v3381_v42  ;;  %v3386_v33 = vadd.f32 %v3347_v28, %v2996_v15  ;;  %10362 = vst [vmem:[#allocation13_spill] sm:$0xff] %v9361_v2  ;;  %v9393_v15 = vld [vmem:[#allocation2 + $0x48] sm:$0xff]  ;;  %v9409_v28 = vld [vmem:[#allocation2 + $0x38] sm:$0xff] }
 0x21f   : > { %v3707_v29 = vpop.f32.mrf.mxu0  ;;  %10366 = vst [vmem:[#allocation15_spill] sm:$0xff] %v9393_v15  ;;  %10368 = vst [vmem:[#allocation18_spill] sm:$0xff] %v9409_v28 }
 0x220   : > { %3872 = vst.msk [vmem:[#allocation2 + $0x129] sm:$0xff] %vm223_vm1, %v3840_v5  ;;  %v3839_v30 = vmax.f32 %v3807_v49, 0.0  ;;  %v3810_v38 = vadd.f32 %v9035_v54, %v3771_v16  ;;  %v3770_v6 = vadd.f32 %v3707_v29, %v3380_v57  ;;  %v9257_v16 = vld [vmem:[#allocation2 + $0xa9] sm:$0xff] }
 0x221   : > { %v7487_v62 = vpop.f32.mrf.mxu0 }
 0x222   : > { %3871 = vst.msk [vmem:[#allocation2 + $0x121] sm:$0xff] %vm223_vm1, %v3839_v30  ;;  %v3842_v41 = vmax.f32 %v3810_v38, 0.0  ;;  %v3809_v51 = vadd.f32 %v9035_v54, %v3770_v6  ;;  %v3773_v48 = vadd.f32 %v7487_v62, %v3383_v59  ;;  %v9289_v59 = vld [vmem:[#allocation2 + $0x91] sm:$0xff] }
 0x223   : > { %v3717_v0 = vpop.f32.mrf.mxu0  ;;  %v9297_v38 = vld [vmem:[#allocation2 + $0x90] sm:$0xff] }
 0x224   : > { %3874 = vst.msk [vmem:[#allocation2 + $0x141] sm:$0xff] %vm223_vm1, %v3842_v41  ;;  %v3841_v10 = vmax.f32 %v3809_v51, 0.0  ;;  %v3812_v20 = vadd.f32 %v9035_v54, %v3773_v48  ;;  %v3772_v26 = vadd.f32 %v3717_v0, %v3382_v14  ;;  %10354 = vst [vmem:[#allocation9_spill] sm:$0xff] %v9297_v38  ;;  %v9329_v14 = vld [vmem:[#allocation2 + $0x78] sm:$0xff]  ;;  %v9337_v51 = vld [vmem:[#allocation2 + $0x69] sm:$0xff] }
 0x225   : > { %v7490_v60 = vpop.f32.mrf.mxu0  ;;  %10358 = vst [vmem:[#allocation11_spill] sm:$0xff] %v9329_v14  ;;  %v9365_v0 = vld [vmem:[#allocation2 + $0x110] sm:$0xff] }
 0x226   : > { %3873 = vst.msk [vmem:[#allocation2 + $0x139] sm:$0xff] %vm223_vm1, %v3841_v10  ;;  %v3844_v12 = vmax.f32 %v3812_v20, 0.0  ;;  %v3811_v1 = vadd.f32 %v9035_v54, %v3772_v26  ;;  %v3775_v9 = vadd.f32 %v7490_v60, %v3385_v21  ;;  %v9357_v21 = vld [vmem:[#allocation2 + $0x111] sm:$0xff]  ;;  %10363 = vst [vmem:[#allocation45_spill] sm:$0xff] %v9365_v0  ;;  %v9373_v10 = vld [vmem:[#allocation2 + $0x109] sm:$0xff] }
 0x227   : > { %v3727_v23 = vpop.f32.mrf.mxu0  ;;  %v9325_v62 = vld [vmem:[#allocation2 + $0x129] sm:$0xff]  ;;  %v9389_v60 = vld [vmem:[#allocation2 + $0xf9] sm:$0xff] }
 0x228   : > { %3876 = vst.msk [vmem:[#allocation2 + $0x159] sm:$0xff] %vm223_vm1, %v3844_v12  ;;  %v3843_v56 = vmax.f32 %v3811_v1, 0.0  ;;  %v3814_v8 = vadd.f32 %v9035_v54, %v3775_v9  ;;  %v3774_v42 = vadd.f32 %v3727_v23, %v3384_v25  ;;  %v9377_v20 = vld [vmem:[#allocation2 + $0x50] sm:$0xff]  ;;  %v9381_v26 = vld [vmem:[#allocation2 + $0x108] sm:$0xff]  ;;  %v9397_v12 = vld [vmem:[#allocation2 + $0xf8] sm:$0xff] }
 0x229   : > { %v7493_v63 = vpop.f32.mrf.mxu0  ;;  %v9333_v41 = vld [vmem:[#allocation2 + $0x128] sm:$0xff]  ;;  %v9349_v13 = vld [vmem:[#allocation2 + $0x120] sm:$0xff]  ;;  %10364 = vst [vmem:[#allocation60_spill] sm:$0xff] %v9377_v20  ;;  %10365 = vst [vmem:[#allocation16_spill] sm:$0xff] %v9381_v26 }
 0x22a   : > { %3875 = vst.msk [vmem:[#allocation2 + $0x151] sm:$0xff] %vm223_vm1, %v3843_v56  ;;  %v3846_v47 = vmax.f32 %v3814_v8, 0.0  ;;  %v3813_v31 = vadd.f32 %v9035_v54, %v3774_v42  ;;  %v3777_v45 = vadd.f32 %v7493_v63, %v3387_v24  ;;  %10359 = vst [vmem:[#allocation44_spill] sm:$0xff] %v9333_v41  ;;  %v9341_v48 = vld [vmem:[#allocation2 + $0x121] sm:$0xff]  ;;  %v9385_v25 = vld [vmem:[#allocation2 + $0x49] sm:$0xff] }
 0x22b   : > { %v3737_v55 = vpop.f32.mrf.mxu0  ;;  %v9293_v30 = vld [vmem:[#allocation2 + $0x141] sm:$0xff]  ;;  %10361 = vst [vmem:[#allocation14_spill] sm:$0xff] %v9349_v13  ;;  %10367 = vst [vmem:[#allocation46_spill] sm:$0xff] %v9397_v12  ;;  %v9401_v1 = vld [vmem:[#allocation2 + $0x39] sm:$0xff] }
 0x22c   : > { %3878 = vst.msk [vmem:[#allocation2 + $0x171] sm:$0xff] %vm223_vm1, %v3846_v47  ;;  %v3845_v39 = vmax.f32 %v3813_v31, 0.0  ;;  %v3816_v4 = vadd.f32 %v9035_v54, %v3777_v45  ;;  %v3776_v58 = vadd.f32 %v3737_v55, %v3386_v33  ;;  %v9405_v9 = vld [vmem:[#allocation2 + $0xf1] sm:$0xff]  ;;  %v9421_v56 = vld [vmem:[#allocation2 + $0xe1] sm:$0xff]  ;;  %v9437_v33 = vld [vmem:[#allocation2 + $0xd9] sm:$0xff] }
 0x22d   : > { %v9301_v6 = vld [vmem:[#allocation2 + $0x140] sm:$0xff]  ;;  %v9317_v40 = vld [vmem:[#allocation2 + $0x138] sm:$0xff]  ;;  %v9413_v23 = vld [vmem:[#allocation2 + $0xf0] sm:$0xff]  ;;  %10371 = vst [vmem:[#allocation20_spill] sm:$0xff] %v9421_v56 }
 0x22e   : > { %3877 = vst.msk [vmem:[#allocation2 + $0x169] sm:$0xff] %vm223_vm1, %v3845_v39  ;;  %v3848_v27 = vmax.f32 %v3816_v4, 0.0  ;;  %v3815_v52 = vadd.f32 %v9035_v54, %v3776_v58  ;;  %v9249_v54 = vld [vmem:[#allocation2 + $0xb0] sm:$0xff]  ;;  %10355 = vst [vmem:[#allocation54_spill] sm:$0xff] %v9301_v6  ;;  %v9309_v43 = vld [vmem:[#allocation2 + $0x139] sm:$0xff] }
 0x22f   : > { %10348 = vst [vmem:[#allocation41_spill] sm:$0xff] %v9249_v54  ;;  %v9261_v7 = vld [vmem:[#allocation2 + $0x159] sm:$0xff]  ;;  %10357 = vst [vmem:[#allocation12_spill] sm:$0xff] %v9317_v40  ;;  %v9417_v24 = vld [vmem:[#allocation2 + $0x31] sm:$0xff] }
 0x230   : > { %3880 = vst.msk [vmem:[#allocation2 + $0x189] sm:$0xff] %vm223_vm1, %v3848_v27  ;;  %v3847_v57 = vmax.f32 %v3815_v52, 0.0  ;;  %10369 = vst [vmem:[#allocation17_spill] sm:$0xff] %v9413_v23  ;;  %v9425_v8 = vld [vmem:[#allocation2 + $0x30] sm:$0xff]  ;;  %v9429_v42 = vld [vmem:[#allocation2 + $0xe0] sm:$0xff] }
 0x231   : > { %v9269_v32 = vld [vmem:[#allocation2 + $0x158] sm:$0xff]  ;;  %v9285_v29 = vld [vmem:[#allocation2 + $0x150] sm:$0xff]  ;;  %10370 = vst [vmem:[#allocation47_spill] sm:$0xff] %v9417_v24  ;;  %10372 = vst [vmem:[#allocation19_spill] sm:$0xff] %v9425_v8 }
 0x232   : > { %3879 = vst.msk [vmem:[#allocation2 + $0x181] sm:$0xff] %vm223_vm1, %v3847_v57  ;;  %10351 = vst [vmem:[#allocation7_spill] sm:$0xff] %v9269_v32  ;;  %v9277_v37 = vld [vmem:[#allocation2 + $0x151] sm:$0xff]  ;;  %v9433_v63 = vld [vmem:[#allocation2 + $0x21] sm:$0xff] }
 0x233   : > { %v9233_v22 = vld [vmem:[#allocation2 + $0x171] sm:$0xff]  ;;  %10353 = vst [vmem:[#allocation10_spill] sm:$0xff] %v9285_v29  ;;  %10373 = vst [vmem:[#allocation48_spill] sm:$0xff] %v9429_v42  ;;  %v9441_v47 = vld [vmem:[#allocation2 + $0x20] sm:$0xff] }
 0x234   : > { %6738 = vmatprep.subr.msk.mxu1 %vm223_vm1, %v9233_v22  ;;  %10374 = vst [vmem:[#allocation22_spill] sm:$0xff] %v9433_v63  ;;  %10375 = vst [vmem:[#allocation21_spill] sm:$0xff] %v9437_v33  ;;  %v9445_v31 = vld [vmem:[#allocation2 + $0xd8] sm:$0xff]  ;;  %v9453_v55 = vld [vmem:[#allocation2 + $0xc9] sm:$0xff] }
 0x235   : > { %6739 = vmatpush3.xpose.msk.msra.mxu1 %vm223_vm1, %v9237_v17  ;;  %v9241_v34 = vld [vmem:[#allocation2 + $0x169] sm:$0xff]  ;;  %v9449_v45 = vld [vmem:[#allocation2 + $0x19] sm:$0xff]  ;;  %v9466_v52 = vld [vmem:[#allocation2 + $0xc1] sm:$0xff] }
 0x236   : > { %v9243_v5 = vld [vmem:[#allocation2 + $0x170] sm:$0xff]  ;;  %6740 = vmatprep.subr.msk.mxu1 %vm223_vm1, %v9241_v34  ;;  %v9253_v49 = vld [vmem:[#allocation2 + $0x168] sm:$0xff]  ;;  %10376 = vst [vmem:[#allocation50_spill] sm:$0xff] %v9449_v45  ;;  %v9457_v39 = vld [vmem:[#allocation2 + $0x18] sm:$0xff] }
 0x237   : > { %10347 = vst [vmem:[#allocation6_spill] sm:$0xff] %v9243_v5  ;;  %6772 = vmatprep.subr.msk.mxu0 %vm223_vm1, %v9243_v5  ;;  %10349 = vst [vmem:[#allocation49_spill] sm:$0xff] %v9253_v49  ;;  %v3915_v4 = vld [vmem:[#allocation2 + $0x9] sm:$0xff]  ;;  %v3914_v57 = vld [vmem:[#allocation2 + $0x1] sm:$0xff] }
 0x238   : > { %6773 = vmatpush3.xpose.msk.msra.mxu0 %vm223_vm1, %v9249_v54  ;;  %v9461_v58 = vld [vmem:[#allocation2 + $0xc8] sm:$0xff] }
 0x239   : > { %6774 = vmatprep.subr.msk.mxu0 %vm223_vm1, %v9253_v49  ;;  %6741 = vmatpush3.xpose.msk.msra.mxu1 %vm223_vm1, %v9257_v16  ;;  %10377 = vst [vmem:[#allocation24_spill] sm:$0xff] %v9461_v58  ;;  %v3882_v27 = vld [vmem:[#allocation2 + $0x8] sm:$0xff] }
 0x23a   : > { %6742 = vmatprep.subr.msk.mxu1 %vm223_vm1, %v9261_v7 }
 0x23c   : > { %6775 = vmatpush3.xpose.msk.msra.mxu0 %vm223_vm1, %v9265_v61 }
 0x23d   : > { %6776 = vmatprep.subr.msk.mxu0 %vm223_vm1, %v9269_v32  ;;  %6743 = vmatpush3.xpose.msk.msra.mxu1 %vm223_vm1, %v9273_v3 }
 0x23e   : > { %6744 = vmatprep.subr.msk.mxu1 %vm223_vm1, %v9277_v37 }
 0x240   : > { %6777 = vmatpush3.xpose.msk.msra.mxu0 %vm223_vm1, %v9281_v46 }
 0x241   : > { %6778 = vmatprep.subr.msk.mxu0 %vm223_vm1, %v9285_v29  ;;  %6745 = vmatpush3.xpose.msk.msra.mxu1 %vm223_vm1, %v9289_v59 }
 0x242   : > { %6746 = vmatprep.subr.msk.mxu1 %vm223_vm1, %v9293_v30 }
 0x244   : > { %6779 = vmatpush3.xpose.msk.msra.mxu0 %vm223_vm1, %v9297_v38 }
 0x245   : > { %6780 = vmatprep.subr.msk.mxu0 %vm223_vm1, %v9301_v6  ;;  %6747 = vmatpush3.xpose.msk.msra.mxu1 %vm223_vm1, %v9305_v44 }
 0x246   : > { %6748 = vmatprep.subr.msk.mxu1 %vm223_vm1, %v9309_v43 }
 0x248   : > { %6781 = vmatpush3.xpose.msk.msra.mxu0 %vm223_vm1, %v9313_v53 }
 0x249   : > { %6782 = vmatprep.subr.msk.mxu0 %vm223_vm1, %v9317_v40  ;;  %6749 = vmatpush3.xpose.msk.msra.mxu1 %vm223_vm1, %v9321_v35 }
 0x24a   : > { %6750 = vmatprep.subr.msk.mxu1 %vm223_vm1, %v9325_v62 }
 0x24c   : > { %6783 = vmatpush3.xpose.msk.msra.mxu0 %vm223_vm1, %v9329_v14 }
 0x24d   : > { %6784 = vmatprep.subr.msk.mxu0 %vm223_vm1, %v9333_v41  ;;  %6751 = vmatpush3.xpose.msk.msra.mxu1 %vm223_vm1, %v9337_v51 }
 0x24e   : > { %6752 = vmatprep.subr.msk.mxu1 %vm223_vm1, %v9341_v48 }
 0x250   : > { %6785 = vmatpush3.xpose.msk.msra.mxu0 %vm223_vm1, %v9345_v36 }
 0x251   : > { %6786 = vmatprep.subr.msk.mxu0 %vm223_vm1, %v9349_v13  ;;  %6753 = vmatpush3.xpose.msk.msra.mxu1 %vm223_vm1, %v9353_v19 }
 0x252   : > { %6754 = vmatprep.subr.msk.mxu1 %vm223_vm1, %v9357_v21 }
 0x254   : > { %6787 = vmatpush3.xpose.msk.msra.mxu0 %vm223_vm1, %v9361_v2 }
 0x255   : > { %6788 = vmatprep.subr.msk.mxu0 %vm223_vm1, %v9365_v0  ;;  %6755 = vmatpush3.xpose.msk.msra.mxu1 %vm223_vm1, %v9369_v11 }
 0x256   : > { %6756 = vmatprep.subr.msk.mxu1 %vm223_vm1, %v9373_v10 }
 0x258   : > { %6789 = vmatpush3.xpose.msk.msra.mxu0 %vm223_vm1, %v9377_v20 }
 0x259   : > { %6790 = vmatprep.subr.msk.mxu0 %vm223_vm1, %v9381_v26  ;;  %6757 = vmatpush3.xpose.msk.msra.mxu1 %vm223_vm1, %v9385_v25 }
 0x25a   : > { %6758 = vmatprep.subr.msk.mxu1 %vm223_vm1, %v9389_v60 }
 0x25c   : > { %6791 = vmatpush3.xpose.msk.msra.mxu0 %vm223_vm1, %v9393_v15 }
 0x25d   : > { %6792 = vmatprep.subr.msk.mxu0 %vm223_vm1, %v9397_v12  ;;  %6759 = vmatpush3.xpose.msk.msra.mxu1 %vm223_vm1, %v9401_v1 }
 0x25e   : > { %6760 = vmatprep.subr.msk.mxu1 %vm223_vm1, %v9405_v9 }
 0x260   : > { %6793 = vmatpush3.xpose.msk.msra.mxu0 %vm223_vm1, %v9409_v28 }
 0x261   : > { %6794 = vmatprep.subr.msk.mxu0 %vm223_vm1, %v9413_v23  ;;  %6761 = vmatpush3.xpose.msk.msra.mxu1 %vm223_vm1, %v9417_v24  ;;  %v9501_v24 = vld [vmem:[#allocation2 + $0x16a] sm:$0xff] }
 0x262   : > { %6762 = vmatprep.subr.msk.mxu1 %vm223_vm1, %v9421_v56  ;;  %v9497_v56 = vld [vmem:[%s10092_s3 + $0x18] sm:$0xff] }
 0x264   : > { %6795 = vmatpush3.xpose.msk.msra.mxu0 %vm223_vm1, %v9425_v8 }
 0x265   : > { %6796 = vmatprep.subr.msk.mxu0 %vm223_vm1, %v9429_v42  ;;  %6763 = vmatpush3.xpose.msk.msra.mxu1 %vm223_vm1, %v9433_v63  ;;  %v9476_v63 = vld [vmem:[#allocation2 + $0x172] sm:$0xff] }
 0x266   : > { %6764 = vmatprep.subr.msk.mxu1 %vm223_vm1, %v9437_v33  ;;  %v3881_v33 = vld [vmem:[#allocation2] sm:$0xff] }
 0x268   : > { %6797 = vmatpush3.xpose.msk.msra.mxu0 %vm223_vm1, %v9441_v47 }
 0x269   : > { %6798 = vmatprep.subr.msk.mxu0 %vm223_vm1, %v9445_v31  ;;  %6765 = vmatpush3.xpose.msk.msra.mxu1 %vm223_vm1, %v9449_v45  ;;  %v9471_v45 = vld [vmem:[#allocation2 + $0xc0] sm:$0xff] }
 0x26a   : > { %6766 = vmatprep.subr.msk.mxu1 %vm223_vm1, %v9453_v55  ;;  %10378 = vst [vmem:[#allocation23_spill] sm:$0xff] %v9471_v45 }
 0x26c   : > { %6799 = vmatpush3.xpose.msk.msra.mxu0 %vm223_vm1, %v9457_v39 }
 0x26d   : > { %6800 = vmatprep.subr.msk.mxu0 %vm223_vm1, %v9461_v58  ;;  %6767 = vmatpush3.xpose.msk.msra.mxu1 %vm223_vm1, %v3915_v4  ;;  %v9483_v4 = vld [vmem:[%s10092_s3 + $0x10] sm:$0xff] }
 0x26e   : > { %6768 = vmatprep.subr.msk.mxu1 %vm223_vm1, %v9466_v52 }
 0x270   : > { %6801 = vmatpush3.xpose.msk.msra.mxu0 %vm223_vm1, %v3882_v27  ;;  %v9486_v27 = vld [vmem:[#allocation2 + $0x188] sm:$0xff] }
 0x271   : > { %6802 = vmatprep.subr.msk.mxu0 %vm223_vm1, %v9471_v45  ;;  %6769 = vmatpush3.xpose.msk.msra.mxu1 %vm223_vm1, %v3914_v57  ;;  %10379 = vst [vmem:[#allocation51_spill] sm:$0xff] %v9486_v27  ;;  %v9492_v57 = vld [vmem:[#allocation2 + $0xb2] sm:$0xff] }
 0x272   : > { %6806 = vmatprep.subr.msk.mxu1 %vm223_vm1, %v9476_v63 }
 0x274   : > { %6803 = vmatpush3.xpose.msk.msra.mxu0 %vm223_vm1, %v3881_v33  ;;  %6771 = vmatmul.mubr.msk.f32.vlgmr.msra.gmra.mxu1 %vm223_vm1, %v9049_v50  ;;  %v9511_v50 = vld [vmem:[#allocation2 + $0x180] sm:$0xff]  ;;  %v9517_v33 = vld [vmem:[#allocation2 + $0xaa] sm:$0xff] }
 0x275   : > { %6840 = vmatprep.subr.msk.mxu0 %vm223_vm1, %v9486_v27  ;;  %6807 = vmatpush3.xpose.msk.msra.mxu1 %vm223_vm1, %v9492_v57  ;;  %10380 = vst [vmem:[#allocation26_spill] sm:$0xff] %v9511_v50  ;;  %v4289_v27 = vld [vmem:[#allocation2 + $0xa] sm:$0xff] }
 0x276   : > { %6838 = vmatprep.mubr.msk.f32.mxu1 %vm223_vm1, %v9483_v4  ;;  %6808 = vmatprep.subr.msk.mxu1 %vm223_vm1, %v9501_v24 }
 0x277   : > { %6805 = vmatmul.mubr.msk.f32.vlgmr.msra.gmra.mxu0 %vm223_vm1, %v9064_v18  ;;  %v9521_v18 = vld [vmem:[#allocation2 + $0x15a] sm:$0xff] }
 0x278   : > { %6841 = vmatpush3.xpose.msk.msra.mxu0 %vm223_vm1, %v9461_v58  ;;  %6872 = vmatprep.mubr.msk.f32.mxu0 %vm223_vm1, %v9497_v56  ;;  %v9529_v58 = vld [vmem:[#allocation2 + $0x9a] sm:$0xff] }
 0x279   : > { %6842 = vmatprep.subr.msk.mxu0 %vm223_vm1, %v9511_v50  ;;  %6809 = vmatpush3.xpose.msk.msra.mxu1 %vm223_vm1, %v9517_v33  ;;  %v9533_v50 = vld [vmem:[#allocation2 + $0x152] sm:$0xff] }
 0x27a   : > { %6810 = vmatprep.subr.msk.mxu1 %vm223_vm1, %v9521_v18 }
 0x27c   : > { %6843 = vmatpush3.xpose.msk.msra.mxu0 %vm223_vm1, %v9471_v45  ;;  %v9541_v45 = vld [vmem:[#allocation2 + $0x92] sm:$0xff] }
 0x27d   : > { %6844 = vmatprep.subr.msk.mxu0 %vm223_vm1, %v9243_v5  ;;  %6811 = vmatpush3.xpose.msk.msra.mxu1 %vm223_vm1, %v9529_v58  ;;  %v9545_v5 = vld [vmem:[#allocation2 + $0x142] sm:$0xff] }
 0x27e   : > { %6812 = vmatprep.subr.msk.mxu1 %vm223_vm1, %v9533_v50 }
 0x280   : > { %6845 = vmatpush3.xpose.msk.msra.mxu0 %vm223_vm1, %v9249_v54  ;;  %v9553_v54 = vld [vmem:[#allocation2 + $0x82] sm:$0xff] }
 0x281   : > { %6846 = vmatprep.subr.msk.mxu0 %vm223_vm1, %v9253_v49  ;;  %6813 = vmatpush3.xpose.msk.msra.mxu1 %vm223_vm1, %v9541_v45  ;;  %v9557_v49 = vld [vmem:[#allocation2 + $0x13a] sm:$0xff] }
 0x282   : > { %6814 = vmatprep.subr.msk.mxu1 %vm223_vm1, %v9545_v5 }
 0x284   : > { %6847 = vmatpush3.xpose.msk.msra.mxu0 %vm223_vm1, %v9265_v61  ;;  %v9565_v61 = vld [vmem:[#allocation2 + $0x7a] sm:$0xff] }
 0x285   : > { %6848 = vmatprep.subr.msk.mxu0 %vm223_vm1, %v9269_v32  ;;  %6815 = vmatpush3.xpose.msk.msra.mxu1 %vm223_vm1, %v9553_v54  ;;  %v9569_v32 = vld [vmem:[#allocation2 + $0x12a] sm:$0xff] }
 0x286   : > { %6816 = vmatprep.subr.msk.mxu1 %vm223_vm1, %v9557_v49 }
 0x288   : > { %6849 = vmatpush3.xpose.msk.msra.mxu0 %vm223_vm1, %v9281_v46  ;;  %v9577_v46 = vld [vmem:[#allocation2 + $0x6a] sm:$0xff] }
 0x289   : > { %6850 = vmatprep.subr.msk.mxu0 %vm223_vm1, %v9285_v29  ;;  %6817 = vmatpush3.xpose.msk.msra.mxu1 %vm223_vm1, %v9565_v61  ;;  %v9581_v29 = vld [vmem:[#allocation2 + $0x122] sm:$0xff] }
 0x28a   : > { %6818 = vmatprep.subr.msk.mxu1 %vm223_vm1, %v9569_v32 }
 0x28c   : > { %6851 = vmatpush3.xpose.msk.msra.mxu0 %vm223_vm1, %v9297_v38  ;;  %v9589_v38 = vld [vmem:[#allocation2 + $0x62] sm:$0xff] }
 0x28d   : > { %6852 = vmatprep.subr.msk.mxu0 %vm223_vm1, %v9301_v6  ;;  %6819 = vmatpush3.xpose.msk.msra.mxu1 %vm223_vm1, %v9577_v46  ;;  %v9593_v6 = vld [vmem:[#allocation2 + $0x112] sm:$0xff] }
 0x28e   : > { %6820 = vmatprep.subr.msk.mxu1 %vm223_vm1, %v9581_v29 }
 0x290   : > { %6853 = vmatpush3.xpose.msk.msra.mxu0 %vm223_vm1, %v9313_v53  ;;  %v9601_v53 = vld [vmem:[#allocation2 + $0x52] sm:$0xff] }
 0x291   : > { %6854 = vmatprep.subr.msk.mxu0 %vm223_vm1, %v9317_v40  ;;  %6821 = vmatpush3.xpose.msk.msra.mxu1 %vm223_vm1, %v9589_v38  ;;  %v9605_v40 = vld [vmem:[#allocation2 + $0x10a] sm:$0xff] }
 0x292   : > { %6822 = vmatprep.subr.msk.mxu1 %vm223_vm1, %v9593_v6  ;;  %10381 = vst [vmem:[#allocation25_spill] sm:$0xff] %v9605_v40 }
 0x294   : > { %6855 = vmatpush3.xpose.msk.msra.mxu0 %vm223_vm1, %v9329_v14  ;;  %v9613_v14 = vld [vmem:[#allocation2 + $0x4a] sm:$0xff] }
 0x295   : > { %6856 = vmatprep.subr.msk.mxu0 %vm223_vm1, %v9333_v41  ;;  %6823 = vmatpush3.xpose.msk.msra.mxu1 %vm223_vm1, %v9601_v53  ;;  %10382 = vst [vmem:[#allocation52_spill] sm:$0xff] %v9613_v14  ;;  %v9617_v41 = vld [vmem:[#allocation2 + $0xfa] sm:$0xff] }
 0x296   : > { %6824 = vmatprep.subr.msk.mxu1 %vm223_vm1, %v9605_v40  ;;  %10383 = vst [vmem:[#allocation28_spill] sm:$0xff] %v9617_v41 }
 0x298   : > { %6857 = vmatpush3.xpose.msk.msra.mxu0 %vm223_vm1, %v9345_v36  ;;  %v9625_v36 = vld [vmem:[#allocation2 + $0x3a] sm:$0xff] }
 0x299   : > { %6858 = vmatprep.subr.msk.mxu0 %vm223_vm1, %v9349_v13  ;;  %6825 = vmatpush3.xpose.msk.msra.mxu1 %vm223_vm1, %v9613_v14  ;;  %10384 = vst [vmem:[#allocation27_spill] sm:$0xff] %v9625_v36  ;;  %v9629_v13 = vld [vmem:[#allocation2 + $0xf2] sm:$0xff] }
 0x29a   : > { %6826 = vmatprep.subr.msk.mxu1 %vm223_vm1, %v9617_v41  ;;  %10385 = vst [vmem:[#allocation53_spill] sm:$0xff] %v9629_v13 }
 0x29c   : > { %6859 = vmatpush3.xpose.msk.msra.mxu0 %vm223_vm1, %v9361_v2  ;;  %v9637_v2 = vld [vmem:[#allocation2 + $0x32] sm:$0xff] }
 0x29d   : > { %6860 = vmatprep.subr.msk.mxu0 %vm223_vm1, %v9365_v0  ;;  %6827 = vmatpush3.xpose.msk.msra.mxu1 %vm223_vm1, %v9625_v36  ;;  %10386 = vst [vmem:[#allocation30_spill] sm:$0xff] %v9637_v2  ;;  %v9641_v0 = vld [vmem:[#allocation2 + $0xe2] sm:$0xff] }
 0x29e   : > { %6828 = vmatprep.subr.msk.mxu1 %vm223_vm1, %v9629_v13 }
 0x2a0   : > { %6861 = vmatpush3.xpose.msk.msra.mxu0 %vm223_vm1, %v9377_v20  ;;  %v9649_v20 = vld [vmem:[#allocation2 + $0x22] sm:$0xff] }
 0x2a1   : > { %6862 = vmatprep.subr.msk.mxu0 %vm223_vm1, %v9381_v26  ;;  %6829 = vmatpush3.xpose.msk.msra.mxu1 %vm223_vm1, %v9637_v2  ;;  %v9653_v26 = vld [vmem:[#allocation2 + $0xda] sm:$0xff] }
 0x2a2   : > { %6830 = vmatprep.subr.msk.mxu1 %vm223_vm1, %v9641_v0 }
 0x2a4   : > { %6863 = vmatpush3.xpose.msk.msra.mxu0 %vm223_vm1, %v9393_v15  ;;  %v9661_v15 = vld [vmem:[#allocation2 + $0x1a] sm:$0xff] }
 0x2a5   : > { %6864 = vmatprep.subr.msk.mxu0 %vm223_vm1, %v9397_v12  ;;  %6831 = vmatpush3.xpose.msk.msra.mxu1 %vm223_vm1, %v9649_v20  ;;  %v9665_v12 = vld [vmem:[#allocation2 + $0xca] sm:$0xff] }
 0x2a6   : > { %6832 = vmatprep.subr.msk.mxu1 %vm223_vm1, %v9653_v26 }
 0x2a8   : > { %6865 = vmatpush3.xpose.msk.msra.mxu0 %vm223_vm1, %v9409_v28  ;;  %v4288_v28 = vld [vmem:[#allocation2 + $0x2] sm:$0xff] }
 0x2a9   : > { %6866 = vmatprep.subr.msk.mxu0 %vm223_vm1, %v9413_v23  ;;  %6833 = vmatpush3.xpose.msk.msra.mxu1 %vm223_vm1, %v9661_v15  ;;  %v9674_v23 = vld [vmem:[#allocation2 + $0xc2] sm:$0xff] }
 0x2aa   : > { %6834 = vmatprep.subr.msk.mxu1 %vm223_vm1, %v9665_v12 }
 0x2ac   : > { %6867 = vmatpush3.xpose.msk.msra.mxu0 %vm223_vm1, %v9425_v8  ;;  %v9683_v8 = vld [vmem:[#allocation2 + $0x189] sm:$0xff] }
 0x2ad   : > { %6868 = vmatprep.subr.msk.mxu0 %vm223_vm1, %v9429_v42  ;;  %6835 = vmatpush3.xpose.msk.msra.mxu1 %vm223_vm1, %v4289_v27  ;;  %v9690_v27 = vld [vmem:[%s10092_s3 + $0x20] sm:$0xff]  ;;  %v9694_v42 = vld [vmem:[#allocation2 + $0x18a] sm:$0xff] }
 0x2ae   : > { %6836 = vmatprep.subr.msk.mxu1 %vm223_vm1, %v9674_v23 }
 0x2b0   : > { %6869 = vmatpush3.xpose.msk.msra.mxu0 %vm223_vm1, %v9441_v47  ;;  %v9707_v47 = vld [vmem:[#allocation2 + $0x181] sm:$0xff] }
 0x2b1   : > { %6870 = vmatprep.subr.msk.mxu0 %vm223_vm1, %v9445_v31  ;;  %6837 = vmatpush3.xpose.msk.msra.mxu1 %vm223_vm1, %v4288_v28  ;;  %v9703_v28 = vld [vmem:[%s10092_s3 + $0x28] sm:$0xff] }
 0x2b2   : > { %6874 = vmatprep.subr.msk.mxu1 %vm223_vm1, %v9683_v8 }
 0x2b4   : > { %6871 = vmatpush3.xpose.msk.msra.mxu0 %vm223_vm1, %v9457_v39  ;;  %6839 = vmatmul.mubr.msk.f32.vlgmr.msra.gmra.mxu1 %vm223_vm1, %v9483_v4  ;;  %v9717_v39 = vld [vmem:[#allocation2 + $0x182] sm:$0xff] }
 0x2b5   : > { %6908 = vmatprep.subr.msk.mxu0 %vm223_vm1, %v9694_v42  ;;  %6875 = vmatpush3.xpose.msk.msra.mxu1 %vm223_vm1, %v9453_v55  ;;  %v10388_v4 = vld [vmem:[#allocation20_spill] sm:$0xff] }
 0x2b6   : > { %6906 = vmatprep.mubr.msk.f32.mxu1 %vm223_vm1, %v9690_v27  ;;  %6876 = vmatprep.subr.msk.mxu1 %vm223_vm1, %v9707_v47 }
 0x2b7   : > { %6873 = vmatmul.mubr.msk.f32.vlgmr.msra.gmra.mxu0 %vm223_vm1, %v9497_v56  ;;  %v10387_v56 = vld [vmem:[#allocation47_spill] sm:$0xff] }
 0x2b8   : > { %6909 = vmatpush3.xpose.msk.msra.mxu0 %vm223_vm1, %v9665_v12  ;;  %6940 = vmatprep.mubr.msk.f32.mxu0 %vm223_vm1, %v9703_v28 }
 0x2b9   : > { %6910 = vmatprep.subr.msk.mxu0 %vm223_vm1, %v9717_v39  ;;  %6877 = vmatpush3.xpose.msk.msra.mxu1 %vm223_vm1, %v9466_v52 }
 0x2ba   : > { %6878 = vmatprep.subr.msk.mxu1 %vm223_vm1, %v9233_v22 }
 0x2bc   : > { %6911 = vmatpush3.xpose.msk.msra.mxu0 %vm223_vm1, %v9674_v23 }
 0x2bd   : > { %6912 = vmatprep.subr.msk.mxu0 %vm223_vm1, %v9476_v63  ;;  %6879 = vmatpush3.xpose.msk.msra.mxu1 %vm223_vm1, %v9237_v17 }
 0x2be   : > { %6880 = vmatprep.subr.msk.mxu1 %vm223_vm1, %v9241_v34 }
 0x2c0   : > { %6913 = vmatpush3.xpose.msk.msra.mxu0 %vm223_vm1, %v9492_v57 }
 0x2c1   : > { %6914 = vmatprep.subr.msk.mxu0 %vm223_vm1, %v9501_v24  ;;  %6881 = vmatpush3.xpose.msk.msra.mxu1 %vm223_vm1, %v9257_v16 }
 0x2c2   : > { %6882 = vmatprep.subr.msk.mxu1 %vm223_vm1, %v9261_v7 }
 0x2c4   : > { %6915 = vmatpush3.xpose.msk.msra.mxu0 %vm223_vm1, %v9517_v33 }
 0x2c5   : > { %6916 = vmatprep.subr.msk.mxu0 %vm223_vm1, %v9521_v18  ;;  %6883 = vmatpush3.xpose.msk.msra.mxu1 %vm223_vm1, %v9273_v3 }
 0x2c6   : > { %6884 = vmatprep.subr.msk.mxu1 %vm223_vm1, %v9277_v37 }
 0x2c8   : > { %6917 = vmatpush3.xpose.msk.msra.mxu0 %vm223_vm1, %v9529_v58 }
 0x2c9   : > { %6918 = vmatprep.subr.msk.mxu0 %vm223_vm1, %v9533_v50  ;;  %6885 = vmatpush3.xpose.msk.msra.mxu1 %vm223_vm1, %v9289_v59 }
 0x2ca   : > { %6886 = vmatprep.subr.msk.mxu1 %vm223_vm1, %v9293_v30 }
 0x2cc   : > { %6919 = vmatpush3.xpose.msk.msra.mxu0 %vm223_vm1, %v9541_v45 }
 0x2cd   : > { %6920 = vmatprep.subr.msk.mxu0 %vm223_vm1, %v9545_v5  ;;  %6887 = vmatpush3.xpose.msk.msra.mxu1 %vm223_vm1, %v9305_v44 }
 0x2ce   : > { %6888 = vmatprep.subr.msk.mxu1 %vm223_vm1, %v9309_v43 }
 0x2d0   : > { %6921 = vmatpush3.xpose.msk.msra.mxu0 %vm223_vm1, %v9553_v54 }
 0x2d1   : > { %6922 = vmatprep.subr.msk.mxu0 %vm223_vm1, %v9557_v49  ;;  %6889 = vmatpush3.xpose.msk.msra.mxu1 %vm223_vm1, %v9321_v35 }
 0x2d2   : > { %6890 = vmatprep.subr.msk.mxu1 %vm223_vm1, %v9325_v62 }
 0x2d4   : > { %6923 = vmatpush3.xpose.msk.msra.mxu0 %vm223_vm1, %v9565_v61 }
 0x2d5   : > { %6924 = vmatprep.subr.msk.mxu0 %vm223_vm1, %v9569_v32  ;;  %6891 = vmatpush3.xpose.msk.msra.mxu1 %vm223_vm1, %v9337_v51 }
 0x2d6   : > { %6892 = vmatprep.subr.msk.mxu1 %vm223_vm1, %v9341_v48 }
 0x2d8   : > { %6925 = vmatpush3.xpose.msk.msra.mxu0 %vm223_vm1, %v9577_v46 }
 0x2d9   : > { %6926 = vmatprep.subr.msk.mxu0 %vm223_vm1, %v9581_v29  ;;  %6893 = vmatpush3.xpose.msk.msra.mxu1 %vm223_vm1, %v9353_v19 }
 0x2da   : > { %6894 = vmatprep.subr.msk.mxu1 %vm223_vm1, %v9357_v21 }
 0x2dc   : > { %6927 = vmatpush3.xpose.msk.msra.mxu0 %vm223_vm1, %v9589_v38 }
 0x2dd   : > { %6928 = vmatprep.subr.msk.mxu0 %vm223_vm1, %v9593_v6  ;;  %6895 = vmatpush3.xpose.msk.msra.mxu1 %vm223_vm1, %v9369_v11 }
 0x2de   : > { %6896 = vmatprep.subr.msk.mxu1 %vm223_vm1, %v9373_v10 }
 0x2e0   : > { %6929 = vmatpush3.xpose.msk.msra.mxu0 %vm223_vm1, %v9601_v53 }
 0x2e1   : > { %6930 = vmatprep.subr.msk.mxu0 %vm223_vm1, %v9605_v40  ;;  %6897 = vmatpush3.xpose.msk.msra.mxu1 %vm223_vm1, %v9385_v25  ;;  %v5142_v40 = vld [vmem:[#allocation2 + $0x198] sm:$0xff] }
 0x2e2   : > { %6898 = vmatprep.subr.msk.mxu1 %vm223_vm1, %v9389_v60 }
 0x2e4   : > { %6931 = vmatpush3.xpose.msk.msra.mxu0 %vm223_vm1, %v9613_v14  ;;  %v10390_v14 = vld [vmem:[#allocation21_spill] sm:$0xff] }
 0x2e5   : > { %6932 = vmatprep.subr.msk.mxu0 %vm223_vm1, %v9617_v41  ;;  %6899 = vmatpush3.xpose.msk.msra.mxu1 %vm223_vm1, %v9401_v1  ;;  %v10389_v41 = vld [vmem:[#allocation22_spill] sm:$0xff] }
 0x2e6   : > { %6900 = vmatprep.subr.msk.mxu1 %vm223_vm1, %v9405_v9 }
 0x2e8   : > { %6933 = vmatpush3.xpose.msk.msra.mxu0 %vm223_vm1, %v9625_v36  ;;  %v10391_v36 = vld [vmem:[#allocation50_spill] sm:$0xff] }
 0x2e9   : > { %6934 = vmatprep.subr.msk.mxu0 %vm223_vm1, %v9629_v13  ;;  %6901 = vmatpush3.xpose.msk.msra.mxu1 %vm223_vm1, %v10387_v56  ;;  %v5143_v13 = vld [vmem:[#allocation2 + $0x1a0] sm:$0xff] }
 0x2ea   : > { %6902 = vmatprep.subr.msk.mxu1 %vm223_vm1, %v10388_v4 }
 0x2ec   : > { %6935 = vmatpush3.xpose.msk.msra.mxu0 %vm223_vm1, %v9637_v2  ;;  %v5349_v2 = vld [vmem:[#allocation2 + $0x1a1] sm:$0xff] }
 0x2ed   : > { %6936 = vmatprep.subr.msk.mxu0 %vm223_vm1, %v9641_v0  ;;  %6903 = vmatpush3.xpose.msk.msra.mxu1 %vm223_vm1, %v10389_v41  ;;  %v9841_v41 = vld [vmem:[%s10092_s3 + $0x30] sm:$0xff] }
 0x2ee   : > { %6904 = vmatprep.subr.msk.mxu1 %vm223_vm1, %v10390_v14 }
 0x2f0   : > { %6937 = vmatpush3.xpose.msk.msra.mxu0 %vm223_vm1, %v9649_v20  ;;  %v5348_v20 = vld [vmem:[#allocation2 + $0x199] sm:$0xff] }
 0x2f1   : > { %6938 = vmatprep.subr.msk.mxu0 %vm223_vm1, %v9653_v26  ;;  %6905 = vmatpush3.xpose.msk.msra.mxu1 %vm223_vm1, %v10391_v36  ;;  %v9851_v36 = vld [vmem:[%s10092_s3 + $0x38] sm:$0xff] }
 0x2f2   : > { %6942 = vmatprep.subr.msk.mxu1 %vm223_vm1, %v5143_v13  ;;  %v10392_v13 = vld [vmem:[#allocation48_spill] sm:$0xff] }
 0x2f4   : > { %6939 = vmatpush3.xpose.msk.msra.mxu0 %vm223_vm1, %v9661_v15  ;;  %6907 = vmatmul.mubr.msk.f32.vlgmr.msra.gmra.mxu1 %vm223_vm1, %v9690_v27  ;;  %v10395_v15 = vld [vmem:[#allocation26_spill] sm:$0xff] }
 0x2f5   : > { %6976 = vmatprep.subr.msk.mxu0 %vm223_vm1, %v5349_v2  ;;  %6943 = vmatpush3.xpose.msk.msra.mxu1 %vm223_vm1, %v10392_v13  ;;  %v10393_v2 = vld [vmem:[#allocation51_spill] sm:$0xff]  ;;  %v10397_v27 = vld [vmem:[#allocation6_spill] sm:$0xff] }
 0x2f6   : > { %6974 = vmatprep.mubr.msk.f32.mxu1 %vm223_vm1, %v9841_v41  ;;  %6944 = vmatprep.subr.msk.mxu1 %vm223_vm1, %v5142_v40  ;;  %v10394_v40 = vld [vmem:[#allocation24_spill] sm:$0xff] }
 0x2f7   : > { %6941 = vmatmul.mubr.msk.f32.vlgmr.msra.gmra.mxu0 %vm223_vm1, %v9703_v28  ;;  %v10401_v28 = vld [vmem:[#allocation7_spill] sm:$0xff] }
 0x2f8   : > { %6977 = vmatpush3.xpose.msk.msra.mxu0 %vm223_vm1, %v10388_v4  ;;  %7008 = vmatprep.mubr.msk.f32.mxu0 %vm223_vm1, %v9851_v36 }
 0x2f9   : > { %6978 = vmatprep.subr.msk.mxu0 %vm223_vm1, %v5348_v20  ;;  %6945 = vmatpush3.xpose.msk.msra.mxu1 %vm223_vm1, %v9445_v31  ;;  %v10396_v31 = vld [vmem:[#allocation23_spill] sm:$0xff] }
 0x2fa   : > { %6946 = vmatprep.subr.msk.mxu1 %vm223_vm1, %v10393_v2 }
 0x2fc   : > { %6979 = vmatpush3.xpose.msk.msra.mxu0 %vm223_vm1, %v10390_v14  ;;  %v10398_v14 = vld [vmem:[#allocation41_spill] sm:$0xff] }
 0x2fd   : > { %6980 = vmatprep.subr.msk.mxu0 %vm223_vm1, %v9683_v8  ;;  %6947 = vmatpush3.xpose.msk.msra.mxu1 %vm223_vm1, %v10394_v40  ;;  %v10399_v8 = vld [vmem:[#allocation49_spill] sm:$0xff] }
 0x2fe   : > { %6948 = vmatprep.subr.msk.mxu1 %vm223_vm1, %v10395_v15 }
 0x300   : > { %6981 = vmatpush3.xpose.msk.msra.mxu0 %vm223_vm1, %v9453_v55  ;;  %v10400_v55 = vld [vmem:[#allocation8_spill] sm:$0xff] }
 0x301   : > { %6982 = vmatprep.subr.msk.mxu0 %vm223_vm1, %v9707_v47  ;;  %6949 = vmatpush3.xpose.msk.msra.mxu1 %vm223_vm1, %v10396_v31 }
 0x302   : > { %6950 = vmatprep.subr.msk.mxu1 %vm223_vm1, %v10397_v27 }
 0x304   : > { %6983 = vmatpush3.xpose.msk.msra.mxu0 %vm223_vm1, %v9466_v52  ;;  %v10403_v52 = vld [vmem:[#allocation10_spill] sm:$0xff] }
 0x305   : > { %6984 = vmatprep.subr.msk.mxu0 %vm223_vm1, %v9233_v22  ;;  %6951 = vmatpush3.xpose.msk.msra.mxu1 %vm223_vm1, %v10398_v14  ;;  %v10402_v22 = vld [vmem:[#allocation42_spill] sm:$0xff] }
 0x306   : > { %6952 = vmatprep.subr.msk.mxu1 %vm223_vm1, %v10399_v8 }
 0x308   : > { %6985 = vmatpush3.xpose.msk.msra.mxu0 %vm223_vm1, %v9237_v17  ;;  %v10404_v17 = vld [vmem:[#allocation9_spill] sm:$0xff] }
 0x309   : > { %6986 = vmatprep.subr.msk.mxu0 %vm223_vm1, %v9241_v34  ;;  %6953 = vmatpush3.xpose.msk.msra.mxu1 %vm223_vm1, %v10400_v55  ;;  %v10405_v34 = vld [vmem:[#allocation54_spill] sm:$0xff] }
 0x30a   : > { %6954 = vmatprep.subr.msk.mxu1 %vm223_vm1, %v10401_v28 }
 0x30c   : > { %6987 = vmatpush3.xpose.msk.msra.mxu0 %vm223_vm1, %v9257_v16  ;;  %v10406_v16 = vld [vmem:[#allocation43_spill] sm:$0xff] }
 0x30d   : > { %6988 = vmatprep.subr.msk.mxu0 %vm223_vm1, %v9261_v7  ;;  %6955 = vmatpush3.xpose.msk.msra.mxu1 %vm223_vm1, %v10402_v22  ;;  %v10407_v7 = vld [vmem:[#allocation12_spill] sm:$0xff] }
 0x30e   : > { %6956 = vmatprep.subr.msk.mxu1 %vm223_vm1, %v10403_v52 }
 0x310   : > { %6989 = vmatpush3.xpose.msk.msra.mxu0 %vm223_vm1, %v9273_v3  ;;  %v10408_v3 = vld [vmem:[#allocation11_spill] sm:$0xff] }
 0x311   : > { %6990 = vmatprep.subr.msk.mxu0 %vm223_vm1, %v9277_v37  ;;  %6957 = vmatpush3.xpose.msk.msra.mxu1 %vm223_vm1, %v10404_v17  ;;  %v10409_v37 = vld [vmem:[#allocation44_spill] sm:$0xff] }
 0x312   : > { %6958 = vmatprep.subr.msk.mxu1 %vm223_vm1, %v10405_v34 }
 0x314   : > { %6991 = vmatpush3.xpose.msk.msra.mxu0 %vm223_vm1, %v9289_v59  ;;  %v10410_v59 = vld [vmem:[#allocation57_spill] sm:$0xff] }
 0x315   : > { %6992 = vmatprep.subr.msk.mxu0 %vm223_vm1, %v9293_v30  ;;  %6959 = vmatpush3.xpose.msk.msra.mxu1 %vm223_vm1, %v10406_v16  ;;  %v10411_v30 = vld [vmem:[#allocation14_spill] sm:$0xff] }
 0x316   : > { %6960 = vmatprep.subr.msk.mxu1 %vm223_vm1, %v10407_v7 }
 0x318   : > { %6993 = vmatpush3.xpose.msk.msra.mxu0 %vm223_vm1, %v9305_v44  ;;  %v10412_v44 = vld [vmem:[#allocation13_spill] sm:$0xff] }
 0x319   : > { %6994 = vmatprep.subr.msk.mxu0 %vm223_vm1, %v9309_v43  ;;  %6961 = vmatpush3.xpose.msk.msra.mxu1 %vm223_vm1, %v10408_v3  ;;  %v10413_v43 = vld [vmem:[#allocation45_spill] sm:$0xff] }
 0x31a   : > { %6962 = vmatprep.subr.msk.mxu1 %vm223_vm1, %v10409_v37 }
 0x31c   : > { %6995 = vmatpush3.xpose.msk.msra.mxu0 %vm223_vm1, %v9321_v35  ;;  %v10414_v35 = vld [vmem:[#allocation60_spill] sm:$0xff] }
 0x31d   : > { %6996 = vmatprep.subr.msk.mxu0 %vm223_vm1, %v9325_v62  ;;  %6963 = vmatpush3.xpose.msk.msra.mxu1 %vm223_vm1, %v10410_v59  ;;  %v10415_v62 = vld [vmem:[#allocation16_spill] sm:$0xff] }
 0x31e   : > { %6964 = vmatprep.subr.msk.mxu1 %vm223_vm1, %v10411_v30 }
 0x320   : > { %6997 = vmatpush3.xpose.msk.msra.mxu0 %vm223_vm1, %v9337_v51  ;;  %v10416_v51 = vld [vmem:[#allocation15_spill] sm:$0xff] }
 0x321   : > { %6998 = vmatprep.subr.msk.mxu0 %vm223_vm1, %v9341_v48  ;;  %6965 = vmatpush3.xpose.msk.msra.mxu1 %vm223_vm1, %v10412_v44  ;;  %v10417_v48 = vld [vmem:[#allocation46_spill] sm:$0xff] }
 0x322   : > { %6966 = vmatprep.subr.msk.mxu1 %vm223_vm1, %v10413_v43 }
 0x324   : > { %6999 = vmatpush3.xpose.msk.msra.mxu0 %vm223_vm1, %v9353_v19  ;;  %v10418_v19 = vld [vmem:[#allocation18_spill] sm:$0xff] }
 0x325   : > { %7000 = vmatprep.subr.msk.mxu0 %vm223_vm1, %v9357_v21  ;;  %6967 = vmatpush3.xpose.msk.msra.mxu1 %vm223_vm1, %v10414_v35  ;;  %v10419_v21 = vld [vmem:[#allocation17_spill] sm:$0xff] }
 0x326   : > { %6968 = vmatprep.subr.msk.mxu1 %vm223_vm1, %v10415_v62 }
 0x328   : > { %7001 = vmatpush3.xpose.msk.msra.mxu0 %vm223_vm1, %v9369_v11  ;;  %v5555_v11 = vld [vmem:[#allocation2 + $0x1a2] sm:$0xff] }
 0x329   : > { %7002 = vmatprep.subr.msk.mxu0 %vm223_vm1, %v9373_v10  ;;  %6969 = vmatpush3.xpose.msk.msra.mxu1 %vm223_vm1, %v10416_v51  ;;  %v10420_v10 = vld [vmem:[#allocation19_spill] sm:$0xff] }
 0x32a   : > { %6970 = vmatprep.subr.msk.mxu1 %vm223_vm1, %v10417_v48 }
 0x32c   : > { %7003 = vmatpush3.xpose.msk.msra.mxu0 %vm223_vm1, %v9385_v25  ;;  %v6400_v25 = vld [vmem:[%s10092_s3 + $0x40] sm:$0xff] }
 0x32d   : > { %7004 = vmatprep.subr.msk.mxu0 %vm223_vm1, %v9389_v60  ;;  %6971 = vmatpush3.xpose.msk.msra.mxu1 %vm223_vm1, %v10418_v19  ;;  %v5554_v60 = vld [vmem:[#allocation2 + $0x19a] sm:$0xff] }
 0x32e   : > { %6972 = vmatprep.subr.msk.mxu1 %vm223_vm1, %v10419_v21 }
 0x330   : > { %7005 = vmatpush3.xpose.msk.msra.mxu0 %vm223_vm1, %v9401_v1  ;;  %v5730_v1 = vld [vmem:[%s10093_s4] sm:$0xff] }
 0x331   : > { %7006 = vmatprep.subr.msk.mxu0 %vm223_vm1, %v9405_v9  ;;  %6973 = vmatpush3.xpose.msk.msra.mxu1 %vm223_vm1, %v10420_v10  ;;  %v7599_v9 = vmov 0  }
 0x332   : > { %7010 = vmatprep.subr.msk.mxu1 %vm223_vm1, %v5555_v11  ;;  %7535 = vset.pattern.permute.xlu0 %v7599_v9 }
 0x333   : > { %5733 = vperm.xlu0 %7535, %v5730_v1  }
 0x334   : > { %7007 = vmatpush3.xpose.msk.msra.mxu0 %vm223_vm1, %v10387_v56  ;;  %6975 = vmatmul.mubr.msk.f32.vlgmr.msra.gmra.mxu1 %vm223_vm1, %v9841_v41 }
 0x335   : > { %7011 = vmatpush3.xpose.msk.msra.mxu1 %vm223_vm1, %v9641_v0  ;;  %7042 = vmatprep.mubr.msk.f32.mxu1 %vm223_vm1, %v6400_v25 }
 0x336   : > { %7012 = vmatprep.subr.msk.mxu1 %vm223_vm1, %v5554_v60 }
 0x337   : > { %7009 = vmatmul.mubr.msk.f32.vlgmr.msra.gmra.mxu0 %vm223_vm1, %v9851_v36 }
 0x339   : > { %7013 = vmatpush3.xpose.msk.msra.mxu1 %vm223_vm1, %v9653_v26 }
 0x33a   : > { %7014 = vmatprep.subr.msk.mxu1 %vm223_vm1, %v9694_v42 }
 0x33d   : > { %7015 = vmatpush3.xpose.msk.msra.mxu1 %vm223_vm1, %v9665_v12 }
 0x33e   : > { %7016 = vmatprep.subr.msk.mxu1 %vm223_vm1, %v9717_v39 }
 0x341   : > { %7017 = vmatpush3.xpose.msk.msra.mxu1 %vm223_vm1, %v9674_v23 }
 0x342   : > { %7018 = vmatprep.subr.msk.mxu1 %vm223_vm1, %v9476_v63 }
 0x345   : > { %7019 = vmatpush3.xpose.msk.msra.mxu1 %vm223_vm1, %v9492_v57 }
 0x346   : > { %7020 = vmatprep.subr.msk.mxu1 %vm223_vm1, %v9501_v24 }
 0x349   : > { %7021 = vmatpush3.xpose.msk.msra.mxu1 %vm223_vm1, %v9517_v33 }
 0x34a   : > { %7022 = vmatprep.subr.msk.mxu1 %vm223_vm1, %v9521_v18 }
 0x34d   : > { %7023 = vmatpush3.xpose.msk.msra.mxu1 %vm223_vm1, %v9529_v58 }
 0x34e   : > { %7024 = vmatprep.subr.msk.mxu1 %vm223_vm1, %v9533_v50 }
 0x351   : > { %7025 = vmatpush3.xpose.msk.msra.mxu1 %vm223_vm1, %v9541_v45 }
 0x352   : > { %7026 = vmatprep.subr.msk.mxu1 %vm223_vm1, %v9545_v5  ;;  %v10421_v5 = vld [vmem:[#allocation25_spill] sm:$0xff] }
 0x355   : > { %7027 = vmatpush3.xpose.msk.msra.mxu1 %vm223_vm1, %v9553_v54  ;;  %v10422_v54 = vld [vmem:[#allocation52_spill] sm:$0xff] }
 0x356   : > { %7028 = vmatprep.subr.msk.mxu1 %vm223_vm1, %v9557_v49  ;;  %v10423_v49 = vld [vmem:[#allocation28_spill] sm:$0xff] }
 0x359   : > { %7029 = vmatpush3.xpose.msk.msra.mxu1 %vm223_vm1, %v9565_v61  ;;  %v10424_v61 = vld [vmem:[#allocation27_spill] sm:$0xff] }
 0x35a   : > { %7030 = vmatprep.subr.msk.mxu1 %vm223_vm1, %v9569_v32  ;;  %v10425_v32 = vld [vmem:[#allocation53_spill] sm:$0xff] }
 0x35d   : > { %7031 = vmatpush3.xpose.msk.msra.mxu1 %vm223_vm1, %v9577_v46  ;;  %v10426_v46 = vld [vmem:[#allocation30_spill] sm:$0xff] }
 0x35e   : > { %7032 = vmatprep.subr.msk.mxu1 %vm223_vm1, %v9581_v29  ;;  %v4113_v29 = vpop.f32.mrf.mxu1 }
 0x361   : > { %7033 = vmatpush3.xpose.msk.msra.mxu1 %vm223_vm1, %v9589_v38  ;;  %v4115_v38 = vpop.f32.mrf.mxu1 }
 0x362   : > { %7034 = vmatprep.subr.msk.mxu1 %vm223_vm1, %v9593_v6  ;;  %v4283_v6 = vpop.f32.mrf.mxu0 }
 0x363   : > { %v4284_v26 = vadd.f32 %v4283_v6, %v4113_v29 }
 0x364   : > { %v4285_v0 = vpop.f32.mrf.mxu0 }
 0x365   : > { %7035 = vmatpush3.xpose.msk.msra.mxu1 %vm223_vm1, %v9601_v53  ;;  %v4286_v24 = vadd.f32 %v4285_v0, %v4115_v38 }
 0x366   : > { %7036 = vmatprep.subr.msk.mxu1 %vm223_vm1, %v10421_v5 }
 0x369   : > { %7037 = vmatpush3.xpose.msk.msra.mxu1 %vm223_vm1, %v10422_v54 }
 0x36a   : > { %7038 = vmatprep.subr.msk.mxu1 %vm223_vm1, %v10423_v49 }
 0x36d   : > { %7039 = vmatpush3.xpose.msk.msra.mxu1 %vm223_vm1, %v10424_v61 }
 0x36e   : > { %7040 = vmatprep.subr.msk.mxu1 %vm223_vm1, %v10425_v32 }
 0x371   : > { %7041 = vmatpush3.xpose.msk.msra.mxu1 %vm223_vm1, %v10426_v46 }
 0x374   : > { %7043 = vmatmul.mubr.msk.f32.vlgmr.msra.gmra.mxu1 %vm223_vm1, %v6400_v25  ;;  %v4487_v53 = vpop.f32.mrf.mxu1 }
 0x375   : > { %v4492_v42 = vadd.f32 %v4487_v53, %v4284_v26 }
 0x376   : > { %v4489_v12 = vpop.f32.mrf.mxu1 }
 0x377   : > { %v4693_v23 = vpop.f32.mrf.mxu0  ;;  %v4493_v45 = vadd.f32 %v4489_v12, %v4286_v24 }
 0x378   : > { %v4698_v57 = vadd.f32 %v4693_v23, %v4492_v42 }
 0x379   : > { %v4695_v58 = vpop.f32.mrf.mxu0 }
 0x37a   : > { %v4699_v18 = vadd.f32 %v4695_v58, %v4493_v45 }
 0x3ae   : > { %v5734_v14 = vpop.permute.xlu0 %5733 }
 0x3b4   : > { %v4899_v63 = vpop.f32.mrf.mxu1 }
 0x3b5   : > { %v4904_v47 = vadd.f32 %v4899_v63, %v4698_v57 }
 0x3b6   : > { %v4901_v50 = vpop.f32.mrf.mxu1 }
 0x3b7   : > { %v5105_v33 = vpop.f32.mrf.mxu0  ;;  %v4905_v56 = vadd.f32 %v4901_v50, %v4699_v18 }
 0x3b8   : > { %v5110_v41 = vadd.f32 %v5105_v33, %v4904_v47 }
 0x3b9   : > { %v5107_v4 = vpop.f32.mrf.mxu0 }
 0x3ba   : > { %v5111_v20 = vadd.f32 %v5107_v4, %v4905_v56 }
 0x3f4   : > { %v5311_v39 = vpop.f32.mrf.mxu1 }
 0x3f5   : > { %v5316_v2 = vadd.f32 %v5311_v39, %v5110_v41 }
 0x3f6   : > { %v5313_v36 = vpop.f32.mrf.mxu1 }
 0x3f7   : > { %v5517_v13 = vpop.f32.mrf.mxu0  ;;  %v5317_v40 = vadd.f32 %v5313_v36, %v5111_v20 }
 0x3f8   : > { %v5522_v31 = vadd.f32 %v5517_v13, %v5316_v2 }
 0x3f9   : > { %v5519_v15 = vpop.f32.mrf.mxu0 }
 0x3fa   : > { %v5523_v8 = vadd.f32 %v5519_v15, %v5317_v40 }
 0x434   : > { %v5723_v27 = vpop.f32.mrf.mxu1 }
 0x435   : > { %v5728_v55 = vadd.f32 %v5723_v27, %v5522_v31 }
 0x436   : > { %v5725_v28 = vpop.f32.mrf.mxu1 }
 0x437   : > { %v5736_v22 = vadd.f32 %v5734_v14, %v5728_v55  ;;  %v5729_v52 = vadd.f32 %v5725_v28, %v5523_v8 }
 0x439   : > { %v5738_v17 = vmax.f32 %v5736_v22, 0.0  ;;  %v5737_v34 = vadd.f32 %v5734_v14, %v5729_v52 }
 0x43b   : > { %5740 = vst [vmem:[%s217_s30] sm:$0xff] %v5738_v17  ;;  %v5739_v16 = vmax.f32 %v5737_v34, 0.0 }
 0x43d   : > { %5741 = vst [vmem:[%s217_s30 + $0x8] sm:$0xff] %v5739_v16 }
 0x43e   : > { %7549 = shalt.err (!%p7546_p3)
}
 0x43f   : > { %s7550_s14 = scalar_lea.hbm %s5755_s9, 256  ;;  %s7554_s17 = scalar_lea.hbm %s10094_s5, 512 }
 0x440   : > { %p7551_p4 = scmp.ne.s32.totalorder %s5755_s9, %s7550_s14  ;;  %p7555_p9 = scmp.lt.s32.totalorder %s5755_s9, %s10094_s5 }
 0x441   : > { %p7556_p10 = scmp.lt.s32.totalorder %s7554_s17, %s7550_s14 }
 0x442   : > { %p7552_p7 = pnand %p7551_p4, %p7669_p5 }
 0x443   : > { %p7557_p11 = por %p7556_p10, %p7555_p9 }
 0x444   : > { %p7553_p8 = pneg %p7552_p7 }
 0x446   : > { %p7558_p12 = pnand %p7557_p11, %p7553_p8 }
 0x448   : > { %7561 = shalt.err (!%p7558_p12)
}
 0x449   : > { %7494 = dma.vmem_to_hbm [thread:$0]  (%p7669_p5), %s5758_s6, 256, %s5755_s9, %s5743_s10  }
 0x44a PF: > { %p7500_p13 = scmp.ge.s32.totalorder %s7596_s21, 2  ;;  %s5769_s26 = sand.u32 1, %s7584_s18  }
 0x44b   : > { %s5770_s30 = scalar_lea.sflag [#allocation4], %s5769_s26 }
 0x44c   : > { %p7497_p0 = pnand %p7500_p13, %p7673_p6 }
 0x44e   : > { %p7498_p1 = pneg %p7497_p0 }
 0x450   : > { %7579 = dma.done.wait (%p7498_p1), %s5770_s30, 256  }
 0x451   : > { %7581 = vsyncadd (%p7498_p1), %s5770_s30, 4294967040  ;;  %p15_p2 = scmp.ge.s32.totalorder %s7656_s24, 4   ;;  %s10427_s18 = smov %s7588_s19 }
 0x452   : > { %s10428_s19 = smov %s7592_s20  ;;  %s10429_s20 = smov %s7667_s27 }
 0x453   : > { %s10430_s21 = smov %s7656_s24  ;;  %17 = sbr.rel (!%p15_p2) target bundleno = 3 (0x3), region = 94 }
 0x458   :  { %5775 = vsyncpa [#allocation4], 1 }
 0x459   :  { %5777 = vsyncpa [#allocation4 + $0x1], 1 }

</bundles_post_ra>
